<compile_context>
chip_gen: v5e
topology: v5e:2x2
jax: 0.10.0
libtpu: 0.0.40
codegen_flags: <defaults>
</compile_context>

<pallas_src>
import math

import jax
import jax.numpy as jnp
from jax import lax
from jax.experimental import pallas as pl
from jax.experimental.pallas import tpu as pltpu

NUM_HEADS = 1     # trans_num_heads (PyTorch default)
ALPHA = 0.5       # residual mixing coefficient inside TransConv

# vectors stored one-per-row in the vector table (widths: H except qkv_b = 3H)
_VEC_NAMES = ("fc0_b", "lin0_b", "ln0_g", "ln0_b", "qkv_b", "ln1_g", "ln1_b",
              "bn0_s", "bn0_t", "gcn_b", "lin1_b", "bn1_s", "bn1_t", "fc_b")


# --------------------------- parameter slab layout ----------------------------

def build_layout(in_ch, hidden, out_ch, num_blocks, num_heads=NUM_HEADS):
    """Static (Python-int) row offsets for the packed matrix / vector slabs."""
    H = hidden
    hd = H * num_heads
    mat_w = max(3 * hd, 2 * H, H, out_ch)
    vec_w = max(3 * hd, H, out_ch)
    mrow = [0]
    vrow = [0]

    def add_mat(L, name, nrows, ncols):
        L[name] = (mrow[0], nrows, ncols)
        mrow[0] += nrows                      # all nrows are multiples of 8

    def add_vec(L, name, ncols):
        L[name] = (vrow[0], ncols)
        vrow[0] += 1

    blocks = []
    for b in range(num_blocks):
        f_in = in_ch if b == 0 else H
        L = {}
        add_mat(L, "in_w", f_in, 2 * H)       # [fc0_w | lin0_w]   (shared-LHS fusion)
        add_mat(L, "qkv_w", H, 3 * hd)        # [Wq | Wk | Wv]
        add_mat(L, "gcn_w", 2 * H, H)         # [W0 ; W1]          (row-stacked GCN weights)
        add_mat(L, "lin1_w", H, H)
        add_mat(L, "fc_w", 2 * H, H)          # combine head
        for name in _VEC_NAMES:
            add_vec(L, name, 3 * hd if name == "qkv_b" else H)
        blocks.append(L)

    proj = {}
    add_mat(proj, "proj_w", H, out_ch)
    add_vec(proj, "proj_b", out_ch)
    return {"blocks": blocks, "proj": proj,
            "mat_rows": mrow[0], "vec_rows": vrow[0],
            "mat_w": mat_w, "vec_w": vec_w}


def pack_params(params, layout):
    """Pack individual parameter arrays into the two slabs (done once, host side)."""
    mat = jnp.zeros((layout["mat_rows"], layout["mat_w"]), jnp.float32)
    vec = jnp.zeros((layout["vec_rows"], layout["vec_w"]), jnp.float32)

    def put_m(dst, entry, value):
        r0, nr, nc = entry
        return dst.at[r0:r0 + nr, 0:nc].set(value)

    def put_v(dst, entry, value):
        r0, nc = entry
        return dst.at[r0:r0 + 1, 0:nc].set(jnp.reshape(value, (1, nc)))

    for b, bp in enumerate(params["blocks"]):
        L = layout["blocks"][b]
        mat = put_m(mat, L["in_w"], jnp.concatenate([bp["fc0_w"], bp["lin0_w"]], axis=1))
        mat = put_m(mat, L["qkv_w"], bp["qkv_w"])
        mat = put_m(mat, L["gcn_w"], jnp.concatenate([bp["gcn_w0"], bp["gcn_w1"]], axis=0))
        mat = put_m(mat, L["lin1_w"], bp["lin1_w"])
        mat = put_m(mat, L["fc_w"], bp["fc_w"])
        for name in _VEC_NAMES:
            vec = put_v(vec, L[name], bp[name])
    P = layout["proj"]
    mat = put_m(mat, P["proj_w"], params["proj_w"])
    vec = put_v(vec, P["proj_b"], params["proj_b"])
    return mat, vec


# --------------------------- in-kernel helpers --------------------------------

def _layernorm(x, g, b):
    mu = jnp.mean(x, axis=-1, keepdims=True)
    xc = x - mu
    var = jnp.mean(xc * xc, axis=-1, keepdims=True)
    return xc * lax.rsqrt(var + 1e-5) * g + b


def _linear_attention(q, k, v, num_heads, head_dim):
    """full_attention_conv(use_standard_attention=False) fused with head-mean."""
    n = q.shape[0]
    # global Frobenius-norm normalization, same hazard on all-zero q/k as PyTorch
    qn = q * lax.rsqrt(jnp.sum(q * q))
    kn = k * lax.rsqrt(jnp.sum(k * k))
    acc = jnp.zeros((n, head_dim), jnp.float32)
    for h in range(num_heads):                        # static unroll over heads
        lo = h * head_dim
        qh = qn[:, lo:lo + head_dim]
        kh = kn[:, lo:lo + head_dim]
        vh = v[:, lo:lo + head_dim]
        kv = lax.dot_general(kh, vh, (((0,), (0,)), ((), ())),
                             preferred_element_type=jnp.float32)         # [C, C]
        num = jnp.dot(qh, kv, preferred_element_type=jnp.float32) + float(n) * vh
        ks_sum = jnp.sum(kh, axis=0, keepdims=True)                      # [1, C]
        denom = jnp.sum(qh * ks_sum, axis=1, keepdims=True) + float(n)   # [N, 1]
        acc = acc + num / denom                      # exact divide (parity w/ torch)
    return acc * (1.0 / float(num_heads))


# --------------------------- fused model kernel -------------------------------

def _make_model_kernel(layout, *, num_blocks, hidden, num_heads, alpha):
    H = hidden
    hd = H * num_heads

    def kernel(x_ref, a_ref, mat_ref, vec_ref, out_ref):
        n = a_ref.shape[1]                      # number of nodes (static)
        a_stack = a_ref[...]                    # [2N, N] = [A0 ; A1]
        x_in = x_ref[...]                       # [N, F_in]

        def M(e):                               # static matrix slice from the slab
            r0, nr, nc = e
            return mat_ref[r0:r0 + nr, 0:nc]

        def V(e):                               # static (1, nc) vector slice
            r0, nc = e
            return vec_ref[r0:r0 + 1, 0:nc]

        x_prev = None
        for b in range(num_blocks):             # static unroll over blocks
            L = layout["blocks"][b]

            # ---- shared-LHS fused input projection: x @ [fc0_w | lin0_w] ----
            hz = jnp.dot(x_in, M(L["in_w"]), preferred_element_type=jnp.float32)
            h = hz[:, 0:H] + V(L["fc0_b"])
            z = hz[:, H:2 * H] + V(L["lin0_b"])

            # ---- transformer (linear attention) branch ----
            h = jnp.maximum(_layernorm(h, V(L["ln0_g"]), V(L["ln0_b"])), 0.0)
            layer0 = h                                               # dropout = identity
            qkv = jnp.dot(h, M(L["qkv_w"]),
                          preferred_element_type=jnp.float32) + V(L["qkv_b"])
            attn = _linear_attention(qkv[:, 0:hd], qkv[:, hd:2 * hd],
                                     qkv[:, 2 * hd:3 * hd], num_heads, H)
            h = alpha * attn + (1.0 - alpha) * layer0                # residual mix
            x_trans = jnp.maximum(_layernorm(h, V(L["ln1_g"]), V(L["ln1_b"])), 0.0)

            # ---- GNN branch (dense normalized adjacency, all in vregs) ----
            z = jnp.maximum(z * V(L["bn0_s"]) + V(L["bn0_t"]), 0.0)  # BN(eval) + ReLU
            prev = z
            az = jnp.dot(a_stack, z, preferred_element_type=jnp.float32)        # [2N, H]
            az_cat = jnp.concatenate([az[0:n, :], az[n:2 * n, :]], axis=1)      # [N, 2H]
            agg = jnp.dot(az_cat, M(L["gcn_w"]),
                          preferred_element_type=jnp.float32) + V(L["gcn_b"])
            z = jnp.dot(agg, M(L["lin1_w"]),
                        preferred_element_type=jnp.float32) + V(L["lin1_b"]) + prev
            x_graph = jnp.maximum(z * V(L["bn1_s"]) + V(L["bn1_t"]), 0.0)

            # ---- combine head: lane-concat (64 lanes) + single K=2H dot + tanh ----
            comb = jnp.concatenate([x_trans, x_graph], axis=1)
            x_curr = jnp.tanh(jnp.dot(comb, M(L["fc_w"]),
                                      preferred_element_type=jnp.float32) + V(L["fc_b"]))

            x_prev = x_curr if b == 0 else x_curr + x_prev    # residual_between_blocks
            x_in = x_prev

        P = layout["proj"]
        out = jnp.dot(x_prev, M(P["proj_w"]),
                      preferred_element_type=jnp.float32) + V(P["proj_b"])
        # TODO(synk): out_ch=8 -> lane-sparse final store; pad/stack along lanes if
        # multiple graphs are ever batched.
        out_ref[...] = jnp.tanh(out)

    return kernel


def make_forward(layout, *, n_nodes, hidden, out_ch, num_blocks,
                 num_heads=NUM_HEADS, alpha=ALPHA):
    vmem = pl.BlockSpec(memory_space=pltpu.MemorySpace.VMEM)
    kernel = _make_model_kernel(layout, num_blocks=num_blocks, hidden=hidden,
                                num_heads=num_heads, alpha=alpha)
    call = pl.pallas_call(
        kernel,
        out_shape=jax.ShapeDtypeStruct((n_nodes, out_ch), jnp.float32),
        in_specs=[vmem, vmem, vmem, vmem],
        out_specs=vmem,
        compiler_params=pltpu.CompilerParams(vmem_limit_bytes=32 * 1024 * 1024),
    )
    return jax.jit(call)


# --------------------------- model glue (plain JAX) ---------------------------

def build_normalized_adjacency(edge_index, edge_type, type_val, num_nodes):
    """Dense GCN-normalized adjacency (self loops, edge_weight==1) for one edge type."""
    src, dst = edge_index[0], edge_index[1]
    w = (edge_type == type_val).astype(jnp.float32)
    deg = jnp.zeros((num_nodes,), jnp.float32).at[dst].add(w) + 1.0   # + self loop
    dinv = 1.0 / jnp.sqrt(deg)
    norm = dinv[src] * w * dinv[dst]
    A = jnp.zeros((num_nodes, num_nodes), jnp.float32).at[dst, src].add(norm)
    A = A + jnp.diag(dinv * dinv)                                      # self-loop entries
    return A


def _linear_params(key, fan_in, fan_out):
    k1, k2 = jax.random.split(key)
    bound = 1.0 / math.sqrt(fan_in)
    w = jax.random.uniform(k1, (fan_in, fan_out), jnp.float32, -bound, bound)
    b = jax.random.uniform(k2, (1, fan_out), jnp.float32, -bound, bound)
    return w, b


def init_block(key, in_ch, hidden, num_heads):
    keys = jax.random.split(key, 9)
    fc0_w, fc0_b = _linear_params(keys[0], in_ch, hidden)
    wq, bq = _linear_params(keys[1], hidden, hidden * num_heads)
    wk, bk = _linear_params(keys[2], hidden, hidden * num_heads)
    wv, bv = _linear_params(keys[3], hidden, hidden * num_heads)
    lin0_w, lin0_b = _linear_params(keys[4], in_ch, hidden)
    gcn_w0, gcn_b0 = _linear_params(keys[5], hidden, hidden)
    gcn_w1, gcn_b1 = _linear_params(keys[6], hidden, hidden)
    lin1_w, lin1_b = _linear_params(keys[7], hidden, hidden)
    fc_w, fc_b = _linear_params(keys[8], 2 * hidden, hidden)
    # BatchNorm1d eval with fresh running stats (mean=0, var=1, gamma=1, beta=0)
    bn_s = jnp.full((1, hidden), 1.0 / math.sqrt(1.0 + 1e-5), jnp.float32)
    bn_t = jnp.zeros((1, hidden), jnp.float32)
    return {
        "fc0_w": fc0_w, "fc0_b": fc0_b,
        "ln0_g": jnp.ones((1, hidden), jnp.float32),
        "ln0_b": jnp.zeros((1, hidden), jnp.float32),
        "qkv_w": jnp.concatenate([wq, wk, wv], axis=1),   # fused QKV [H, 3H]
        "qkv_b": jnp.concatenate([bq, bk, bv], axis=1),
        "ln1_g": jnp.ones((1, hidden), jnp.float32),
        "ln1_b": jnp.zeros((1, hidden), jnp.float32),
        "lin0_w": lin0_w, "lin0_b": lin0_b,
        "bn0_s": bn_s, "bn0_t": bn_t,
        "gcn_w0": gcn_w0, "gcn_w1": gcn_w1,
        "gcn_b": gcn_b0 + gcn_b1,
        "lin1_w": lin1_w, "lin1_b": lin1_b,
        "bn1_s": bn_s, "bn1_t": bn_t,
        "fc_w": fc_w, "fc_b": fc_b,
    }


# --------------------------- main ---------------------------------------------

if __name__ == "__main__":
    IN_CH, HIDDEN, OUT_CH = 16, 32, 8
    NUM_BLOCKS = 2
    N_NODES, N_EDGES = 64, 160

    root = jax.random.PRNGKey(0)
    kx, ksrc, kdst, kt, kp = jax.random.split(root, 5)
    x = jax.random.normal(kx, (N_NODES, IN_CH), jnp.float32)
    src = jax.random.randint(ksrc, (N_EDGES,), 0, N_NODES)
    dst = jax.random.randint(kdst, (N_EDGES,), 0, N_NODES)
    dst = jnp.where(dst == src, (dst + 1) % N_NODES, dst)   # keep synthetic graph loop-free
    edge_index = jnp.stack([src, dst], axis=0)
    edge_type = jax.random.randint(kt, (N_EDGES,), 0, 2)

    A0 = build_normalized_adjacency(edge_index, edge_type, 0, N_NODES)
    A1 = build_normalized_adjacency(edge_index, edge_type, 1, N_NODES)
    # TODO(synk): cast a_stack (the only O(N^2) operand) to bf16 on v6e/v7x at large N.
    a_stack = jnp.concatenate([A0, A1], axis=0)              # [2N, N] row-stacked

    bkeys = jax.random.split(kp, NUM_BLOCKS + 1)
    blocks = [init_block(bkeys[0], IN_CH, HIDDEN, NUM_HEADS)]
    blocks += [init_block(bkeys[i], HIDDEN, HIDDEN, NUM_HEADS)
               for i in range(1, NUM_BLOCKS)]
    proj_w, proj_b = _linear_params(bkeys[NUM_BLOCKS], HIDDEN, OUT_CH)
    params = {"blocks": blocks, "proj_w": proj_w, "proj_b": proj_b}

    layout = build_layout(IN_CH, HIDDEN, OUT_CH, NUM_BLOCKS, NUM_HEADS)
    mat_slab, vec_slab = pack_params(params, layout)         # packed once, host side

    fwd = make_forward(layout, n_nodes=N_NODES, hidden=HIDDEN, out_ch=OUT_CH,
                       num_blocks=NUM_BLOCKS, num_heads=NUM_HEADS, alpha=ALPHA)
    out = fwd(x, a_stack, mat_slab, vec_slab)
    jax.block_until_ready(out)
    assert out.shape == (N_NODES, OUT_CH) and out.dtype == jnp.float32
    print("KERNEL_OK")
</pallas_src>

<mosaic_0001>
module attributes {stable_mosaic.version = 11 : i64} {
  func.func @kernel(%arg0: memref<64x16xf32, #tpu.memory_space<vmem>>, %arg1: memref<128x64xf32, #tpu.memory_space<vmem>>, %arg2: memref<464x96xf32, #tpu.memory_space<vmem>>, %arg3: memref<29x96xf32, #tpu.memory_space<vmem>>, %arg4: memref<64x8xf32, #tpu.memory_space<vmem>>) attributes {dimension_semantics = [], scalar_prefetch = 0 : i64, scratch_operands = 0 : i64, tpu.core_type = #tpu.core_type<tc>} {
    %c0 = arith.constant 0 : index
    %c0_0 = arith.constant 0 : index
    %0 = vector.load %arg1[%c0, %c0_0] : memref<128x64xf32, #tpu.memory_space<vmem>>, vector<128x64xf32>
    %c0_1 = arith.constant 0 : index
    %c0_2 = arith.constant 0 : index
    %1 = vector.load %arg0[%c0_1, %c0_2] : memref<64x16xf32, #tpu.memory_space<vmem>>, vector<64x16xf32>
    %c0_3 = arith.constant 0 : index
    %c0_4 = arith.constant 0 : index
    %2 = vector.load %arg2[%c0_3, %c0_4] : memref<464x96xf32, #tpu.memory_space<vmem>>, vector<16x64xf32>
    %cst = arith.constant dense<0.000000e+00> : vector<64x64xf32>
    %3 = tpu.matmul %1, %2, %cst {dimension_numbers = #tpu.dot_dimension_numbers<[1], [0], [0], [1], [0, 0, 1, 1], [], []>} : vector<64x16xf32>, vector<16x64xf32>, vector<64x64xf32> -> vector<64x64xf32>
    %4 = vector.extract_strided_slice %3 {offsets = [0, 0], sizes = [64, 32], strides = [1, 1]} : vector<64x64xf32> to vector<64x32xf32>
    %c0_5 = arith.constant 0 : index
    %c0_6 = arith.constant 0 : index
    %5 = vector.load %arg3[%c0_5, %c0_6] : memref<29x96xf32, #tpu.memory_space<vmem>>, vector<1x32xf32>
    %6 = vector.broadcast %5 : vector<1x32xf32> to vector<64x32xf32>
    %7 = arith.addf %4, %6 : vector<64x32xf32>
    %8 = vector.extract_strided_slice %3 {offsets = [0, 32], sizes = [64, 32], strides = [1, 1]} : vector<64x64xf32> to vector<64x32xf32>
    %c1 = arith.constant 1 : index
    %c0_7 = arith.constant 0 : index
    %9 = vector.load %arg3[%c1, %c0_7] : memref<29x96xf32, #tpu.memory_space<vmem>>, vector<1x32xf32>
    %10 = vector.broadcast %9 : vector<1x32xf32> to vector<64x32xf32>
    %11 = arith.addf %8, %10 : vector<64x32xf32>
    %c2 = arith.constant 2 : index
    %c0_8 = arith.constant 0 : index
    %12 = vector.load %arg3[%c2, %c0_8] : memref<29x96xf32, #tpu.memory_space<vmem>>, vector<1x32xf32>
    %c3 = arith.constant 3 : index
    %c0_9 = arith.constant 0 : index
    %13 = vector.load %arg3[%c3, %c0_9] : memref<29x96xf32, #tpu.memory_space<vmem>>, vector<1x32xf32>
    %cst_10 = arith.constant dense<0.000000e+00> : vector<64xf32>
    %14 = vector.multi_reduction <add>, %7, %cst_10 [1] : vector<64x32xf32> to vector<64xf32>
    %15 = vector.shape_cast %14 : vector<64xf32> to vector<64x1xf32>
    %cst_11 = arith.constant 3.200000e+01 : f32
    %16 = vector.broadcast %cst_11 : f32 to vector<64x1xf32>
    %17 = arith.divf %15, %16 : vector<64x1xf32>
    %18 = vector.broadcast %17 : vector<64x1xf32> to vector<64x32xf32>
    %19 = arith.subf %7, %18 : vector<64x32xf32>
    %20 = arith.mulf %19, %19 : vector<64x32xf32>
    %cst_12 = arith.constant dense<0.000000e+00> : vector<64xf32>
    %21 = vector.multi_reduction <add>, %20, %cst_12 [1] : vector<64x32xf32> to vector<64xf32>
    %22 = vector.shape_cast %21 : vector<64xf32> to vector<64x1xf32>
    %cst_13 = arith.constant 3.200000e+01 : f32
    %23 = vector.broadcast %cst_13 : f32 to vector<64x1xf32>
    %24 = arith.divf %22, %23 : vector<64x1xf32>
    %cst_14 = arith.constant 9.99999974E-6 : f32
    %25 = vector.broadcast %cst_14 : f32 to vector<64x1xf32>
    %26 = arith.addf %24, %25 : vector<64x1xf32>
    %27 = math.rsqrt %26 : vector<64x1xf32>
    %28 = vector.broadcast %27 : vector<64x1xf32> to vector<64x32xf32>
    %29 = arith.mulf %19, %28 : vector<64x32xf32>
    %30 = vector.broadcast %12 : vector<1x32xf32> to vector<64x32xf32>
    %31 = arith.mulf %29, %30 : vector<64x32xf32>
    %32 = vector.broadcast %13 : vector<1x32xf32> to vector<64x32xf32>
    %33 = arith.addf %31, %32 : vector<64x32xf32>
    %cst_15 = arith.constant 0.000000e+00 : f32
    %34 = vector.broadcast %cst_15 : f32 to vector<64x32xf32>
    %35 = arith.maximumf %33, %34 : vector<64x32xf32>
    %c16 = arith.constant 16 : index
    %c0_16 = arith.constant 0 : index
    %36 = vector.load %arg2[%c16, %c0_16] : memref<464x96xf32, #tpu.memory_space<vmem>>, vector<32x96xf32>
    %cst_17 = arith.constant dense<0.000000e+00> : vector<64x96xf32>
    %37 = tpu.matmul %35, %36, %cst_17 {dimension_numbers = #tpu.dot_dimension_numbers<[1], [0], [0], [1], [0, 0, 1, 1], [], []>} : vector<64x32xf32>, vector<32x96xf32>, vector<64x96xf32> -> vector<64x96xf32>
    %c4 = arith.constant 4 : index
    %c0_18 = arith.constant 0 : index
    %38 = vector.load %arg3[%c4, %c0_18] : memref<29x96xf32, #tpu.memory_space<vmem>>, vector<1x96xf32>
    %39 = vector.broadcast %38 : vector<1x96xf32> to vector<64x96xf32>
    %40 = arith.addf %37, %39 : vector<64x96xf32>
    %41 = vector.extract_strided_slice %40 {offsets = [0, 0], sizes = [64, 32], strides = [1, 1]} : vector<64x96xf32> to vector<64x32xf32>
    %42 = vector.extract_strided_slice %40 {offsets = [0, 32], sizes = [64, 32], strides = [1, 1]} : vector<64x96xf32> to vector<64x32xf32>
    %43 = vector.extract_strided_slice %40 {offsets = [0, 64], sizes = [64, 32], strides = [1, 1]} : vector<64x96xf32> to vector<64x32xf32>
    %44 = arith.mulf %41, %41 : vector<64x32xf32>
    %45 = vector.shape_cast %44 : vector<64x32xf32> to vector<1x64x32xf32>
    %cst_19 = arith.constant dense<0.000000e+00> : vector<1xf32>
    %46 = vector.multi_reduction <add>, %45, %cst_19 [1, 2] : vector<1x64x32xf32> to vector<1xf32>
    %47 = vector.shape_cast %46 : vector<1xf32> to vector<1x1x1xf32>
    %48 = vector.extract %47[0, 0, 0] : f32 from vector<1x1x1xf32>
    %49 = math.rsqrt %48 : f32
    %50 = vector.broadcast %49 : f32 to vector<64x32xf32>
    %51 = arith.mulf %41, %50 : vector<64x32xf32>
    %52 = arith.mulf %42, %42 : vector<64x32xf32>
    %53 = vector.shape_cast %52 : vector<64x32xf32> to vector<1x64x32xf32>
    %cst_20 = arith.constant dense<0.000000e+00> : vector<1xf32>
    %54 = vector.multi_reduction <add>, %53, %cst_20 [1, 2] : vector<1x64x32xf32> to vector<1xf32>
    %55 = vector.shape_cast %54 : vector<1xf32> to vector<1x1x1xf32>
    %56 = vector.extract %55[0, 0, 0] : f32 from vector<1x1x1xf32>
    %57 = math.rsqrt %56 : f32
    %58 = vector.broadcast %57 : f32 to vector<64x32xf32>
    %59 = arith.mulf %42, %58 : vector<64x32xf32>
    %cst_21 = arith.constant 0.000000e+00 : f32
    %60 = vector.broadcast %cst_21 : f32 to vector<64x32xf32>
    %cst_22 = arith.constant dense<0.000000e+00> : vector<32x32xf32>
    %61 = tpu.matmul %59, %43, %cst_22 {dimension_numbers = #tpu.dot_dimension_numbers<[0], [0], [1], [1], [0, 1, 1, 1], [], []>} : vector<64x32xf32>, vector<64x32xf32>, vector<32x32xf32> -> vector<32x32xf32>
    %cst_23 = arith.constant dense<0.000000e+00> : vector<64x32xf32>
    %62 = tpu.matmul %51, %61, %cst_23 {dimension_numbers = #tpu.dot_dimension_numbers<[1], [0], [0], [1], [0, 0, 1, 1], [], []>} : vector<64x32xf32>, vector<32x32xf32>, vector<64x32xf32> -> vector<64x32xf32>
    %cst_24 = arith.constant 6.400000e+01 : f32
    %63 = vector.broadcast %cst_24 : f32 to vector<64x32xf32>
    %64 = arith.mulf %63, %43 : vector<64x32xf32>
    %65 = arith.addf %62, %64 : vector<64x32xf32>
    %cst_25 = arith.constant dense<0.000000e+00> : vector<32xf32>
    %66 = vector.multi_reduction <add>, %59, %cst_25 [0] : vector<64x32xf32> to vector<32xf32>
    %67 = vector.shape_cast %66 : vector<32xf32> to vector<1x32xf32>
    %68 = vector.broadcast %67 : vector<1x32xf32> to vector<64x32xf32>
    %69 = arith.mulf %51, %68 : vector<64x32xf32>
    %cst_26 = arith.constant dense<0.000000e+00> : vector<64xf32>
    %70 = vector.multi_reduction <add>, %69, %cst_26 [1] : vector<64x32xf32> to vector<64xf32>
    %71 = vector.shape_cast %70 : vector<64xf32> to vector<64x1xf32>
    %cst_27 = arith.constant 6.400000e+01 : f32
    %72 = vector.broadcast %cst_27 : f32 to vector<64x1xf32>
    %73 = arith.addf %71, %72 : vector<64x1xf32>
    %74 = vector.broadcast %73 : vector<64x1xf32> to vector<64x32xf32>
    %75 = arith.divf %65, %74 : vector<64x32xf32>
    %76 = arith.addf %60, %75 : vector<64x32xf32>
    %cst_28 = arith.constant 1.000000e+00 : f32
    %77 = vector.broadcast %cst_28 : f32 to vector<64x32xf32>
    %78 = arith.mulf %76, %77 : vector<64x32xf32>
    %cst_29 = arith.constant 5.000000e-01 : f32
    %79 = vector.broadcast %cst_29 : f32 to vector<64x32xf32>
    %80 = arith.mulf %79, %78 : vector<64x32xf32>
    %cst_30 = arith.constant 5.000000e-01 : f32
    %81 = vector.broadcast %cst_30 : f32 to vector<64x32xf32>
    %82 = arith.mulf %81, %35 : vector<64x32xf32>
    %83 = arith.addf %80, %82 : vector<64x32xf32>
    %c5 = arith.constant 5 : index
    %c0_31 = arith.constant 0 : index
    %84 = vector.load %arg3[%c5, %c0_31] : memref<29x96xf32, #tpu.memory_space<vmem>>, vector<1x32xf32>
    %c6 = arith.constant 6 : index
    %c0_32 = arith.constant 0 : index
    %85 = vector.load %arg3[%c6, %c0_32] : memref<29x96xf32, #tpu.memory_space<vmem>>, vector<1x32xf32>
    %cst_33 = arith.constant dense<0.000000e+00> : vector<64xf32>
    %86 = vector.multi_reduction <add>, %83, %cst_33 [1] : vector<64x32xf32> to vector<64xf32>
    %87 = vector.shape_cast %86 : vector<64xf32> to vector<64x1xf32>
    %cst_34 = arith.constant 3.200000e+01 : f32
    %88 = vector.broadcast %cst_34 : f32 to vector<64x1xf32>
    %89 = arith.divf %87, %88 : vector<64x1xf32>
    %90 = vector.broadcast %89 : vector<64x1xf32> to vector<64x32xf32>
    %91 = arith.subf %83, %90 : vector<64x32xf32>
    %92 = arith.mulf %91, %91 : vector<64x32xf32>
    %cst_35 = arith.constant dense<0.000000e+00> : vector<64xf32>
    %93 = vector.multi_reduction <add>, %92, %cst_35 [1] : vector<64x32xf32> to vector<64xf32>
    %94 = vector.shape_cast %93 : vector<64xf32> to vector<64x1xf32>
    %cst_36 = arith.constant 3.200000e+01 : f32
    %95 = vector.broadcast %cst_36 : f32 to vector<64x1xf32>
    %96 = arith.divf %94, %95 : vector<64x1xf32>
    %cst_37 = arith.constant 9.99999974E-6 : f32
    %97 = vector.broadcast %cst_37 : f32 to vector<64x1xf32>
    %98 = arith.addf %96, %97 : vector<64x1xf32>
    %99 = math.rsqrt %98 : vector<64x1xf32>
    %100 = vector.broadcast %99 : vector<64x1xf32> to vector<64x32xf32>
    %101 = arith.mulf %91, %100 : vector<64x32xf32>
    %102 = vector.broadcast %84 : vector<1x32xf32> to vector<64x32xf32>
    %103 = arith.mulf %101, %102 : vector<64x32xf32>
    %104 = vector.broadcast %85 : vector<1x32xf32> to vector<64x32xf32>
    %105 = arith.addf %103, %104 : vector<64x32xf32>
    %cst_38 = arith.constant 0.000000e+00 : f32
    %106 = vector.broadcast %cst_38 : f32 to vector<64x32xf32>
    %107 = arith.maximumf %105, %106 : vector<64x32xf32>
    %c7 = arith.constant 7 : index
    %c0_39 = arith.constant 0 : index
    %108 = vector.load %arg3[%c7, %c0_39] : memref<29x96xf32, #tpu.memory_space<vmem>>, vector<1x32xf32>
    %109 = vector.broadcast %108 : vector<1x32xf32> to vector<64x32xf32>
    %110 = arith.mulf %11, %109 : vector<64x32xf32>
    %c8 = arith.constant 8 : index
    %c0_40 = arith.constant 0 : index
    %111 = vector.load %arg3[%c8, %c0_40] : memref<29x96xf32, #tpu.memory_space<vmem>>, vector<1x32xf32>
    %112 = vector.broadcast %111 : vector<1x32xf32> to vector<64x32xf32>
    %113 = arith.addf %110, %112 : vector<64x32xf32>
    %cst_41 = arith.constant 0.000000e+00 : f32
    %114 = vector.broadcast %cst_41 : f32 to vector<64x32xf32>
    %115 = arith.maximumf %113, %114 : vector<64x32xf32>
    %cst_42 = arith.constant dense<0.000000e+00> : vector<128x32xf32>
    %116 = tpu.matmul %0, %115, %cst_42 {dimension_numbers = #tpu.dot_dimension_numbers<[1], [0], [0], [1], [0, 0, 1, 1], [], []>} : vector<128x64xf32>, vector<64x32xf32>, vector<128x32xf32> -> vector<128x32xf32>
    %117 = vector.extract_strided_slice %116 {offsets = [0, 0], sizes = [64, 32], strides = [1, 1]} : vector<128x32xf32> to vector<64x32xf32>
    %118 = vector.extract_strided_slice %116 {offsets = [64, 0], sizes = [64, 32], strides = [1, 1]} : vector<128x32xf32> to vector<64x32xf32>
    %119 = tpu.concatenate %117, %118 in 1 : vector<64x32xf32>, vector<64x32xf32> -> vector<64x64xf32>
    %c48 = arith.constant 48 : index
    %c0_43 = arith.constant 0 : index
    %120 = vector.load %arg2[%c48, %c0_43] : memref<464x96xf32, #tpu.memory_space<vmem>>, vector<64x32xf32>
    %cst_44 = arith.constant dense<0.000000e+00> : vector<64x32xf32>
    %121 = tpu.matmul %119, %120, %cst_44 {dimension_numbers = #tpu.dot_dimension_numbers<[1], [0], [0], [1], [0, 0, 1, 1], [], []>} : vector<64x64xf32>, vector<64x32xf32>, vector<64x32xf32> -> vector<64x32xf32>
    %c9 = arith.constant 9 : index
    %c0_45 = arith.constant 0 : index
    %122 = vector.load %arg3[%c9, %c0_45] : memref<29x96xf32, #tpu.memory_space<vmem>>, vector<1x32xf32>
    %123 = vector.broadcast %122 : vector<1x32xf32> to vector<64x32xf32>
    %124 = arith.addf %121, %123 : vector<64x32xf32>
    %c112 = arith.constant 112 : index
    %c0_46 = arith.constant 0 : index
    %125 = vector.load %arg2[%c112, %c0_46] : memref<464x96xf32, #tpu.memory_space<vmem>>, vector<32x32xf32>
    %cst_47 = arith.constant dense<0.000000e+00> : vector<64x32xf32>
    %126 = tpu.matmul %124, %125, %cst_47 {dimension_numbers = #tpu.dot_dimension_numbers<[1], [0], [0], [1], [0, 0, 1, 1], [], []>} : vector<64x32xf32>, vector<32x32xf32>, vector<64x32xf32> -> vector<64x32xf32>
    %c10 = arith.constant 10 : index
    %c0_48 = arith.constant 0 : index
    %127 = vector.load %arg3[%c10, %c0_48] : memref<29x96xf32, #tpu.memory_space<vmem>>, vector<1x32xf32>
    %128 = vector.broadcast %127 : vector<1x32xf32> to vector<64x32xf32>
    %129 = arith.addf %126, %128 : vector<64x32xf32>
    %130 = arith.addf %129, %115 : vector<64x32xf32>
    %c11 = arith.constant 11 : index
    %c0_49 = arith.constant 0 : index
    %131 = vector.load %arg3[%c11, %c0_49] : memref<29x96xf32, #tpu.memory_space<vmem>>, vector<1x32xf32>
    %132 = vector.broadcast %131 : vector<1x32xf32> to vector<64x32xf32>
    %133 = arith.mulf %130, %132 : vector<64x32xf32>
    %c12 = arith.constant 12 : index
    %c0_50 = arith.constant 0 : index
    %134 = vector.load %arg3[%c12, %c0_50] : memref<29x96xf32, #tpu.memory_space<vmem>>, vector<1x32xf32>
    %135 = vector.broadcast %134 : vector<1x32xf32> to vector<64x32xf32>
    %136 = arith.addf %133, %135 : vector<64x32xf32>
    %cst_51 = arith.constant 0.000000e+00 : f32
    %137 = vector.broadcast %cst_51 : f32 to vector<64x32xf32>
    %138 = arith.maximumf %136, %137 : vector<64x32xf32>
    %139 = tpu.concatenate %107, %138 in 1 : vector<64x32xf32>, vector<64x32xf32> -> vector<64x64xf32>
    %c144 = arith.constant 144 : index
    %c0_52 = arith.constant 0 : index
    %140 = vector.load %arg2[%c144, %c0_52] : memref<464x96xf32, #tpu.memory_space<vmem>>, vector<64x32xf32>
    %cst_53 = arith.constant dense<0.000000e+00> : vector<64x32xf32>
    %141 = tpu.matmul %139, %140, %cst_53 {dimension_numbers = #tpu.dot_dimension_numbers<[1], [0], [0], [1], [0, 0, 1, 1], [], []>} : vector<64x64xf32>, vector<64x32xf32>, vector<64x32xf32> -> vector<64x32xf32>
    %c13 = arith.constant 13 : index
    %c0_54 = arith.constant 0 : index
    %142 = vector.load %arg3[%c13, %c0_54] : memref<29x96xf32, #tpu.memory_space<vmem>>, vector<1x32xf32>
    %143 = vector.broadcast %142 : vector<1x32xf32> to vector<64x32xf32>
    %144 = arith.addf %141, %143 : vector<64x32xf32>
    %145 = math.tanh %144 : vector<64x32xf32>
    %c208 = arith.constant 208 : index
    %c0_55 = arith.constant 0 : index
    %146 = vector.load %arg2[%c208, %c0_55] : memref<464x96xf32, #tpu.memory_space<vmem>>, vector<32x64xf32>
    %cst_56 = arith.constant dense<0.000000e+00> : vector<64x64xf32>
    %147 = tpu.matmul %145, %146, %cst_56 {dimension_numbers = #tpu.dot_dimension_numbers<[1], [0], [0], [1], [0, 0, 1, 1], [], []>} : vector<64x32xf32>, vector<32x64xf32>, vector<64x64xf32> -> vector<64x64xf32>
    %148 = vector.extract_strided_slice %147 {offsets = [0, 0], sizes = [64, 32], strides = [1, 1]} : vector<64x64xf32> to vector<64x32xf32>
    %c14 = arith.constant 14 : index
    %c0_57 = arith.constant 0 : index
    %149 = vector.load %arg3[%c14, %c0_57] : memref<29x96xf32, #tpu.memory_space<vmem>>, vector<1x32xf32>
    %150 = vector.broadcast %149 : vector<1x32xf32> to vector<64x32xf32>
    %151 = arith.addf %148, %150 : vector<64x32xf32>
    %152 = vector.extract_strided_slice %147 {offsets = [0, 32], sizes = [64, 32], strides = [1, 1]} : vector<64x64xf32> to vector<64x32xf32>
    %c15 = arith.constant 15 : index
    %c0_58 = arith.constant 0 : index
    %153 = vector.load %arg3[%c15, %c0_58] : memref<29x96xf32, #tpu.memory_space<vmem>>, vector<1x32xf32>
    %154 = vector.broadcast %153 : vector<1x32xf32> to vector<64x32xf32>
    %155 = arith.addf %152, %154 : vector<64x32xf32>
    %c16_59 = arith.constant 16 : index
    %c0_60 = arith.constant 0 : index
    %156 = vector.load %arg3[%c16_59, %c0_60] : memref<29x96xf32, #tpu.memory_space<vmem>>, vector<1x32xf32>
    %c17 = arith.constant 17 : index
    %c0_61 = arith.constant 0 : index
    %157 = vector.load %arg3[%c17, %c0_61] : memref<29x96xf32, #tpu.memory_space<vmem>>, vector<1x32xf32>
    %cst_62 = arith.constant dense<0.000000e+00> : vector<64xf32>
    %158 = vector.multi_reduction <add>, %151, %cst_62 [1] : vector<64x32xf32> to vector<64xf32>
    %159 = vector.shape_cast %158 : vector<64xf32> to vector<64x1xf32>
    %cst_63 = arith.constant 3.200000e+01 : f32
    %160 = vector.broadcast %cst_63 : f32 to vector<64x1xf32>
    %161 = arith.divf %159, %160 : vector<64x1xf32>
    %162 = vector.broadcast %161 : vector<64x1xf32> to vector<64x32xf32>
    %163 = arith.subf %151, %162 : vector<64x32xf32>
    %164 = arith.mulf %163, %163 : vector<64x32xf32>
    %cst_64 = arith.constant dense<0.000000e+00> : vector<64xf32>
    %165 = vector.multi_reduction <add>, %164, %cst_64 [1] : vector<64x32xf32> to vector<64xf32>
    %166 = vector.shape_cast %165 : vector<64xf32> to vector<64x1xf32>
    %cst_65 = arith.constant 3.200000e+01 : f32
    %167 = vector.broadcast %cst_65 : f32 to vector<64x1xf32>
    %168 = arith.divf %166, %167 : vector<64x1xf32>
    %cst_66 = arith.constant 9.99999974E-6 : f32
    %169 = vector.broadcast %cst_66 : f32 to vector<64x1xf32>
    %170 = arith.addf %168, %169 : vector<64x1xf32>
    %171 = math.rsqrt %170 : vector<64x1xf32>
    %172 = vector.broadcast %171 : vector<64x1xf32> to vector<64x32xf32>
    %173 = arith.mulf %163, %172 : vector<64x32xf32>
    %174 = vector.broadcast %156 : vector<1x32xf32> to vector<64x32xf32>
    %175 = arith.mulf %173, %174 : vector<64x32xf32>
    %176 = vector.broadcast %157 : vector<1x32xf32> to vector<64x32xf32>
    %177 = arith.addf %175, %176 : vector<64x32xf32>
    %cst_67 = arith.constant 0.000000e+00 : f32
    %178 = vector.broadcast %cst_67 : f32 to vector<64x32xf32>
    %179 = arith.maximumf %177, %178 : vector<64x32xf32>
    %c240 = arith.constant 240 : index
    %c0_68 = arith.constant 0 : index
    %180 = vector.load %arg2[%c240, %c0_68] : memref<464x96xf32, #tpu.memory_space<vmem>>, vector<32x96xf32>
    %cst_69 = arith.constant dense<0.000000e+00> : vector<64x96xf32>
    %181 = tpu.matmul %179, %180, %cst_69 {dimension_numbers = #tpu.dot_dimension_numbers<[1], [0], [0], [1], [0, 0, 1, 1], [], []>} : vector<64x32xf32>, vector<32x96xf32>, vector<64x96xf32> -> vector<64x96xf32>
    %c18 = arith.constant 18 : index
    %c0_70 = arith.constant 0 : index
    %182 = vector.load %arg3[%c18, %c0_70] : memref<29x96xf32, #tpu.memory_space<vmem>>, vector<1x96xf32>
    %183 = vector.broadcast %182 : vector<1x96xf32> to vector<64x96xf32>
    %184 = arith.addf %181, %183 : vector<64x96xf32>
    %185 = vector.extract_strided_slice %184 {offsets = [0, 0], sizes = [64, 32], strides = [1, 1]} : vector<64x96xf32> to vector<64x32xf32>
    %186 = vector.extract_strided_slice %184 {offsets = [0, 32], sizes = [64, 32], strides = [1, 1]} : vector<64x96xf32> to vector<64x32xf32>
    %187 = vector.extract_strided_slice %184 {offsets = [0, 64], sizes = [64, 32], strides = [1, 1]} : vector<64x96xf32> to vector<64x32xf32>
    %188 = arith.mulf %185, %185 : vector<64x32xf32>
    %189 = vector.shape_cast %188 : vector<64x32xf32> to vector<1x64x32xf32>
    %cst_71 = arith.constant dense<0.000000e+00> : vector<1xf32>
    %190 = vector.multi_reduction <add>, %189, %cst_71 [1, 2] : vector<1x64x32xf32> to vector<1xf32>
    %191 = vector.shape_cast %190 : vector<1xf32> to vector<1x1x1xf32>
    %192 = vector.extract %191[0, 0, 0] : f32 from vector<1x1x1xf32>
    %193 = math.rsqrt %192 : f32
    %194 = vector.broadcast %193 : f32 to vector<64x32xf32>
    %195 = arith.mulf %185, %194 : vector<64x32xf32>
    %196 = arith.mulf %186, %186 : vector<64x32xf32>
    %197 = vector.shape_cast %196 : vector<64x32xf32> to vector<1x64x32xf32>
    %cst_72 = arith.constant dense<0.000000e+00> : vector<1xf32>
    %198 = vector.multi_reduction <add>, %197, %cst_72 [1, 2] : vector<1x64x32xf32> to vector<1xf32>
    %199 = vector.shape_cast %198 : vector<1xf32> to vector<1x1x1xf32>
    %200 = vector.extract %199[0, 0, 0] : f32 from vector<1x1x1xf32>
    %201 = math.rsqrt %200 : f32
    %202 = vector.broadcast %201 : f32 to vector<64x32xf32>
    %203 = arith.mulf %186, %202 : vector<64x32xf32>
    %cst_73 = arith.constant 0.000000e+00 : f32
    %204 = vector.broadcast %cst_73 : f32 to vector<64x32xf32>
    %cst_74 = arith.constant dense<0.000000e+00> : vector<32x32xf32>
    %205 = tpu.matmul %203, %187, %cst_74 {dimension_numbers = #tpu.dot_dimension_numbers<[0], [0], [1], [1], [0, 1, 1, 1], [], []>} : vector<64x32xf32>, vector<64x32xf32>, vector<32x32xf32> -> vector<32x32xf32>
    %cst_75 = arith.constant dense<0.000000e+00> : vector<64x32xf32>
    %206 = tpu.matmul %195, %205, %cst_75 {dimension_numbers = #tpu.dot_dimension_numbers<[1], [0], [0], [1], [0, 0, 1, 1], [], []>} : vector<64x32xf32>, vector<32x32xf32>, vector<64x32xf32> -> vector<64x32xf32>
    %cst_76 = arith.constant 6.400000e+01 : f32
    %207 = vector.broadcast %cst_76 : f32 to vector<64x32xf32>
    %208 = arith.mulf %207, %187 : vector<64x32xf32>
    %209 = arith.addf %206, %208 : vector<64x32xf32>
    %cst_77 = arith.constant dense<0.000000e+00> : vector<32xf32>
    %210 = vector.multi_reduction <add>, %203, %cst_77 [0] : vector<64x32xf32> to vector<32xf32>
    %211 = vector.shape_cast %210 : vector<32xf32> to vector<1x32xf32>
    %212 = vector.broadcast %211 : vector<1x32xf32> to vector<64x32xf32>
    %213 = arith.mulf %195, %212 : vector<64x32xf32>
    %cst_78 = arith.constant dense<0.000000e+00> : vector<64xf32>
    %214 = vector.multi_reduction <add>, %213, %cst_78 [1] : vector<64x32xf32> to vector<64xf32>
    %215 = vector.shape_cast %214 : vector<64xf32> to vector<64x1xf32>
    %cst_79 = arith.constant 6.400000e+01 : f32
    %216 = vector.broadcast %cst_79 : f32 to vector<64x1xf32>
    %217 = arith.addf %215, %216 : vector<64x1xf32>
    %218 = vector.broadcast %217 : vector<64x1xf32> to vector<64x32xf32>
    %219 = arith.divf %209, %218 : vector<64x32xf32>
    %220 = arith.addf %204, %219 : vector<64x32xf32>
    %cst_80 = arith.constant 1.000000e+00 : f32
    %221 = vector.broadcast %cst_80 : f32 to vector<64x32xf32>
    %222 = arith.mulf %220, %221 : vector<64x32xf32>
    %cst_81 = arith.constant 5.000000e-01 : f32
    %223 = vector.broadcast %cst_81 : f32 to vector<64x32xf32>
    %224 = arith.mulf %223, %222 : vector<64x32xf32>
    %cst_82 = arith.constant 5.000000e-01 : f32
    %225 = vector.broadcast %cst_82 : f32 to vector<64x32xf32>
    %226 = arith.mulf %225, %179 : vector<64x32xf32>
    %227 = arith.addf %224, %226 : vector<64x32xf32>
    %c19 = arith.constant 19 : index
    %c0_83 = arith.constant 0 : index
    %228 = vector.load %arg3[%c19, %c0_83] : memref<29x96xf32, #tpu.memory_space<vmem>>, vector<1x32xf32>
    %c20 = arith.constant 20 : index
    %c0_84 = arith.constant 0 : index
    %229 = vector.load %arg3[%c20, %c0_84] : memref<29x96xf32, #tpu.memory_space<vmem>>, vector<1x32xf32>
    %cst_85 = arith.constant dense<0.000000e+00> : vector<64xf32>
    %230 = vector.multi_reduction <add>, %227, %cst_85 [1] : vector<64x32xf32> to vector<64xf32>
    %231 = vector.shape_cast %230 : vector<64xf32> to vector<64x1xf32>
    %cst_86 = arith.constant 3.200000e+01 : f32
    %232 = vector.broadcast %cst_86 : f32 to vector<64x1xf32>
    %233 = arith.divf %231, %232 : vector<64x1xf32>
    %234 = vector.broadcast %233 : vector<64x1xf32> to vector<64x32xf32>
    %235 = arith.subf %227, %234 : vector<64x32xf32>
    %236 = arith.mulf %235, %235 : vector<64x32xf32>
    %cst_87 = arith.constant dense<0.000000e+00> : vector<64xf32>
    %237 = vector.multi_reduction <add>, %236, %cst_87 [1] : vector<64x32xf32> to vector<64xf32>
    %238 = vector.shape_cast %237 : vector<64xf32> to vector<64x1xf32>
    %cst_88 = arith.constant 3.200000e+01 : f32
    %239 = vector.broadcast %cst_88 : f32 to vector<64x1xf32>
    %240 = arith.divf %238, %239 : vector<64x1xf32>
    %cst_89 = arith.constant 9.99999974E-6 : f32
    %241 = vector.broadcast %cst_89 : f32 to vector<64x1xf32>
    %242 = arith.addf %240, %241 : vector<64x1xf32>
    %243 = math.rsqrt %242 : vector<64x1xf32>
    %244 = vector.broadcast %243 : vector<64x1xf32> to vector<64x32xf32>
    %245 = arith.mulf %235, %244 : vector<64x32xf32>
    %246 = vector.broadcast %228 : vector<1x32xf32> to vector<64x32xf32>
    %247 = arith.mulf %245, %246 : vector<64x32xf32>
    %248 = vector.broadcast %229 : vector<1x32xf32> to vector<64x32xf32>
    %249 = arith.addf %247, %248 : vector<64x32xf32>
    %cst_90 = arith.constant 0.000000e+00 : f32
    %250 = vector.broadcast %cst_90 : f32 to vector<64x32xf32>
    %251 = arith.maximumf %249, %250 : vector<64x32xf32>
    %c21 = arith.constant 21 : index
    %c0_91 = arith.constant 0 : index
    %252 = vector.load %arg3[%c21, %c0_91] : memref<29x96xf32, #tpu.memory_space<vmem>>, vector<1x32xf32>
    %253 = vector.broadcast %252 : vector<1x32xf32> to vector<64x32xf32>
    %254 = arith.mulf %155, %253 : vector<64x32xf32>
    %c22 = arith.constant 22 : index
    %c0_92 = arith.constant 0 : index
    %255 = vector.load %arg3[%c22, %c0_92] : memref<29x96xf32, #tpu.memory_space<vmem>>, vector<1x32xf32>
    %256 = vector.broadcast %255 : vector<1x32xf32> to vector<64x32xf32>
    %257 = arith.addf %254, %256 : vector<64x32xf32>
    %cst_93 = arith.constant 0.000000e+00 : f32
    %258 = vector.broadcast %cst_93 : f32 to vector<64x32xf32>
    %259 = arith.maximumf %257, %258 : vector<64x32xf32>
    %cst_94 = arith.constant dense<0.000000e+00> : vector<128x32xf32>
    %260 = tpu.matmul %0, %259, %cst_94 {dimension_numbers = #tpu.dot_dimension_numbers<[1], [0], [0], [1], [0, 0, 1, 1], [], []>} : vector<128x64xf32>, vector<64x32xf32>, vector<128x32xf32> -> vector<128x32xf32>
    %261 = vector.extract_strided_slice %260 {offsets = [0, 0], sizes = [64, 32], strides = [1, 1]} : vector<128x32xf32> to vector<64x32xf32>
    %262 = vector.extract_strided_slice %260 {offsets = [64, 0], sizes = [64, 32], strides = [1, 1]} : vector<128x32xf32> to vector<64x32xf32>
    %263 = tpu.concatenate %261, %262 in 1 : vector<64x32xf32>, vector<64x32xf32> -> vector<64x64xf32>
    %c272 = arith.constant 272 : index
    %c0_95 = arith.constant 0 : index
    %264 = vector.load %arg2[%c272, %c0_95] : memref<464x96xf32, #tpu.memory_space<vmem>>, vector<64x32xf32>
    %cst_96 = arith.constant dense<0.000000e+00> : vector<64x32xf32>
    %265 = tpu.matmul %263, %264, %cst_96 {dimension_numbers = #tpu.dot_dimension_numbers<[1], [0], [0], [1], [0, 0, 1, 1], [], []>} : vector<64x64xf32>, vector<64x32xf32>, vector<64x32xf32> -> vector<64x32xf32>
    %c23 = arith.constant 23 : index
    %c0_97 = arith.constant 0 : index
    %266 = vector.load %arg3[%c23, %c0_97] : memref<29x96xf32, #tpu.memory_space<vmem>>, vector<1x32xf32>
    %267 = vector.broadcast %266 : vector<1x32xf32> to vector<64x32xf32>
    %268 = arith.addf %265, %267 : vector<64x32xf32>
    %c336 = arith.constant 336 : index
    %c0_98 = arith.constant 0 : index
    %269 = vector.load %arg2[%c336, %c0_98] : memref<464x96xf32, #tpu.memory_space<vmem>>, vector<32x32xf32>
    %cst_99 = arith.constant dense<0.000000e+00> : vector<64x32xf32>
    %270 = tpu.matmul %268, %269, %cst_99 {dimension_numbers = #tpu.dot_dimension_numbers<[1], [0], [0], [1], [0, 0, 1, 1], [], []>} : vector<64x32xf32>, vector<32x32xf32>, vector<64x32xf32> -> vector<64x32xf32>
    %c24 = arith.constant 24 : index
    %c0_100 = arith.constant 0 : index
    %271 = vector.load %arg3[%c24, %c0_100] : memref<29x96xf32, #tpu.memory_space<vmem>>, vector<1x32xf32>
    %272 = vector.broadcast %271 : vector<1x32xf32> to vector<64x32xf32>
    %273 = arith.addf %270, %272 : vector<64x32xf32>
    %274 = arith.addf %273, %259 : vector<64x32xf32>
    %c25 = arith.constant 25 : index
    %c0_101 = arith.constant 0 : index
    %275 = vector.load %arg3[%c25, %c0_101] : memref<29x96xf32, #tpu.memory_space<vmem>>, vector<1x32xf32>
    %276 = vector.broadcast %275 : vector<1x32xf32> to vector<64x32xf32>
    %277 = arith.mulf %274, %276 : vector<64x32xf32>
    %c26 = arith.constant 26 : index
    %c0_102 = arith.constant 0 : index
    %278 = vector.load %arg3[%c26, %c0_102] : memref<29x96xf32, #tpu.memory_space<vmem>>, vector<1x32xf32>
    %279 = vector.broadcast %278 : vector<1x32xf32> to vector<64x32xf32>
    %280 = arith.addf %277, %279 : vector<64x32xf32>
    %cst_103 = arith.constant 0.000000e+00 : f32
    %281 = vector.broadcast %cst_103 : f32 to vector<64x32xf32>
    %282 = arith.maximumf %280, %281 : vector<64x32xf32>
    %283 = tpu.concatenate %251, %282 in 1 : vector<64x32xf32>, vector<64x32xf32> -> vector<64x64xf32>
    %c368 = arith.constant 368 : index
    %c0_104 = arith.constant 0 : index
    %284 = vector.load %arg2[%c368, %c0_104] : memref<464x96xf32, #tpu.memory_space<vmem>>, vector<64x32xf32>
    %cst_105 = arith.constant dense<0.000000e+00> : vector<64x32xf32>
    %285 = tpu.matmul %283, %284, %cst_105 {dimension_numbers = #tpu.dot_dimension_numbers<[1], [0], [0], [1], [0, 0, 1, 1], [], []>} : vector<64x64xf32>, vector<64x32xf32>, vector<64x32xf32> -> vector<64x32xf32>
    %c27 = arith.constant 27 : index
    %c0_106 = arith.constant 0 : index
    %286 = vector.load %arg3[%c27, %c0_106] : memref<29x96xf32, #tpu.memory_space<vmem>>, vector<1x32xf32>
    %287 = vector.broadcast %286 : vector<1x32xf32> to vector<64x32xf32>
    %288 = arith.addf %285, %287 : vector<64x32xf32>
    %289 = math.tanh %288 : vector<64x32xf32>
    %290 = arith.addf %289, %145 : vector<64x32xf32>
    %c432 = arith.constant 432 : index
    %c0_107 = arith.constant 0 : index
    %291 = vector.load %arg2[%c432, %c0_107] : memref<464x96xf32, #tpu.memory_space<vmem>>, vector<32x8xf32>
    %cst_108 = arith.constant dense<0.000000e+00> : vector<64x8xf32>
    %292 = tpu.matmul %290, %291, %cst_108 {dimension_numbers = #tpu.dot_dimension_numbers<[1], [0], [0], [1], [0, 0, 1, 1], [], []>} : vector<64x32xf32>, vector<32x8xf32>, vector<64x8xf32> -> vector<64x8xf32>
    %c28 = arith.constant 28 : index
    %c0_109 = arith.constant 0 : index
    %293 = vector.load %arg3[%c28, %c0_109] : memref<29x96xf32, #tpu.memory_space<vmem>>, vector<1x8xf32>
    %294 = vector.broadcast %293 : vector<1x8xf32> to vector<64x8xf32>
    %295 = arith.addf %292, %294 : vector<64x8xf32>
    %296 = math.tanh %295 : vector<64x8xf32>
    %c0_110 = arith.constant 0 : index
    %c0_111 = arith.constant 0 : index
    %297 = vector.load %arg4[%c0_110, %c0_111] : memref<64x8xf32, #tpu.memory_space<vmem>>, vector<64x8xf32>
    tpu.vector_store %arg4[%c0_110, %c0_111], %296 {strides = array<i32>} : memref<64x8xf32, #tpu.memory_space<vmem>>, vector<64x8xf32>,
    return
  }
}

</mosaic_0001>

<bundles_post_ra>
// kernel: tpu_custom_call.1
= control target key start
LH: loop header
LB: loop body
LE: loop exit
PB: predicated region body
PF: predicated region fallthrough
CT: control target
= control target key end

     0   :  { %vm43_vm0 = vcmask 130048   ;;  %vm135_vm1 = vcmask 261120   ;;  %v3890_v32 = vmov 32.0   ;;  %s3891_s24 = smov 96   ;;  %s3892_s27 = smov 32   ;;  %s5894_s2 = inlined_call_operand.vmem [shape: f32[464,96], index: 2, kind: input, shape index: {}]   ;;  %s5895_s0 = inlined_call_operand.vmem [shape: f32[64,16], index: 0, kind: input, shape index: {}]   ;;  %s5896_s3 = inlined_call_operand.vmem [shape: f32[29,96], index: 3, kind: input, shape index: {}]   ;;  %s5897_s1 = inlined_call_operand.vmem [shape: f32[128,64], index: 1, kind: input, shape index: {}]   ;;  %s5898_s4 = inlined_call_operand.vmem [shape: f32[64,8], index: 4, kind: output, shape index: {}]  }
   0x1   :  { %v42_v0 = vld [vmem:[%s5894_s2 + $0x8] sm:$0xff]  ;;  %v41_v1 = vld [vmem:[%s5894_s2] sm:$0xff]  ;;  %v39_v5 = vld [vmem:[%s5895_s0 + $0x30] sm:$0xff]  ;;  %3720 = vrcp.f32 %v3890_v32  ;;  %s3893_s6 = smov 64  }
   0x2   :  { %82 = vmatpush.msra.mxu0 %v42_v0  ;;  %v33_v2 = vld [vmem:[%s5895_s0] sm:$0xff]  ;;  %3620 = vmatpush.msra.mxu1 %v42_v0  ;;  %v38_v3 = vld [vmem:[%s5895_s0 + $0x28] sm:$0xff]  ;;  %v35_v6 = vld [vmem:[%s5895_s0 + $0x10] sm:$0xff] }
   0x3   :  { %v34_v4 = vld [vmem:[%s5895_s0 + $0x8] sm:$0xff]  ;;  %v36_v7 = vld [vmem:[%s5895_s0 + $0x18] sm:$0xff]  ;;  %v37_v8 = vld [vmem:[%s5895_s0 + $0x20] sm:$0xff] }
   0x4   :  { %83 = vmatpush.msra.mxu0 %v41_v1  ;;  %3621 = vmatpush.msra.mxu1 %v41_v1  ;;  %v40_v9 = vld [vmem:[%s5895_s0 + $0x38] sm:$0xff]  ;;  %v3691_v10 = vld [vmem:[%s5896_s3] ss:$0 sm:$0xff] }
   0x5   :  { %3476 = vmatmul.msk.f32.vlgmr.msra.gmra.mxu0 %vm43_vm0, %v33_v2  ;;  %3481 = vmatmul.msk.f32.vlgmr.msra.gmra.mxu1 %vm43_vm0, %v38_v3 }
   0x7   :  { %v3721_v33 = vpop.eup %3720 }
   0x8   :  { %v161_v34 = vmul.f32 32.0, %v3721_v33  ;;  %vm165_vm2 = vweird.f32 %v3721_v33 }
   0xa   :  { %v162_v35 = vsub.f32 1.0, %v161_v34 }
   0xc   :  { %v163_v36 = vmul.f32 %v3721_v33, %v162_v35 }
   0xd   :  { %3477 = vmatmul.msk.f32.gmra.mxu0 %vm43_vm0, %v34_v4  ;;  %3482 = vmatmul.msk.f32.gmra.mxu1 %vm43_vm0, %v39_v5 }
   0xe   :  { %v164_v37 = vadd.f32 %v3721_v33, %v163_v36 }
  0x10   :  { %v3988_v38 = vsel %vm165_vm2, %v3721_v33, %v164_v37 }
  0x15   :  { %3478 = vmatmul.msk.f32.gmra.mxu0 %vm43_vm0, %v35_v6  ;;  %3483 = vmatmul.msk.f32.gmra.mxu1 %vm43_vm0, %v40_v9 }
  0x1d   :  { %3479 = vmatmul.msk.f32.gmra.mxu0 %vm43_vm0, %v36_v7 }
  0x25   :  { %3480 = vmatmul.msk.f32.gmra.mxu0 %vm43_vm0, %v37_v8 }
  0x82   :  { %v3960_v11 = vpop.f32.mrf.mxu0  ;;  %v3970_v18 = vpop.f32.mrf.mxu1 }
  0x83   :  { %v111_v12 = vadd.f32 %v3691_v10, %v3960_v11  ;;  %v116_v30 = vadd.f32 %v3691_v10, %v3970_v18 }
  0x85   :  { %v136_v13 = vsel %vm135_vm1, %v111_v12, 0.0  ;;  %v151_v31 = vsel %vm135_vm1, %v116_v30, 0.0 }
  0x86   :  { %137 = vadd.xlane.f32.xlu0 %v136_v13 }
  0x8a   :  { %v3964_v14 = vpop.f32.mrf.mxu0  ;;  %v3977_v23 = vpop.f32.mrf.mxu1 }
  0x8b   :  { %v112_v15 = vadd.f32 %v3691_v10, %v3964_v14  ;;  %v117_v25 = vadd.f32 %v3691_v10, %v3977_v23 }
  0x8d   :  { %v139_v16 = vsel %vm135_vm1, %v112_v15, 0.0  ;;  %v154_v27 = vsel %vm135_vm1, %v117_v25, 0.0 }
  0x8e   :  { %140 = vadd.xlane.f32.xlu0 %v139_v16  ;;  %v347_v16 = vld [vmem:[%s5894_s2 + $0x20] sm:$0xff] }
  0x92   :  { %v3968_v17 = vpop.f32.mrf.mxu0  ;;  %v3995_v43 = vpop.f32.mrf.mxu1 }
  0x93   :  { %v113_v19 = vadd.f32 %v3691_v10, %v3968_v17  ;;  %v118_v47 = vadd.f32 %v3691_v10, %v3995_v43 }
  0x95   :  { %v142_v20 = vsel %vm135_vm1, %v113_v19, 0.0  ;;  %v157_v49 = vsel %vm135_vm1, %v118_v47, 0.0 }
  0x96   :  { %143 = vadd.xlane.f32.xlu1 %v142_v20  ;;  %v345_v20 = vld [vmem:[%s5894_s2 + $0x10] sm:$0xff] }
  0x9a   :  { %v3974_v21 = vpop.f32.mrf.mxu0 }
  0x9b   :  { %v114_v22 = vadd.f32 %v3691_v10, %v3974_v21 }
  0x9d   :  { %v145_v24 = vsel %vm135_vm1, %v114_v22, 0.0 }
  0x9e   :  { %146 = vadd.xlane.f32.xlu1 %v145_v24 }
  0xa2   :  { %v3981_v26 = vpop.f32.mrf.mxu0 }
  0xa3   :  { %v115_v28 = vadd.f32 %v3691_v10, %v3981_v26 }
  0xa5   :  { %v148_v29 = vsel %vm135_vm1, %v115_v28, 0.0 }
  0xa6   :  { %155 = vadd.xlane.f32.xlu1 %v154_v27  ;;  %149 = vadd.xlane.f32.xlu2 %v148_v29 }
  0xae   :  { %152 = vadd.xlane.f32.xlu2 %v151_v31 }
  0xf9   :  { %v138_v39 = vpop.xlane.xlu0 %137 }
  0xfa   :  { %v167_v40 = vmul.f32 %v3988_v38, %v138_v39 }
  0xfc   :  { %v3991_v41 = vsub.f32 %v111_v12, %v167_v40 }
  0xfe   :  { %v183_v42 = vmul.f32 %v3991_v41, %v3991_v41 }
 0x100   :  { %v191_v44 = vsel %vm135_vm1, %v183_v42, 0.0 }
 0x101   :  { %192 = vadd.xlane.f32.xlu0 %v191_v44  ;;  %v141_v45 = vpop.xlane.xlu0 %140 }
 0x102   :  { %v168_v46 = vmul.f32 %v3988_v38, %v141_v45 }
 0x104   :  { %v4000_v48 = vsub.f32 %v112_v15, %v168_v46  ;;  %v348_v15 = vld [vmem:[%s5894_s2 + $0x28] sm:$0xff] }
 0x105   :  { %387 = vmatpush.msrb.mxu1 %v348_v15 }
 0x106   :  { %v184_v50 = vmul.f32 %v4000_v48, %v4000_v48 }
 0x107   :  { %388 = vmatpush.msrb.mxu1 %v347_v16 }
 0x108   :  { %v194_v51 = vsel %vm135_vm1, %v184_v50, 0.0  ;;  %v4060_v50 = vld [vmem:[%s5896_s3 + $0x2] ss:$0 sm:$0xff] }
 0x109   :  { %158 = vadd.xlane.f32.xlu0 %v157_v49  ;;  %v144_v52 = vpop.xlane.xlu1 %143  ;;  %195 = vadd.xlane.f32.xlu2 %v194_v51 }
 0x10a   :  { %v169_v53 = vmul.f32 %v3988_v38, %v144_v52 }
 0x10c   :  { %v4007_v54 = vsub.f32 %v113_v19, %v169_v53  ;;  %v346_v19 = vld [vmem:[%s5894_s2 + $0x18] sm:$0xff] }
 0x10d   :  { %389 = vmatpush.msrb.mxu1 %v346_v19 }
 0x10e   :  { %v185_v55 = vmul.f32 %v4007_v54, %v4007_v54 }
 0x10f   :  { %390 = vmatpush.msrb.mxu1 %v345_v20 }
 0x110   :  { %v197_v56 = vsel %vm135_vm1, %v185_v55, 0.0  ;;  %v4066_v55 = vld [vmem:[%s5896_s3 + $0x3] ss:$0 sm:$0xff] }
 0x111   :  { %198 = vadd.xlane.f32.xlu1 %v197_v56  ;;  %v147_v57 = vpop.xlane.xlu1 %146 }
 0x112   :  { %v170_v58 = vmul.f32 %v3988_v38, %v147_v57 }
 0x114   :  { %v4013_v59 = vsub.f32 %v114_v22, %v170_v58 }
 0x116   :  { %v186_v60 = vmul.f32 %v4013_v59, %v4013_v59 }
 0x118   :  { %v200_v61 = vsel %vm135_vm1, %v186_v60, 0.0 }
 0x119   :  { %v156_v62 = vpop.xlane.xlu1 %155  ;;  %201 = vadd.xlane.f32.xlu2 %v200_v61  ;;  %v150_v63 = vpop.xlane.xlu2 %149 }
 0x11a   :  { %v173_v0 = vmul.f32 %v3988_v38, %v156_v62  ;;  %v171_v1 = vmul.f32 %v3988_v38, %v150_v63 }
 0x11c   :  { %v4020_v2 = vsub.f32 %v117_v25, %v173_v0  ;;  %v4022_v3 = vsub.f32 %v115_v28, %v171_v1 }
 0x11e   :  { %v189_v4 = vmul.f32 %v4020_v2, %v4020_v2  ;;  %v187_v5 = vmul.f32 %v4022_v3, %v4022_v3 }
 0x120   :  { %v209_v6 = vsel %vm135_vm1, %v189_v4, 0.0  ;;  %v203_v7 = vsel %vm135_vm1, %v187_v5, 0.0 }
 0x121   :  { %210 = vadd.xlane.f32.xlu2 %v209_v6  ;;  %204 = vadd.xlane.f32.xlu0 %v203_v7  ;;  %v153_v8 = vpop.xlane.xlu2 %152 }
 0x122   :  { %v172_v9 = vmul.f32 %v3988_v38, %v153_v8 }
 0x124   :  { %v4031_v10 = vsub.f32 %v116_v30, %v172_v9 }
 0x126   :  { %v188_v12 = vmul.f32 %v4031_v10, %v4031_v10 }
 0x128   :  { %v206_v13 = vsel %vm135_vm1, %v188_v12, 0.0 }
 0x129   :  { %207 = vadd.xlane.f32.xlu1 %v206_v13 }
 0x174   :  { %v193_v22 = vpop.xlane.xlu0 %192 }
 0x175   :  { %v215_v24 = vmul.f32 %v193_v22, %v3988_v38 }
 0x177   :  { %v223_v25 = vadd.f32 1e-05, %v215_v24 }
 0x179   :  { %3722 = vrsqrt.f32 %v223_v25  ;;  %vm237_vm4 = vweird.f32 %v223_v25 }
 0x17c   :  { %v159_v27 = vpop.xlane.xlu0 %158  ;;  %v196_v28 = vpop.xlane.xlu2 %195 }
 0x17d   :  { %v174_v29 = vmul.f32 %v3988_v38, %v159_v27  ;;  %v216_v30 = vmul.f32 %v196_v28, %v3988_v38 }
 0x17f   :  { %v3723_v31 = vpop.eup %3722  ;;  %v4051_v32 = vsub.f32 %v118_v47, %v174_v29  ;;  %v224_v33 = vadd.f32 1e-05, %v216_v30 }
 0x180   :  { %v232_v34 = vmul.f32 %v3723_v31, %v223_v25  ;;  %vm238_vm3 = vweird.f32 %v3723_v31 }
 0x181   :  { %3724 = vrsqrt.f32 %v224_v33  ;;  %v190_v35 = vmul.f32 %v4051_v32, %v4051_v32  ;;  %vm239_vm5 = vmor %vm237_vm4, %vm238_vm3  ;;  %vm247_vm7 = vweird.f32 %v224_v33 }
 0x182   :  { %v233_v36 = vmul.f32 %v3723_v31, %v232_v34 }
 0x183   :  { %v212_v37 = vsel %vm135_vm1, %v190_v35, 0.0 }
 0x184   :  { %v234_v39 = vmul.f32 0.5, %v233_v36  ;;  %v199_v40 = vpop.xlane.xlu1 %198  ;;  %213 = vadd.xlane.f32.xlu0 %v212_v37 }
 0x185   :  { %v217_v42 = vmul.f32 %v199_v40, %v3988_v38 }
 0x186   :  { %v235_v44 = vsub.f32 1.5, %v234_v39 }
 0x187   :  { %v3725_v45 = vpop.eup %3724  ;;  %v225_v46 = vadd.f32 1e-05, %v217_v42 }
 0x188   :  { %v236_v47 = vmul.f32 %v3723_v31, %v235_v44  ;;  %v242_v49 = vmul.f32 %v3725_v45, %v224_v33  ;;  %vm248_vm6 = vweird.f32 %v3725_v45 }
 0x189   :  { %3726 = vrsqrt.f32 %v225_v46  ;;  %vm249_vm8 = vmor %vm247_vm7, %vm248_vm6  ;;  %vm257_vm10 = vweird.f32 %v225_v46 }
 0x18a   :  { %v240_v51 = vsel %vm239_vm5, %v3723_v31, %v236_v47  ;;  %v243_v52 = vmul.f32 %v3725_v45, %v242_v49 }
 0x18b   :  { %v311_v53 = vmul.f32 %v240_v51, %v3991_v41 }
 0x18c   :  { %v244_v56 = vmul.f32 0.5, %v243_v52  ;;  %v202_v57 = vpop.xlane.xlu2 %201 }
 0x18d   :  { %v218_v58 = vmul.f32 %v202_v57, %v3988_v38  ;;  %v320_v60 = vmul.f32 %v4060_v50, %v311_v53 }
 0x18e   :  { %v245_v61 = vsub.f32 1.5, %v244_v56 }
 0x18f   :  { %v3727_v62 = vpop.eup %3726  ;;  %v226_v63 = vadd.f32 1e-05, %v218_v58  ;;  %v4071_v0 = vadd.f32 %v4066_v55, %v320_v60 }
 0x190   :  { %v246_v1 = vmul.f32 %v3725_v45, %v245_v61  ;;  %v252_v41 = vmul.f32 %v3727_v62, %v225_v46  ;;  %vm258_vm9 = vweird.f32 %v3727_v62 }
 0x191   :  { %3728 = vrsqrt.f32 %v226_v63  ;;  %v337_v4 = vmax.f32 %v4071_v0, 0.0  ;;  %vm259_vm11 = vmor %vm257_vm10, %vm258_vm9  ;;  %vm267_vm13 = vweird.f32 %v226_v63 }
 0x192   :  { %v253_v5 = vmul.f32 %v3727_v62, %v252_v41  ;;  %v250_v6 = vsel %vm249_vm8, %v3725_v45, %v246_v1 }
 0x193   :  { %3484 = vmatmul.msk.f32.vlgmr.msrb.gmra.mxu1 %vm135_vm1, %v337_v4  ;;  %v312_v7 = vmul.f32 %v250_v6, %v4000_v48 }
 0x194   :  { %v254_v8 = vmul.f32 0.5, %v253_v5  ;;  %v205_v9 = vpop.xlane.xlu0 %204  ;;  %v211_v12 = vpop.xlane.xlu2 %210 }
 0x195   :  { %v219_v13 = vmul.f32 %v205_v9, %v3988_v38  ;;  %v221_v15 = vmul.f32 %v211_v12, %v3988_v38  ;;  %v321_v16 = vmul.f32 %v4060_v50, %v312_v7 }
 0x196   :  { %v255_v19 = vsub.f32 1.5, %v254_v8 }
 0x197   :  { %v3729_v20 = vpop.eup %3728  ;;  %v227_v22 = vadd.f32 1e-05, %v219_v13  ;;  %v4081_v24 = vadd.f32 1e-05, %v221_v15  ;;  %v4084_v25 = vadd.f32 %v4066_v55, %v321_v16 }
 0x198   :  { %v256_v27 = vmul.f32 %v3727_v62, %v255_v19  ;;  %v262_v48 = vmul.f32 %v3729_v20, %v226_v63  ;;  %vm268_vm12 = vweird.f32 %v3729_v20 }
 0x199   :  { %3730 = vrsqrt.f32 %v227_v22  ;;  %v338_v28 = vmax.f32 %v4084_v25, 0.0  ;;  %vm269_vm14 = vmor %vm267_vm13, %vm268_vm12  ;;  %vm277_vm0 = vweird.f32 %v227_v22  ;;  %vm297_vm6 = vweird.f32 %v4081_v24 }
 0x19a   :  { %v260_v29 = vsel %vm259_vm11, %v3727_v62, %v256_v27  ;;  %v263_v30 = vmul.f32 %v3729_v20, %v262_v48  ;;  %3732 = vrsqrt.f32 %v4081_v24 }
 0x19b   :  { %3485 = vmatmul.msk.f32.gmra.mxu1 %vm135_vm1, %v338_v28  ;;  %v313_v31 = vmul.f32 %v260_v29, %v4007_v54 }
 0x19c   :  { %v264_v33 = vmul.f32 0.5, %v263_v30  ;;  %v208_v34 = vpop.xlane.xlu1 %207 }
 0x19d   :  { %v220_v35 = vmul.f32 %v208_v34, %v3988_v38  ;;  %v322_v36 = vmul.f32 %v4060_v50, %v313_v31 }
 0x19e   :  { %v265_v37 = vsub.f32 1.5, %v264_v33 }
 0x19f   :  { %v3731_v39 = vpop.eup %3730  ;;  %v228_v40 = vadd.f32 1e-05, %v220_v35  ;;  %v4095_v42 = vadd.f32 %v4066_v55, %v322_v36 }
 0x1a0   :  { %v3733_v44 = vpop.eup %3732  ;;  %v266_v45 = vmul.f32 %v3729_v20, %v265_v37  ;;  %v272_v46 = vmul.f32 %v3731_v39, %v227_v22  ;;  %vm278_vm15 = vweird.f32 %v3731_v39 }
 0x1a1   :  { %v292_v54 = vmul.f32 %v3733_v44, %v4081_v24  ;;  %3734 = vrsqrt.f32 %v228_v40  ;;  %v339_v49 = vmax.f32 %v4095_v42, 0.0  ;;  %vm279_vm2 = vmor %vm277_vm0, %vm278_vm15  ;;  %vm298_vm4 = vweird.f32 %v3733_v44 }
 0x1a2   :  { %v273_v47 = vmul.f32 %v3731_v39, %v272_v46  ;;  %v270_v51 = vsel %vm269_vm14, %v3729_v20, %v266_v45  ;;  %vm287_vm5 = vweird.f32 %v228_v40  ;;  %vm299_vm8 = vmor %vm297_vm6, %vm298_vm4  ;;  %v3694_v45 = vld [vmem:[%s5896_s3 + $0x4] ss:$0 sm:$0xff]  ;;  %vm642_vm4 = vcmask 523264  }
 0x1a3   :  { %v293_v52 = vmul.f32 %v3733_v44, %v292_v54  ;;  %v314_v53 = vmul.f32 %v270_v51, %v4013_v59  ;;  %3486 = vmatmul.msk.f32.gmra.mxu1 %vm135_vm1, %v339_v49 }
 0x1a4   :  { %v274_v56 = vmul.f32 0.5, %v273_v47 }
 0x1a5   :  { %v323_v57 = vmul.f32 %v4060_v50, %v314_v53  ;;  %v294_v61 = vmul.f32 0.5, %v293_v52 }
 0x1a6   :  { %v275_v58 = vsub.f32 1.5, %v274_v56 }
 0x1a7   :  { %v3735_v60 = vpop.eup %3734  ;;  %v4105_v62 = vadd.f32 %v4066_v55, %v323_v57  ;;  %v295_v6 = vsub.f32 1.5, %v294_v61 }
 0x1a8   :  { %v276_v63 = vmul.f32 %v3731_v39, %v275_v58  ;;  %v282_v1 = vmul.f32 %v3735_v60, %v228_v40  ;;  %vm288_vm3 = vweird.f32 %v3735_v60 }
 0x1a9   :  { %v340_v59 = vmax.f32 %v4105_v62, 0.0  ;;  %v296_v13 = vmul.f32 %v3733_v44, %v295_v6  ;;  %vm289_vm7 = vmor %vm287_vm5, %vm288_vm3  ;;  %vm789_vm3 = vcmask 523520  }
 0x1aa   :  { %v283_v41 = vmul.f32 %v3735_v60, %v282_v1  ;;  %v280_v5 = vsel %vm279_vm2, %v3731_v39, %v276_v63 }
 0x1ab   :  { %v315_v7 = vmul.f32 %v280_v5, %v4022_v3  ;;  %3487 = vmatmul.msk.f32.gmra.mxu1 %vm135_vm1, %v340_v59  ;;  %v300_v22 = vsel %vm299_vm8, %v3733_v44, %v296_v13 }
 0x1ac   :  { %v284_v8 = vmul.f32 0.5, %v283_v41  ;;  %v317_v48 = vmul.f32 %v300_v22, %v4020_v2 }
 0x1ad   :  { %v324_v9 = vmul.f32 %v4060_v50, %v315_v7 }
 0x1ae   :  { %v285_v12 = vsub.f32 1.5, %v284_v8  ;;  %v326_v30 = vmul.f32 %v4060_v50, %v317_v48 }
 0x1af   :  { %v4114_v15 = vadd.f32 %v4066_v55, %v324_v9 }
 0x1b0   :  { %v286_v16 = vmul.f32 %v3735_v60, %v285_v12 }
 0x1b1   :  { %v341_v3 = vmax.f32 %v4114_v15, 0.0 }
 0x1b2   :  { %v290_v19 = vsel %vm289_vm7, %v3735_v60, %v286_v16 }
 0x1b3   :  { %v316_v20 = vmul.f32 %v290_v19, %v4031_v10  ;;  %3488 = vmatmul.msk.f32.gmra.mxu1 %vm135_vm1, %v341_v3  ;;  %v4133_v10 = vadd.f32 %v4066_v55, %v326_v30 }
 0x1b5   :  { %v325_v27 = vmul.f32 %v4060_v50, %v316_v20  ;;  %v343_v31 = vmax.f32 %v4133_v10, 0.0 }
 0x1b7   :  { %v4125_v29 = vadd.f32 %v4066_v55, %v325_v27 }
 0x1b9   :  { %v342_v24 = vmax.f32 %v4125_v29, 0.0 }
 0x1bb   :  { %3489 = vmatmul.msk.f32.gmra.mxu1 %vm135_vm1, %v342_v24 }
 0x1c3   :  { %3490 = vmatmul.msk.f32.gmra.mxu1 %vm135_vm1, %v343_v31 }
 0x1f7   :  { %v214_v2 = vpop.xlane.xlu0 %213 }
 0x1f8   :  { %v222_v33 = vmul.f32 %v214_v2, %v3988_v38 }
 0x1fa   :  { %v230_v34 = vadd.f32 1e-05, %v222_v33 }
 0x1fc   :  { %3736 = vrsqrt.f32 %v230_v34  ;;  %vm307_vm10 = vweird.f32 %v230_v34 }
 0x202   :  { %v3737_v35 = vpop.eup %3736 }
 0x203   :  { %v302_v36 = vmul.f32 %v3737_v35, %v230_v34  ;;  %vm308_vm9 = vweird.f32 %v3737_v35 }
 0x204   :  { %vm309_vm11 = vmor %vm307_vm10, %vm308_vm9 }
 0x205   :  { %v303_v37 = vmul.f32 %v3737_v35, %v302_v36 }
 0x207   :  { %v304_v39 = vmul.f32 0.5, %v303_v37 }
 0x209   :  { %v305_v40 = vsub.f32 1.5, %v304_v39 }
 0x20b   :  { %v306_v44 = vmul.f32 %v3737_v35, %v305_v40 }
 0x20d   :  { %v310_v46 = vsel %vm309_vm11, %v3737_v35, %v306_v44 }
 0x20e   :  { %v318_v54 = vmul.f32 %v310_v46, %v4051_v32 }
 0x210   :  { %v392_v47 = vpop.f32.mrf.mxu1  ;;  %v327_v51 = vmul.f32 %v4060_v50, %v318_v54 }
 0x211   :  { %v4145_v52 = vadd.f32 %v3694_v45, %v392_v47 }
 0x212   :  { %v4148_v53 = vadd.f32 %v4066_v55, %v327_v51 }
 0x213   :  { %v416_v56 = vmul.f32 %v4145_v52, %v4145_v52 }
 0x214   :  { %v344_v57 = vmax.f32 %v4148_v53, 0.0  ;;  %v4687_v53 = vld [vmem:[%s5896_s3 + $0xb] ss:$0 sm:$0xff] }
 0x215   :  { %477 = vrot.lane.b32.xlu2 %v416_v56, %s3891_s24  ;;  %v424_v55 = vsel %vm135_vm1, %v416_v56, 0.0  ;;  %v3695_v56 = vld [vmem:[%s5896_s3 + $0x1] ss:$0 sm:$0xff] }
 0x216   :  { %3491 = vmatmul.msk.f32.gmra.mxu1 %vm135_vm1, %v344_v57 }
 0x218   :  { %v395_v32 = vpop.f32.mrf.mxu1 }
 0x219   :  { %v4157_v58 = vadd.f32 %v3694_v45, %v395_v32  ;;  %v3697_v32 = vld [vmem:[%s5896_s3 + $0x8] ss:$0 sm:$0xff] }
 0x21b   :  { %v417_v50 = vmul.f32 %v4157_v58, %v4157_v58 }
 0x21d   :  { %479 = vrot.lane.b32.xlu0 %v417_v50, %s3891_s24  ;;  %v425_v60 = vsel %vm135_vm1, %v417_v50, 0.0 }
 0x21e   :  { %v426_v61 = vadd.f32 %v425_v60, %v424_v55 }
 0x220   :  { %v398_v63 = vpop.f32.mrf.mxu1 }
 0x221   :  { %v4164_v1 = vadd.f32 %v3694_v45, %v398_v63 }
 0x223   :  { %v418_v41 = vmul.f32 %v4164_v1, %v4164_v1 }
 0x225   :  { %481 = vrot.lane.b32.xlu1 %v418_v41, %s3891_s24  ;;  %v427_v5 = vsel %vm135_vm1, %v418_v41, 0.0 }
 0x226   :  { %v428_v6 = vadd.f32 %v427_v5, %v426_v61 }
 0x228   :  { %v401_v7 = vpop.f32.mrf.mxu1 }
 0x229   :  { %v4170_v8 = vadd.f32 %v3694_v45, %v401_v7 }
 0x22b   :  { %v419_v9 = vmul.f32 %v4170_v8, %v4170_v8 }
 0x22d   :  { %483 = vrot.lane.b32.xlu2 %v419_v9, %s3891_s24  ;;  %v429_v12 = vsel %vm135_vm1, %v419_v9, 0.0 }
 0x22e   :  { %v430_v13 = vadd.f32 %v429_v12, %v428_v6 }
 0x230   :  { %v404_v16 = vpop.f32.mrf.mxu1 }
 0x231   :  { %v4176_v19 = vadd.f32 %v3694_v45, %v404_v16 }
 0x233   :  { %v420_v20 = vmul.f32 %v4176_v19, %v4176_v19 }
 0x235   :  { %485 = vrot.lane.b32.xlu0 %v420_v20, %s3891_s24  ;;  %v431_v22 = vsel %vm135_vm1, %v420_v20, 0.0 }
 0x236   :  { %v432_v27 = vadd.f32 %v431_v22, %v430_v13 }
 0x238   :  { %v407_v48 = vpop.f32.mrf.mxu1 }
 0x239   :  { %v4182_v30 = vadd.f32 %v3694_v45, %v407_v48 }
 0x23b   :  { %v421_v2 = vmul.f32 %v4182_v30, %v4182_v30 }
 0x23d   :  { %v433_v33 = vsel %vm135_vm1, %v421_v2, 0.0  ;;  %487 = vrot.lane.b32.xlu2 %v421_v2, %s3891_s24 }
 0x23e   :  { %v434_v34 = vadd.f32 %v433_v33, %v432_v27 }
 0x240   :  { %v410_v35 = vpop.f32.mrf.mxu1 }
 0x241   :  { %v4188_v36 = vadd.f32 %v3694_v45, %v410_v35 }
 0x243   :  { %v422_v37 = vmul.f32 %v4188_v36, %v4188_v36 }
 0x245   :  { %v435_v44 = vsel %vm135_vm1, %v422_v37, 0.0 }
 0x246   :  { %v436_v54 = vadd.f32 %v435_v44, %v434_v34 }
 0x26f   :  { %v478_v63 = vpop.permute.xlu2 %477 }
 0x270   :  { %v501_v12 = vsel %vm135_vm1, %v478_v63, 0.0 }
 0x287   :  { %v484_v20 = vpop.permute.xlu2 %483 }
 0x288   :  { %v506_v2 = vsel %vm135_vm1, %v484_v20, 0.0 }
 0x28f   :  { %v480_v5 = vpop.permute.xlu0 %479 }
 0x290   :  { %v502_v7 = vsel %vm135_vm1, %v480_v5, 0.0 }
 0x291   :  { %v503_v22 = vadd.f32 %v502_v7, %v501_v12 }
 0x293   :  { %v413_v39 = vpop.f32.mrf.mxu1 }
 0x294   :  { %v4192_v40 = vadd.f32 %v3694_v45, %v413_v39  ;;  %v3696_v45 = vld [vmem:[%s5896_s3 + $0x7] ss:$0 sm:$0xff] }
 0x296   :  { %v423_v46 = vmul.f32 %v4192_v40, %v4192_v40 }
 0x297   :  { %v482_v50 = vpop.permute.xlu1 %481  ;;  %v488_v35 = vpop.permute.xlu2 %487 }
 0x298   :  { %491 = vrot.lane.b32.xlu0 %v423_v46, %s3891_s24  ;;  %v437_v47 = vsel %vm135_vm1, %v423_v46, 0.0  ;;  %v504_v13 = vsel %vm135_vm1, %v482_v50, 0.0  ;;  %v510_v39 = vsel %vm135_vm1, %v488_v35, 0.0 }
 0x299   :  { %v438_v51 = vadd.f32 %v437_v47, %v436_v54  ;;  %v505_v27 = vadd.f32 %v504_v13, %v503_v22 }
 0x29b   :  { %439 = vadd.xlane.f32.xlu1 %v438_v51  ;;  %v507_v34 = vadd.f32 %v506_v2, %v505_v27 }
 0x2a0   :  { %122 = vrot.lane.b32.xlu0 %v3695_v56, %s3892_s27 }
 0x2a7   :  { %v486_v48 = vpop.permute.xlu0 %485 }
 0x2a8   :  { %1214 = vrot.lane.b32.xlu0 %v3696_v45, %s3892_s27  ;;  %v508_v33 = vsel %vm135_vm1, %v486_v48, 0.0 }
 0x2b0   :  { %1228 = vrot.lane.b32.xlu0 %v3697_v32, %s3892_s27 }
 0x2b4   :  { %489 = vrot.lane.b32.xlu1 %v422_v37, %s3891_s24  ;;  %v509_v37 = vadd.f32 %v508_v33, %v507_v34 }
 0x2b6   :  { %v511_v54 = vadd.f32 %v510_v39, %v509_v37 }
 0x30a   :  { %v492_v44 = vpop.permute.xlu0 %491 }
 0x30b   :  { %v514_v56 = vsel %vm135_vm1, %v492_v44, 0.0 }
 0x30e   :  { %v440_v55 = vpop.xlane.xlu1 %439 }
 0x30f   :  { %v441_v60 = vrot.slane %v440_v55, 4 }
 0x311   :  { %v442_v61 = vadd.f32 %v441_v60, %v440_v55  ;;  %v3651_v55 = vpack.i.bf16 %v4188_v36, %v4192_v40 }
 0x312   :  { %v4220_v32 = vpop.permute.xlu0 %122 }
 0x313   :  { %v443_v41 = vrot.slane %v442_v61, 2  ;;  %v129_v60 = vadd.f32 %v4220_v32, %v3981_v26 }
 0x315   :  { %v444_v6 = vadd.f32 %v443_v41, %v442_v61 }
 0x317   :  { %v445_v9 = vrot.slane %v444_v6, 1 }
 0x319   :  { %v446_v16 = vadd.f32 %v445_v9, %v444_v6 }
 0x31a   :  { %v4222_v50 = vpop.permute.xlu0 %1214 }
 0x31b   :  { %3630 = vpush %v446_v16  ;;  %v1221_v63 = vmul.f32 %v4222_v50, %v129_v60 }
 0x322   :  { %v4228_v61 = vpop.permute.xlu0 %1228 }
 0x323   :  { %v1235_v41 = vadd.f32 %v4228_v61, %v1221_v63 }
 0x325   :  { %v1243_v5 = vmax.f32 %v1235_v41, 0.0 }
 0x326   :  { %v490_v46 = vpop.permute.xlu1 %489 }
 0x327   :  { %v512_v47 = vsel %vm135_vm1, %v490_v46, 0.0 }
 0x328   :  { %v513_v51 = vadd.f32 %v512_v47, %v511_v54 }
 0x32a   :  { %v515_v45 = vadd.f32 %v514_v56, %v513_v51 }
 0x32c   :  { %516 = vadd.xlane.f32.xlu2 %v515_v45 }
 0x344   :  { %3652 = vrot.lane.b32.xlu2 %v3651_v55, %s3893_s6 }
 0x34c   :  { %s3631_s7 = spop %3630  ;;  %1263 = vrot.lane.b32.xlu2 %v1243_v5, %s3891_s24 }
 0x34d   :  { %v448_v6 = vstv %s3631_s7 }
 0x34e   :  { %3738 = vrsqrt.f32 %v448_v6  ;;  %vm455_vm13 = vweird.f32 %v448_v6 }
 0x354   :  { %v3739_v7 = vpop.eup %3738 }
 0x355   :  { %v450_v9 = vmul.f32 %v3739_v7, %v448_v6  ;;  %vm456_vm12 = vweird.f32 %v3739_v7 }
 0x356   :  { %vm457_vm14 = vmor %vm455_vm13, %vm456_vm12 }
 0x357   :  { %v451_v12 = vmul.f32 %v3739_v7, %v450_v9 }
 0x359   :  { %v452_v13 = vmul.f32 0.5, %v451_v12 }
 0x35b   :  { %v453_v26 = vsub.f32 1.5, %v452_v13 }
 0x35d   :  { %v454_v16 = vmul.f32 %v3739_v7, %v453_v26 }
 0x35f   :  { %v458_v20 = vsel %vm457_vm14, %v3739_v7, %v454_v16 }
 0x360   :  { %3632 = vpush %v458_v20 }
 0x391   :  { %s4234_s8 = spop %3632 }
 0x39f   :  { %v517_v22 = vpop.xlane.xlu2 %516 }
 0x3a0   :  { %v518_v27 = vrot.slane %v517_v22, 4 }
 0x3a2   :  { %v519_v48 = vadd.f32 %v518_v27, %v517_v22 }
 0x3a4   :  { %v520_v2 = vrot.slane %v519_v48, 2 }
 0x3a6   :  { %v521_v33 = vadd.f32 %v520_v2, %v519_v48 }
 0x3a7   :  { %v3653_v34 = vpop.permute.xlu2 %3652 }
 0x3a8   :  { %v3654_v35 = vunpack.i.l.bf16 %v3653_v34  ;;  %v522_v37 = vrot.slane %v521_v33, 1  ;;  %v3655_v39 = vunpack.i.h.bf16 %v3653_v34 }
 0x3aa   :  { %663 = vmatpush.msra.mxu1 %v3654_v35  ;;  %3622 = vmatpush.msra.mxu2 %v3654_v35  ;;  %v523_v44 = vadd.f32 %v522_v37, %v521_v33 }
 0x3ac   :  { %3634 = vpush %v523_v44  ;;  %664 = vmatpush.msra.mxu1 %v3655_v39  ;;  %3623 = vmatpush.msra.mxu2 %v3655_v39 }
 0x3dd   :  { %s3635_s9 = spop %3634 }
 0x3de   :  { %v525_v46 = vstv %s3635_s9 }
 0x3df   :  { %3740 = vrsqrt.f32 %v525_v46  ;;  %vm532_vm0 = vweird.f32 %v525_v46 }
 0x3e5   :  { %v3741_v54 = vpop.eup %3740 }
 0x3e6   :  { %v527_v47 = vmul.f32 %v3741_v54, %v525_v46  ;;  %vm533_vm15 = vweird.f32 %v3741_v54 }
 0x3e7   :  { %vm534_vm2 = vmor %vm532_vm0, %vm533_vm15 }
 0x3e8   :  { %v528_v51 = vmul.f32 %v3741_v54, %v527_v47 }
 0x3ea   :  { %v529_v56 = vmul.f32 0.5, %v528_v51  ;;  %v3656_v51 = vpack.i.bf16 %v4176_v19, %v4182_v30 }
 0x3ec   :  { %v530_v45 = vsub.f32 1.5, %v529_v56  ;;  %v3666_v56 = vpack.i.bf16 %v4145_v52, %v4157_v58 }
 0x3ee   :  { %v531_v55 = vmul.f32 %v3741_v54, %v530_v45  ;;  %v131_v45 = vadd.f32 %v4220_v32, %v3977_v23 }
 0x3f0   :  { %v535_v60 = vsel %vm534_vm2, %v3741_v54, %v531_v55  ;;  %v1223_v55 = vmul.f32 %v4222_v50, %v131_v45 }
 0x3f1   :  { %3636 = vpush %v535_v60 }
 0x3f2   :  { %v1237_v60 = vadd.f32 %v4228_v61, %v1223_v55 }
 0x422   :  { %s3637_s10 = spop %3636 }
 0x423   :  { %v537_v63 = vstv %s3637_s10 }
 0x424   :  { %v542_v41 = vmul.f32 %v537_v63, %v4176_v19  ;;  %v538_v5 = vmul.f32 %v537_v63, %v4145_v52  ;;  %v539_v6 = vmul.f32 %v537_v63, %v4157_v58  ;;  %v540_v7 = vmul.f32 %v537_v63, %v4164_v1 }
 0x425   :  { %v541_v13 = vmul.f32 %v537_v63, %v4170_v8  ;;  %v543_v27 = vmul.f32 %v537_v63, %v4182_v30  ;;  %v544_v33 = vmul.f32 %v537_v63, %v4188_v36  ;;  %v545_v37 = vmul.f32 %v537_v63, %v4192_v40 }
 0x426   :  { %562 = vrot.lane.b32.xlu0 %v542_v41, %s3891_s24  ;;  %554 = vrot.lane.b32.xlu1 %v538_v5, %s3891_s24  ;;  %v790_v9 = vsel %vm789_vm3, %v538_v5, 0.0  ;;  %v791_v12 = vsel %vm789_vm3, %v539_v6, 0.0  ;;  %v793_v16 = vsel %vm789_vm3, %v540_v7, 0.0  ;;  %v797_v2 = vsel %vm789_vm3, %v542_v41, 0.0 }
 0x427   :  { %v792_v26 = vadd.f32 %v791_v12, %v790_v9  ;;  %v795_v22 = vsel %vm789_vm3, %v541_v13, 0.0  ;;  %v799_v35 = vsel %vm789_vm3, %v543_v27, 0.0  ;;  %v801_v44 = vsel %vm789_vm3, %v544_v33, 0.0 }
 0x428   :  { %v803_v54 = vsel %vm789_vm3, %v545_v37, 0.0  ;;  %v1245_v63 = vmax.f32 %v1237_v60, 0.0  ;;  %v128_v41 = vadd.f32 %v4220_v32, %v3974_v21 }
 0x429   :  { %v794_v20 = vadd.f32 %v793_v16, %v792_v26  ;;  %v132_v26 = vadd.f32 %v4220_v32, %v3995_v43  ;;  %v127_v43 = vadd.f32 %v4220_v32, %v3968_v17 }
 0x42a   :  { %v1220_v5 = vmul.f32 %v4222_v50, %v128_v41 }
 0x42b   :  { %v796_v48 = vadd.f32 %v795_v22, %v794_v20  ;;  %v130_v22 = vadd.f32 %v4220_v32, %v3970_v18  ;;  %v125_v18 = vadd.f32 %v4220_v32, %v3960_v11 }
 0x42c   :  { %v1234_v23 = vadd.f32 %v4228_v61, %v1220_v5 }
 0x42d   :  { %v798_v34 = vadd.f32 %v797_v2, %v796_v48 }
 0x42e   :  { %566 = vrot.lane.b32.xlu0 %v544_v33, %s3891_s24  ;;  %556 = vrot.lane.b32.xlu1 %v539_v6, %s3891_s24  ;;  %v1242_v6 = vmax.f32 %v1234_v23, 0.0  ;;  %v1219_v33 = vmul.f32 %v4222_v50, %v127_v43  ;;  %v18_v43 = vld [vmem:[%s5897_s1 + $0x8] sm:$0xff] }
 0x42f   :  { %v800_v39 = vadd.f32 %v799_v35, %v798_v34 }
 0x430   :  { %v1233_v34 = vadd.f32 %v4228_v61, %v1219_v33  ;;  %v19_v33 = vld [vmem:[%s5897_s1 + $0x10] sm:$0xff] }
 0x431   :  { %v802_v46 = vadd.f32 %v801_v44, %v800_v39 }
 0x432   :  { %v1241_v35 = vmax.f32 %v1233_v34, 0.0  ;;  %v20_v34 = vld [vmem:[%s5897_s1 + $0x18] sm:$0xff] }
 0x433   :  { %v4256_v47 = vadd.f32 %v803_v54, %v802_v46 }
 0x436   :  { %3657 = vrot.lane.b32.xlu0 %v3656_v51, %s3893_s6  ;;  %558 = vrot.lane.b32.xlu1 %v540_v7, %s3891_s24  ;;  %v126_v7 = vadd.f32 %v4220_v32, %v3964_v14  ;;  %v1224_v14 = vmul.f32 %v4222_v50, %v132_v26 }
 0x438   :  { %v1218_v9 = vmul.f32 %v4222_v50, %v126_v7  ;;  %v1238_v16 = vadd.f32 %v4228_v61, %v1224_v14 }
 0x43a   :  { %v1232_v21 = vadd.f32 %v4228_v61, %v1218_v9  ;;  %v1246_v20 = vmax.f32 %v1238_v16, 0.0 }
 0x43c   :  { %v1240_v12 = vmax.f32 %v1232_v21, 0.0 }
 0x43e   :  { %3667 = vrot.lane.b32.xlu0 %v3666_v56, %s3893_s6  ;;  %560 = vrot.lane.b32.xlu1 %v541_v13, %s3891_s24  ;;  %v3661_v13 = vpack.i.bf16 %v4164_v1, %v4170_v8 }
 0x446   :  { %1267 = vrot.lane.b32.xlu0 %v1245_v63, %s3891_s24  ;;  %564 = vrot.lane.b32.xlu1 %v543_v27, %s3891_s24  ;;  %v1222_v27 = vmul.f32 %v4222_v50, %v130_v22 }
 0x448   :  { %v1236_v48 = vadd.f32 %v4228_v61, %v1222_v27 }
 0x44a   :  { %v1244_v2 = vmax.f32 %v1236_v48, 0.0 }
 0x44e   :  { %1261 = vrot.lane.b32.xlu0 %v1242_v6, %s3891_s24  ;;  %568 = vrot.lane.b32.xlu1 %v545_v37, %s3891_s24  ;;  %v1217_v37 = vmul.f32 %v4222_v50, %v125_v18  ;;  %v22_v18 = vld [vmem:[%s5897_s1 + $0x28] sm:$0xff] }
 0x450   :  { %v1231_v39 = vadd.f32 %v4228_v61, %v1217_v37  ;;  %v23_v37 = vld [vmem:[%s5897_s1 + $0x30] sm:$0xff] }
 0x452   :  { %v1239_v44 = vmax.f32 %v1231_v39, 0.0  ;;  %v24_v39 = vld [vmem:[%s5897_s1 + $0x38] sm:$0xff] }
 0x456   :  { %1257 = vrot.lane.b32.xlu0 %v1240_v12, %s3891_s24  ;;  %3662 = vrot.lane.b32.xlu1 %v3661_v13, %s3893_s6  ;;  %v4317_v13 = vpop.permute.xlu2 %1263 }
 0x45e   :  { %1269 = vrot.lane.b32.xlu1 %v1246_v20, %s3891_s24 }
 0x466   :  { %1265 = vrot.lane.b32.xlu1 %v1244_v2, %s3891_s24  ;;  %v17_v2 = vld [vmem:[%s5897_s1] sm:$0xff] }
 0x46e   :  { %1259 = vrot.lane.b32.xlu1 %v1241_v35, %s3891_s24  ;;  %v21_v35 = vld [vmem:[%s5897_s1 + $0x20] sm:$0xff] }
 0x476   :  { %1255 = vrot.lane.b32.xlu1 %v1239_v44, %s3891_s24  ;;  %v25_v44 = vld [vmem:[%s5897_s1 + $0x40] sm:$0xff] }
 0x498   :  { %v563_v17 = vpop.permute.xlu0 %562  ;;  %v555_v46 = vpop.permute.xlu1 %554 }
 0x499   :  { %578 = vxpose.xlu2.b32.start [1/8] (short) (narrow) %v555_v46, 32  ;;  %v27_v46 = vld [vmem:[%s5897_s1 + $0x50] sm:$0xff] }
 0x4a0   :  { %v567_v54 = vpop.permute.xlu0 %566  ;;  %v557_v51 = vpop.permute.xlu1 %556 }
 0x4a1   :  { %579 = vxpose.xlu2.b32.cont [2/8] (short) (narrow) %v557_v51, 32  ;;  %v29_v51 = vld [vmem:[%s5897_s1 + $0x60] sm:$0xff] }
 0x4a8   :  { %v3658_v56 = vpop.permute.xlu0 %3657  ;;  %v559_v45 = vpop.permute.xlu1 %558 }
 0x4a9   :  { %v3659_v55 = vunpack.i.l.bf16 %v3658_v56  ;;  %580 = vxpose.xlu2.b32.cont [3/8] (short) (narrow) %v559_v45, 32  ;;  %v3660_v11 = vunpack.i.h.bf16 %v3658_v56  ;;  %v30_v56 = vld [vmem:[%s5897_s1 + $0x68] sm:$0xff] }
 0x4ab   :  { %665 = vmatpush.msra.mxu1 %v3659_v55  ;;  %3624 = vmatpush.msra.mxu2 %v3659_v55  ;;  %v31_v55 = vld [vmem:[%s5897_s1 + $0x70] sm:$0xff] }
 0x4ad   :  { %666 = vmatpush.msra.mxu1 %v3660_v11  ;;  %3625 = vmatpush.msra.mxu2 %v3660_v11 }
 0x4b0   :  { %v561_v32 = vpop.permute.xlu1 %560  ;;  %v3668_v60 = vpop.permute.xlu0 %3667 }
 0x4b1   :  { %581 = vxpose.xlu2.b32.cont [4/8] (short) (narrow) %v561_v32, 32  ;;  %v3669_v23 = vunpack.i.l.bf16 %v3668_v60  ;;  %v3670_v7 = vunpack.i.h.bf16 %v3668_v60 }
 0x4b8   :  { %v565_v50 = vpop.permute.xlu1 %564  ;;  %v4306_v6 = vpop.permute.xlu0 %1267 }
 0x4b9   :  { %582 = vxpose.xlu2.b32.cont [5/8] (short) (narrow) %v563_v17, 32  ;;  %v26_v17 = vld [vmem:[%s5897_s1 + $0x48] sm:$0xff] }
 0x4c0   :  { %v569_v61 = vpop.permute.xlu1 %568  ;;  %v4312_v21 = vpop.permute.xlu0 %1261 }
 0x4c1   :  { %583 = vxpose.xlu2.b32.cont [6/8] (short) (narrow) %v565_v50, 32  ;;  %v460_v50 = vstv %s4234_s8 }
 0x4c2   :  { %v4396_v60 = vmul.f32 %v460_v50, %v4145_v52 }
 0x4c8   :  { %v3663_v63 = vpop.permute.xlu1 %3662  ;;  %v4324_v14 = vpop.permute.xlu0 %1257 }
 0x4c9   :  { %v3664_v41 = vunpack.i.l.bf16 %v3663_v63  ;;  %584 = vxpose.xlu2.b32.cont [7/8] (short) (narrow) %v567_v54, 32  ;;  %v3665_v5 = vunpack.i.h.bf16 %v3663_v63  ;;  %v28_v54 = vld [vmem:[%s5897_s1 + $0x58] sm:$0xff] }
 0x4cb   :  { %667 = vmatpush.msra.mxu1 %v3664_v41  ;;  %3626 = vmatpush.msra.mxu2 %v3664_v41  ;;  %v4403_v41 = vmul.f32 %v460_v50, %v4157_v58 }
 0x4cd   :  { %668 = vmatpush.msra.mxu1 %v3665_v5  ;;  %3627 = vmatpush.msra.mxu2 %v3665_v5 }
 0x4cf   :  { %669 = vmatpush.msra.mxu1 %v3669_v23  ;;  %3628 = vmatpush.msra.mxu2 %v3669_v23  ;;  %v4410_v23 = vmul.f32 %v460_v50, %v4164_v1 }
 0x4d0   :  { %v4308_v9 = vpop.permute.xlu1 %1269 }
 0x4d1   :  { %585 = vxpose.xlu2.b32.end [8/8] (short) (narrow) %v569_v61, 32  ;;  %670 = vmatpush.msra.mxu1 %v3670_v7 }
 0x4d2   :  { %3629 = vmatpush.msra.mxu2 %v3670_v7 }
 0x4d4   :  { %1335 = vmatpush.msrb.mxu2 %v4308_v9 }
 0x4d6   :  { %1336 = vmatpush.msrb.mxu2 %v4306_v6 }
 0x4d8   :  { %v4314_v12 = vpop.permute.xlu1 %1265 }
 0x4d9   :  { %1337 = vmatpush.msrb.mxu2 %v4314_v12 }
 0x4db   :  { %1338 = vmatpush.msrb.mxu2 %v4317_v13 }
 0x4dd   :  { %1339 = vmatpush.msrb.mxu2 %v4312_v21 }
 0x4e0   :  { %v4321_v26 = vpop.permute.xlu1 %1259 }
 0x4e1   :  { %1340 = vmatpush.msrb.mxu2 %v4321_v26 }
 0x4e3   :  { %1341 = vmatpush.msrb.mxu2 %v4324_v14 }
 0x4e8   :  { %v4327_v16 = vpop.permute.xlu1 %1255 }
 0x4e9   :  { %1342 = vmatpush.msrb.mxu2 %v4327_v16 }
 0x532   :  { %v594_v20 = vpop.trf.xlu2 }
 0x533   :  { %3492 = vmatmul.msk.f32.vlgmr.msra.gmra.mxu1 %vm642_vm4, %v594_v20  ;;  %v4417_v20 = vmul.f32 %v460_v50, %v4170_v8 }
 0x53a   :  { %v595_v22 = vpop.trf.xlu2 }
 0x53b   :  { %3493 = vmatmul.msk.f32.vlgmr.msra.gmra.mxu2 %vm642_vm4, %v595_v22 }
 0x542   :  { %v596_v27 = vpop.trf.xlu2 }
 0x543   :  { %3494 = vmatmul.msk.f32.gmra.mxu2 %vm642_vm4, %v596_v27  ;;  %v4424_v27 = vmul.f32 %v460_v50, %v4176_v19 }
 0x54a   :  { %v597_v48 = vpop.trf.xlu2 }
 0x54b   :  { %3495 = vmatmul.msk.f32.gmra.mxu2 %vm642_vm4, %v597_v48 }
 0x553   :  { %3504 = vmatmul.msk.f32.vlgmr.msrb.gmra.mxu2 %vm642_vm4, %v17_v2  ;;  %v4431_v2 = vmul.f32 %v460_v50, %v4182_v30 }
 0x55b   :  { %3505 = vmatmul.msk.f32.gmra.mxu2 %vm642_vm4, %v18_v43 }
 0x563   :  { %3506 = vmatmul.msk.f32.gmra.mxu2 %vm642_vm4, %v19_v33  ;;  %v4438_v33 = vmul.f32 %v460_v50, %v4188_v36 }
 0x56b   :  { %3507 = vmatmul.msk.f32.gmra.mxu2 %vm642_vm4, %v20_v34 }
 0x573   :  { %3508 = vmatmul.msk.f32.gmra.mxu2 %vm642_vm4, %v21_v35  ;;  %v4445_v35 = vmul.f32 %v460_v50, %v4192_v40 }
 0x57b   :  { %3509 = vmatmul.msk.f32.gmra.mxu2 %vm642_vm4, %v22_v18 }
 0x583   :  { %3510 = vmatmul.msk.f32.gmra.mxu2 %vm642_vm4, %v23_v37 }
 0x58b   :  { %3511 = vmatmul.msk.f32.gmra.mxu2 %vm642_vm4, %v24_v39 }
 0x593   :  { %3512 = vmatmul.msk.f32.gmra.mxu2 %vm642_vm4, %v25_v44 }
 0x59b   :  { %3513 = vmatmul.msk.f32.gmra.mxu2 %vm642_vm4, %v26_v17 }
 0x5a3   :  { %3514 = vmatmul.msk.f32.gmra.mxu2 %vm642_vm4, %v27_v46 }
 0x5ab   :  { %3515 = vmatmul.msk.f32.gmra.mxu2 %vm642_vm4, %v28_v54  ;;  %v805_v54 = vrot.slane %v4256_v47, 4 }
 0x5b0   :  { %v672_v61 = vpop.f32.mrf.mxu1 }
 0x5b3   :  { %3516 = vmatmul.msk.f32.gmra.mxu2 %vm642_vm4, %v29_v51  ;;  %v32_v51 = vld [vmem:[%s5897_s1 + $0x78] sm:$0xff] }
 0x5bb   :  { %3517 = vmatmul.msk.f32.gmra.mxu2 %vm642_vm4, %v30_v56  ;;  %v806_v56 = vadd.f32 %v805_v54, %v4256_v47  ;;  %v1438_v47 = vld [vmem:[%s5894_s2 + $0x60] sm:$0xff]  ;;  %v1433_v54 = vld [vmem:[%s5894_s2 + $0x38] sm:$0xff] }
 0x5be   :  { %v675_v45 = vpop.f32.mrf.mxu2 }
 0x5c3   :  { %3518 = vmatmul.msk.f32.gmra.mxu2 %vm642_vm4, %v31_v55  ;;  %v807_v55 = vrot.slane %v806_v56, 2 }
 0x5c6   :  { %v678_v11 = vpop.f32.mrf.mxu2 }
 0x5cb   :  { %3519 = vmatmul.msk.f32.gmra.mxu2 %vm642_vm4, %v32_v51  ;;  %v1432_v51 = vld [vmem:[%s5894_s2 + $0x30] sm:$0xff] }
 0x5ce   :  { %v681_v32 = vpop.f32.mrf.mxu2 }
 0x5cf   :  { %760 = vmatpush.msra.mxu3 %v681_v32 }
 0x5d1   :  { %761 = vmatpush.msra.mxu3 %v678_v11  ;;  %v808_v11 = vadd.f32 %v807_v55, %v806_v56 }
 0x5d3   :  { %762 = vmatpush.msra.mxu3 %v675_v45  ;;  %v809_v50 = vrot.slane %v808_v11, 1 }
 0x5d5   :  { %763 = vmatpush.msra.mxu3 %v672_v61  ;;  %v810_v61 = vadd.f32 %v809_v50, %v808_v11 }
 0x5d6   :  { %3496 = vmatmul.msk.f32.vlgmr.msra.gmra.mxu3 %vm135_vm1, %v4396_v60  ;;  %v4400_v63 = vpop.f32.mrf.mxu2 }
 0x5de   :  { %3497 = vmatmul.msk.f32.gmra.mxu3 %vm135_vm1, %v4403_v41  ;;  %v4407_v5 = vpop.f32.mrf.mxu2 }
 0x5e6   :  { %3498 = vmatmul.msk.f32.gmra.mxu3 %vm135_vm1, %v4410_v23  ;;  %v4414_v7 = vpop.f32.mrf.mxu2 }
 0x5ee   :  { %3499 = vmatmul.msk.f32.gmra.mxu3 %vm135_vm1, %v4417_v20  ;;  %v4421_v22 = vpop.f32.mrf.mxu2 }
 0x5f6   :  { %3500 = vmatmul.msk.f32.gmra.mxu3 %vm135_vm1, %v4424_v27  ;;  %v4428_v48 = vpop.f32.mrf.mxu2 }
 0x5fe   :  { %3501 = vmatmul.msk.f32.gmra.mxu3 %vm135_vm1, %v4431_v2  ;;  %v4435_v43 = vpop.f32.mrf.mxu2 }
 0x606   :  { %3502 = vmatmul.msk.f32.gmra.mxu3 %vm135_vm1, %v4438_v33  ;;  %v4442_v34 = vpop.f32.mrf.mxu2 }
 0x60e   :  { %3503 = vmatmul.msk.f32.gmra.mxu3 %vm135_vm1, %v4445_v35  ;;  %v4449_v18 = vpop.f32.mrf.mxu2 }
 0x616   :  { %v1368_v37 = vpop.f32.mrf.mxu2 }
 0x617   :  { %1400 = vrot.lane.b32.xlu0 %v1368_v37, %s3892_s27  ;;  %v1439_v37 = vld [vmem:[%s5894_s2 + $0x68] sm:$0xff] }
 0x618   :  { %1474 = vmatpush.msrb.mxu0 %v1439_v37 }
 0x61a   :  { %1475 = vmatpush.msrb.mxu0 %v1438_v47 }
 0x61e   :  { %v1371_v39 = vpop.f32.mrf.mxu2 }
 0x61f   :  { %1402 = vrot.lane.b32.xlu1 %v1371_v39, %s3892_s27  ;;  %v1437_v39 = vld [vmem:[%s5894_s2 + $0x58] sm:$0xff] }
 0x620   :  { %1476 = vmatpush.msrb.mxu0 %v1437_v39 }
 0x626   :  { %v1374_v44 = vpop.f32.mrf.mxu2 }
 0x627   :  { %1404 = vrot.lane.b32.xlu0 %v1374_v44, %s3892_s27  ;;  %v1436_v44 = vld [vmem:[%s5894_s2 + $0x50] sm:$0xff] }
 0x628   :  { %1477 = vmatpush.msrb.mxu0 %v1436_v44 }
 0x62e   :  { %v1377_v17 = vpop.f32.mrf.mxu2 }
 0x62f   :  { %1406 = vrot.lane.b32.xlu1 %v1377_v17, %s3892_s27  ;;  %v1435_v17 = vld [vmem:[%s5894_s2 + $0x48] sm:$0xff] }
 0x630   :  { %1478 = vmatpush.msrb.mxu0 %v1435_v17 }
 0x636   :  { %v1380_v46 = vpop.f32.mrf.mxu2 }
 0x637   :  { %1408 = vrot.lane.b32.xlu0 %v1380_v46, %s3892_s27  ;;  %v1434_v46 = vld [vmem:[%s5894_s2 + $0x40] sm:$0xff] }
 0x638   :  { %1479 = vmatpush.msrb.mxu0 %v1434_v46 }
 0x63a   :  { %1480 = vmatpush.msrb.mxu0 %v1433_v54 }
 0x63c   :  { %1481 = vmatpush.msrb.mxu0 %v1432_v51 }
 0x63e   :  { %v1383_v45 = vpop.f32.mrf.mxu2 }
 0x63f   :  { %1410 = vrot.lane.b32.xlu1 %v1383_v45, %s3892_s27 }
 0x646   :  { %v1386_v32 = vpop.f32.mrf.mxu2 }
 0x647   :  { %1412 = vrot.lane.b32.xlu0 %v1386_v32, %s3892_s27 }
 0x64f   :  { %812 = vrot.lane.b32.xlu0 %v810_v61, %s3891_s24 }
 0x689   :  { %v1401_v56 = vpop.permute.xlu0 %1400 }
 0x68a   :  { %v1424_v45 = vsel %vm135_vm1, %v4400_v63, %v1401_v56  ;;  %v1389_v56 = vpop.f32.mrf.mxu2 }
 0x68b   :  { %3520 = vmatmul.msk.f32.vlgmr.msrb.gmra.mxu0 %vm642_vm4, %v1424_v45 }
 0x691   :  { %v1403_v55 = vpop.permute.xlu1 %1402 }
 0x692   :  { %v1425_v11 = vsel %vm135_vm1, %v4407_v5, %v1403_v55 }
 0x693   :  { %3521 = vmatmul.msk.f32.gmra.mxu0 %vm642_vm4, %v1425_v11 }
 0x699   :  { %v1405_v32 = vpop.permute.xlu0 %1404 }
 0x69a   :  { %v1426_v50 = vsel %vm135_vm1, %v4414_v7, %v1405_v32  ;;  %v4546_v32 = vld [vmem:[%s5896_s3 + $0x9] ss:$0 sm:$0xff] }
 0x69b   :  { %3522 = vmatmul.msk.f32.gmra.mxu0 %vm642_vm4, %v1426_v50 }
 0x6a1   :  { %v1407_v61 = vpop.permute.xlu1 %1406 }
 0x6a2   :  { %v1427_v37 = vsel %vm135_vm1, %v4421_v22, %v1407_v61 }
 0x6a3   :  { %3523 = vmatmul.msk.f32.gmra.mxu0 %vm642_vm4, %v1427_v37 }
 0x6a9   :  { %v1409_v63 = vpop.permute.xlu0 %1408 }
 0x6aa   :  { %v1428_v47 = vsel %vm135_vm1, %v4428_v48, %v1409_v63 }
 0x6ab   :  { %3524 = vmatmul.msk.f32.gmra.mxu0 %vm642_vm4, %v1428_v47 }
 0x6b1   :  { %v1411_v5 = vpop.permute.xlu1 %1410 }
 0x6b2   :  { %v1429_v39 = vsel %vm135_vm1, %v4435_v43, %v1411_v5 }
 0x6b3   :  { %3525 = vmatmul.msk.f32.gmra.mxu0 %vm642_vm4, %v1429_v39  ;;  %v688_v39 = vmul.f32 64.0, %v4176_v19 }
 0x6b9   :  { %v1413_v7 = vpop.permute.xlu0 %1412 }
 0x6ba   :  { %v1430_v44 = vsel %vm135_vm1, %v4442_v34, %v1413_v7  ;;  %v684_v34 = vmul.f32 64.0, %v4145_v52  ;;  %v1508_v52 = vld [vmem:[%s5894_s2 + $0x78] sm:$0xff] }
 0x6bb   :  { %3526 = vmatmul.msk.f32.gmra.mxu0 %vm642_vm4, %v1430_v44  ;;  %v685_v44 = vmul.f32 64.0, %v4157_v58 }
 0x6c1   :  { %v4510_v22 = vpop.permute.xlu0 %812 }
 0x6c2   :  { %v818_v17 = vmul.f32 %v4510_v22, %v4417_v20  ;;  %v816_v48 = vmul.f32 %v4510_v22, %v4403_v41  ;;  %v815_v46 = vmul.f32 %v4510_v22, %v4396_v60  ;;  %v691_v20 = vmul.f32 64.0, %v4192_v40  ;;  %v1510_v60 = vld [vmem:[%s5894_s2 + $0x88] sm:$0xff]  ;;  %v1509_v41 = vld [vmem:[%s5894_s2 + $0x80] sm:$0xff]  ;;  %v1507_v40 = vld [vmem:[%s5894_s2 + $0x70] sm:$0xff] }
 0x6c3   :  { %1549 = vmatpush.msrb.mxu1 %v1510_v60  ;;  %v819_v45 = vmul.f32 %v4510_v22, %v4424_v27  ;;  %v817_v11 = vmul.f32 %v4510_v22, %v4410_v23  ;;  %v687_v23 = vmul.f32 64.0, %v4170_v8  ;;  %v689_v8 = vmul.f32 64.0, %v4182_v30 }
 0x6c4   :  { %v832_v43 = vsel %vm135_vm1, %v818_v17, 0.0  ;;  %v826_v54 = vsel %vm135_vm1, %v816_v48, 0.0  ;;  %v823_v51 = vsel %vm135_vm1, %v815_v46, 0.0  ;;  %v686_v46 = vmul.f32 64.0, %v4164_v1 }
 0x6c5   :  { %833 = vadd.xlane.f32.xlu2 %v832_v43  ;;  %827 = vadd.xlane.f32.xlu0 %v826_v54  ;;  %v835_v55 = vsel %vm135_vm1, %v819_v45, 0.0  ;;  %v829_v61 = vsel %vm135_vm1, %v817_v11, 0.0 }
 0x6c6   :  { %824 = vadd.xlane.f32.xlu1 %v823_v51  ;;  %1550 = vmatpush.msrb.mxu1 %v1509_v41 }
 0x6c8   :  { %1551 = vmatpush.msrb.mxu1 %v1508_v52 }
 0x6ca   :  { %1552 = vmatpush.msrb.mxu1 %v1507_v40 }
 0x6d9   :  { %700 = vrot.lane.b32.xlu0 %v684_v34, %s3893_s6 }
 0x6dd   :  { %714 = vrot.lane.b32.xlu2 %v691_v20, %s3893_s6 }
 0x6df   :  { %1414 = vrot.lane.b32.xlu1 %v1389_v56, %s3892_s27 }
 0x703   :  { %836 = vadd.xlane.f32.xlu0 %v835_v55  ;;  %v765_v55 = vpop.f32.mrf.mxu3 }
 0x708   :  { %v1483_v50 = vpop.f32.mrf.mxu0 }
 0x709   :  { %v1484_v37 = vadd.f32 %v4546_v32, %v1483_v50  ;;  %830 = vadd.xlane.f32.xlu1 %v829_v61 }
 0x70b   :  { %3528 = vmatmul.msk.f32.vlgmr.msrb.gmra.mxu1 %vm135_vm1, %v1484_v37 }
 0x710   :  { %v1486_v27 = vpop.f32.mrf.mxu0 }
 0x711   :  { %v1487_v63 = vadd.f32 %v4546_v32, %v1486_v27 }
 0x713   :  { %3529 = vmatmul.msk.f32.gmra.mxu1 %vm135_vm1, %v1487_v63 }
 0x717   :  { %706 = vrot.lane.b32.xlu0 %v687_v23, %s3893_s6  ;;  %v820_v23 = vmul.f32 %v4510_v22, %v4431_v2  ;;  %v821_v2 = vmul.f32 %v4510_v22, %v4438_v33  ;;  %v690_v33 = vmul.f32 64.0, %v4188_v36 }
 0x718   :  { %v1489_v47 = vpop.f32.mrf.mxu0 }
 0x719   :  { %v1490_v5 = vadd.f32 %v4546_v32, %v1489_v47  ;;  %v841_v0 = vsel %vm135_vm1, %v821_v2, 0.0  ;;  %v994_v2 = vmul.f32 0.5, %v340_v59 }
 0x71b   :  { %3530 = vmatmul.msk.f32.gmra.mxu1 %vm135_vm1, %v1490_v5  ;;  %v991_v5 = vmul.f32 0.5, %v337_v4  ;;  %v822_v4 = vmul.f32 %v4510_v22, %v4445_v35 }
 0x71f   :  { %708 = vrot.lane.b32.xlu0 %v688_v39, %s3893_s6 }
 0x720   :  { %v1492_v7 = vpop.f32.mrf.mxu0 }
 0x721   :  { %v1493_v17 = vadd.f32 %v4546_v32, %v1492_v7 }
 0x722   :  { %702 = vrot.lane.b32.xlu1 %v685_v44, %s3893_s6 }
 0x723   :  { %3531 = vmatmul.msk.f32.gmra.mxu1 %vm135_vm1, %v1493_v17  ;;  %v838_v17 = vsel %vm135_vm1, %v820_v23, 0.0 }
 0x727   :  { %710 = vrot.lane.b32.xlu0 %v689_v8, %s3893_s6 }
 0x728   :  { %v1495_v48 = vpop.f32.mrf.mxu0 }
 0x729   :  { %v1496_v19 = vadd.f32 %v4546_v32, %v1495_v48 }
 0x72a   :  { %704 = vrot.lane.b32.xlu1 %v686_v46, %s3893_s6 }
 0x72b   :  { %3532 = vmatmul.msk.f32.gmra.mxu1 %vm135_vm1, %v1496_v19  ;;  %v4591_v19 = vpop.f32.mrf.mxu3 }
 0x730   :  { %v1498_v58 = vpop.f32.mrf.mxu0 }
 0x731   :  { %v1499_v43 = vadd.f32 %v4546_v32, %v1498_v58 }
 0x733   :  { %3533 = vmatmul.msk.f32.gmra.mxu1 %vm135_vm1, %v1499_v43  ;;  %v4596_v35 = vpop.f32.mrf.mxu3 }
 0x738   :  { %v1501_v54 = vpop.f32.mrf.mxu0  ;;  %v828_v20 = vpop.xlane.xlu0 %827 }
 0x739   :  { %v1502_v51 = vadd.f32 %v4546_v32, %v1501_v54  ;;  %v825_v30 = vpop.xlane.xlu1 %824  ;;  %v834_v48 = vpop.xlane.xlu2 %833 }
 0x73a   :  { %v847_v34 = vadd.f32 64.0, %v825_v30  ;;  %v850_v46 = vadd.f32 64.0, %v834_v48  ;;  %v4593_v30 = vadd.f32 64.0, %v828_v20 }
 0x73b   :  { %3534 = vmatmul.msk.f32.gmra.mxu1 %vm135_vm1, %v1502_v51 }
 0x73c   :  { %3742 = vrcp.f32 %v847_v34  ;;  %v866_v41 = vand.u32 2147483648, %v847_v34  ;;  %v864_v40 = vand.u32 2147483647, %v847_v34  ;;  %vm860_vm6 = vweird.f32 %v847_v34 }
 0x73d   :  { %3744 = vrcp.f32 %v850_v46  ;;  %v911_v36 = vand.u32 2147483648, %v850_v46  ;;  %vm905_vm10 = vweird.f32 %v850_v46 }
 0x73e   :  { %v867_v50 = vor.u32 1.1754944e-38, %v866_v41  ;;  %vm865_vm8 = vcmp.eq.f32.partialorder %v864_v40, 8.507059e+37 }
 0x742   :  { %v3743_v1 = vpop.eup %3742 }
 0x743   :  { %v856_v56 = vmul.f32 %v3743_v1, %v847_v34  ;;  %vm861_vm5 = vweird.f32 %v3743_v1  ;;  %v3745_v58 = vpop.eup %3744 }
 0x744   :  { %vm862_vm7 = vmor %vm860_vm6, %vm861_vm5  ;;  %v901_v51 = vmul.f32 %v3745_v58, %v850_v46  ;;  %vm906_vm9 = vweird.f32 %v3745_v58  ;;  %vm875_vm5 = vweird.f32 %v4593_v30 }
 0x745   :  { %v857_v60 = vsub.f32 1.0, %v856_v56  ;;  %vm907_vm11 = vmor %vm905_vm10, %vm906_vm9 }
 0x746   :  { %v902_v34 = vsub.f32 1.0, %v901_v51 }
 0x747   :  { %v858_v52 = vmul.f32 %v3743_v1, %v857_v60 }
 0x748   :  { %v903_v41 = vmul.f32 %v3745_v58, %v902_v34 }
 0x749   :  { %v859_v45 = vadd.f32 %v3743_v1, %v858_v52 }
 0x74a   :  { %v904_v40 = vadd.f32 %v3745_v58, %v903_v41 }
 0x74b   :  { %v701_v11 = vpop.permute.xlu0 %700  ;;  %v863_v37 = vsel %vm862_vm7, %v3743_v1, %v859_v45 }
 0x74c   :  { %v766_v61 = vadd.f32 %v765_v55, %v701_v11  ;;  %v868_v27 = vsel %vm865_vm8, %v867_v50, %v863_v37  ;;  %v909_v55 = vand.u32 2147483647, %v850_v46  ;;  %v774_v11 = vpop.f32.mrf.mxu3 }
 0x74e   :  { %v869_v63 = vmul.f32 %v868_v27, %v766_v61  ;;  %v908_v61 = vsel %vm907_vm11, %v3745_v58, %v904_v40  ;;  %v912_v27 = vor.u32 1.1754944e-38, %v911_v36  ;;  %vm910_vm12 = vcmp.eq.f32.partialorder %v909_v55, 8.507059e+37 }
 0x74f   :  { %v995_v55 = vmul.f32 0.5, %v341_v3 }
 0x750   :  { %v983_v47 = vmul.f32 0.5, %v869_v63 }
 0x751   :  { %v1415_v39 = vpop.permute.xlu1 %1414 }
 0x752   :  { %v1431_v7 = vsel %vm135_vm1, %v4449_v18, %v1415_v39  ;;  %v4579_v44 = vadd.f32 %v991_v5, %v983_v47  ;;  %v844_v18 = vsel %vm135_vm1, %v822_v4, 0.0  ;;  %v913_v39 = vsel %vm910_vm12, %v912_v27, %v908_v61 }
 0x753   :  { %3527 = vmatmul.msk.f32.gmra.mxu0 %vm642_vm4, %v1431_v7 }
 0x754   :  { %839 = vadd.xlane.f32.xlu1 %v838_v17  ;;  %v1009_v8 = vsel %vm135_vm1, %v4579_v44, 0.0 }
 0x755   :  { %1010 = vadd.xlane.f32.xlu0 %v1009_v8 }
 0x75c   :  { %842 = vadd.xlane.f32.xlu1 %v841_v0 }
 0x764   :  { %845 = vadd.xlane.f32.xlu1 %v844_v18 }
 0x776   :  { %v837_v43 = vpop.xlane.xlu0 %836 }
 0x777   :  { %v851_v54 = vadd.f32 64.0, %v837_v43  ;;  %v777_v43 = vpop.f32.mrf.mxu3 }
 0x779   :  { %3746 = vrcp.f32 %v851_v54  ;;  %v926_v8 = vand.u32 2147483648, %v851_v54  ;;  %vm920_vm14 = vweird.f32 %v851_v54  ;;  %v924_v4 = vand.u32 2147483647, %v851_v54 }
 0x77a   :  { %3748 = vrcp.f32 %v4593_v30 }
 0x77b   :  { %v927_v51 = vor.u32 1.1754944e-38, %v926_v8  ;;  %vm925_vm2 = vcmp.eq.f32.partialorder %v924_v4, 8.507059e+37  ;;  %v993_v8 = vmul.f32 0.5, %v339_v49 }
 0x77c   :  { %v831_v1 = vpop.xlane.xlu1 %830 }
 0x77d   :  { %712 = vrot.lane.b32.xlu1 %v690_v33, %s3893_s6  ;;  %v4600_v22 = vadd.f32 64.0, %v831_v1 }
 0x77f   :  { %v3747_v56 = vpop.eup %3746  ;;  %3750 = vrcp.f32 %v4600_v22  ;;  %vm890_vm9 = vweird.f32 %v4600_v22 }
 0x780   :  { %v916_v60 = vmul.f32 %v3747_v56, %v851_v54  ;;  %v3749_v20 = vpop.eup %3748  ;;  %vm921_vm13 = vweird.f32 %v3747_v56 }
 0x781   :  { %v871_v45 = vmul.f32 %v3749_v20, %v4593_v30  ;;  %vm922_vm15 = vmor %vm920_vm14, %vm921_vm13  ;;  %vm876_vm0 = vweird.f32 %v3749_v20 }
 0x782   :  { %v917_v52 = vsub.f32 1.0, %v916_v60  ;;  %v881_v60 = vand.u32 2147483648, %v4593_v30  ;;  %vm877_vm6 = vmor %vm875_vm5, %vm876_vm0 }
 0x783   :  { %v872_v47 = vsub.f32 1.0, %v871_v45 }
 0x784   :  { %v918_v37 = vmul.f32 %v3747_v56, %v917_v52 }
 0x785   :  { %v4604_v50 = vpop.eup %3750  ;;  %v873_v18 = vmul.f32 %v3749_v20, %v872_v47 }
 0x786   :  { %v886_v5 = vmul.f32 %v4604_v50, %v4600_v22  ;;  %v919_v17 = vadd.f32 %v3747_v56, %v918_v37  ;;  %vm891_vm7 = vweird.f32 %v4604_v50  ;;  %v896_v37 = vand.u32 2147483648, %v4600_v22 }
 0x787   :  { %v874_v1 = vadd.f32 %v3749_v20, %v873_v18  ;;  %vm892_vm10 = vmor %vm890_vm9, %vm891_vm7 }
 0x788   :  { %v887_v48 = vsub.f32 1.0, %v886_v5  ;;  %v923_v46 = vsel %vm922_vm15, %v3747_v56, %v919_v17  ;;  %v879_v56 = vand.u32 2147483647, %v4593_v30  ;;  %v992_v17 = vmul.f32 0.5, %v338_v28 }
 0x789   :  { %v707_v63 = vpop.permute.xlu0 %706  ;;  %v928_v59 = vsel %vm925_vm2, %v927_v51, %v923_v46  ;;  %v878_v36 = vsel %vm877_vm6, %v3749_v20, %v874_v1  ;;  %v894_v20 = vand.u32 2147483647, %v4600_v22 }
 0x78a   :  { %v775_v23 = vadd.f32 %v774_v11, %v707_v63  ;;  %v888_v54 = vmul.f32 %v4604_v50, %v887_v48  ;;  %v882_v11 = vor.u32 1.1754944e-38, %v881_v60  ;;  %vm880_vm8 = vcmp.eq.f32.partialorder %v879_v56, 8.507059e+37 }
 0x78b   :  { %vm895_vm11 = vcmp.eq.f32.partialorder %v894_v20, 8.507059e+37 }
 0x78c   :  { %v914_v7 = vmul.f32 %v913_v39, %v775_v23  ;;  %v889_v61 = vadd.f32 %v4604_v50, %v888_v54  ;;  %v883_v30 = vsel %vm880_vm8, %v882_v11, %v878_v36 }
 0x78e   :  { %v986_v0 = vmul.f32 0.5, %v914_v7  ;;  %v893_v3 = vsel %vm892_vm10, %v4604_v50, %v889_v61 }
 0x790   :  { %v4610_v58 = vadd.f32 %v994_v2, %v986_v0 }
 0x791   :  { %v709_v33 = vpop.permute.xlu0 %708 }
 0x792   :  { %v778_v34 = vadd.f32 %v777_v43, %v709_v33  ;;  %v1018_v62 = vsel %vm135_vm1, %v4610_v58, 0.0 }
 0x793   :  { %1019 = vadd.xlane.f32.xlu0 %v1018_v62 }
 0x794   :  { %v929_v41 = vmul.f32 %v928_v59, %v778_v34  ;;  %v703_v52 = vpop.permute.xlu1 %702 }
 0x795   :  { %v769_v45 = vadd.f32 %v4591_v19, %v703_v52  ;;  %v897_v19 = vor.u32 1.1754944e-38, %v896_v37  ;;  %v780_v52 = vpop.f32.mrf.mxu3 }
 0x796   :  { %v987_v40 = vmul.f32 0.5, %v929_v41 }
 0x797   :  { %v884_v63 = vmul.f32 %v883_v30, %v769_v45  ;;  %v898_v39 = vsel %vm895_vm11, %v897_v19, %v893_v3  ;;  %v996_v30 = vmul.f32 0.5, %v342_v24 }
 0x798   :  { %v4624_v27 = vadd.f32 %v995_v55, %v987_v40 }
 0x799   :  { %v984_v5 = vmul.f32 0.5, %v884_v63  ;;  %v711_v4 = vpop.permute.xlu0 %710 }
 0x79a   :  { %v1021_v15 = vsel %vm135_vm1, %v4624_v27, 0.0  ;;  %v781_v45 = vadd.f32 %v780_v52, %v711_v4 }
 0x79b   :  { %1022 = vadd.xlane.f32.xlu0 %v1021_v15  ;;  %v4636_v2 = vadd.f32 %v992_v17, %v984_v5  ;;  %v1554_v5 = vpop.f32.mrf.mxu1 }
 0x79c   :  { %v705_v23 = vpop.permute.xlu1 %704 }
 0x79d   :  { %v772_v47 = vadd.f32 %v4596_v35, %v705_v23  ;;  %v1012_v35 = vsel %vm135_vm1, %v4636_v2, 0.0  ;;  %v783_v17 = vpop.f32.mrf.mxu3 }
 0x79f   :  { %v899_v7 = vmul.f32 %v898_v39, %v772_v47 }
 0x7a1   :  { %v985_v22 = vmul.f32 0.5, %v899_v7 }
 0x7a3   :  { %v4638_v0 = vadd.f32 %v993_v8, %v985_v22 }
 0x7a5   :  { %v1015_v50 = vsel %vm135_vm1, %v4638_v0, 0.0 }
 0x7a6   :  { %1016 = vadd.xlane.f32.xlu2 %v1015_v50 }
 0x7a7   :  { %1013 = vadd.xlane.f32.xlu1 %v1012_v35 }
 0x7c7   :  { %v840_v18 = vpop.xlane.xlu1 %839 }
 0x7c8   :  { %v852_v25 = vadd.f32 64.0, %v840_v18  ;;  %v1011_v28 = vpop.xlane.xlu0 %1010 }
 0x7c9   :  { %v1033_v48 = vmul.f32 %v1011_v28, %v3988_v38  ;;  %v715_v28 = vpop.permute.xlu2 %714 }
 0x7ca   :  { %3752 = vrcp.f32 %v852_v25  ;;  %v941_v60 = vand.u32 2147483648, %v852_v25  ;;  %v939_v54 = vand.u32 2147483647, %v852_v25  ;;  %vm935_vm13 = vweird.f32 %v852_v25 }
 0x7cb   :  { %v4646_v42 = vsub.f32 %v4579_v44, %v1033_v48 }
 0x7cc   :  { %v942_v36 = vor.u32 1.1754944e-38, %v941_v60  ;;  %vm940_vm15 = vcmp.eq.f32.partialorder %v939_v54, 8.507059e+37 }
 0x7cd   :  { %v1049_v49 = vmul.f32 %v4646_v42, %v4646_v42 }
 0x7cf   :  { %v843_v46 = vpop.xlane.xlu1 %842  ;;  %v1057_v43 = vsel %vm135_vm1, %v1049_v49, 0.0 }
 0x7d0   :  { %v3753_v51 = vpop.eup %3752  ;;  %v1504_v33 = vpop.f32.mrf.mxu0  ;;  %1058 = vadd.xlane.f32.xlu1 %v1057_v43  ;;  %v853_v1 = vadd.f32 64.0, %v843_v46 }
 0x7d1   :  { %v931_v34 = vmul.f32 %v3753_v51, %v852_v25  ;;  %v1505_v62 = vadd.f32 %v4546_v32, %v1504_v33  ;;  %vm936_vm12 = vweird.f32 %v3753_v51  ;;  %v1557_v43 = vpop.f32.mrf.mxu1  ;;  %v786_v33 = vpop.f32.mrf.mxu3 }
 0x7d2   :  { %3754 = vrcp.f32 %v853_v1  ;;  %vm937_vm14 = vmor %vm935_vm13, %vm936_vm12  ;;  %vm950_vm5 = vweird.f32 %v853_v1  ;;  %v956_v29 = vand.u32 2147483648, %v853_v1  ;;  %v954_v35 = vand.u32 2147483647, %v853_v1 }
 0x7d3   :  { %v932_v59 = vsub.f32 1.0, %v931_v34  ;;  %3535 = vmatmul.msk.f32.gmra.mxu1 %vm135_vm1, %v1505_v62 }
 0x7d4   :  { %v957_v48 = vor.u32 1.1754944e-38, %v956_v29  ;;  %vm955_vm9 = vcmp.eq.f32.partialorder %v954_v35, 8.507059e+37 }
 0x7d5   :  { %v933_v44 = vmul.f32 %v3753_v51, %v932_v59  ;;  %v787_v59 = vadd.f32 %v786_v33, %v715_v28 }
 0x7d7   :  { %v846_v41 = vpop.xlane.xlu1 %845  ;;  %v934_v56 = vadd.f32 %v3753_v51, %v933_v44  ;;  %v997_v44 = vmul.f32 0.5, %v343_v31 }
 0x7d8   :  { %v854_v40 = vadd.f32 64.0, %v846_v41  ;;  %v3755_v11 = vpop.eup %3754 }
 0x7d9   :  { %v938_v55 = vsel %vm937_vm14, %v3753_v51, %v934_v56  ;;  %v946_v20 = vmul.f32 %v3755_v11, %v853_v1  ;;  %vm951_vm0 = vweird.f32 %v3755_v11 }
 0x7da   :  { %3756 = vrcp.f32 %v854_v40  ;;  %v943_v32 = vsel %vm940_vm15, %v942_v36, %v938_v55  ;;  %v971_v24 = vand.u32 2147483648, %v854_v40  ;;  %vm4659_vm6 = vmor %vm950_vm5, %vm951_vm0  ;;  %vm965_vm7 = vweird.f32 %v854_v40  ;;  %v4678_v55 = vld [vmem:[%s5896_s3 + $0xa] ss:$0 sm:$0xff] }
 0x7db   :  { %v944_v61 = vmul.f32 %v943_v32, %v781_v45  ;;  %v947_v23 = vsub.f32 1.0, %v946_v20  ;;  %v969_v4 = vand.u32 2147483647, %v854_v40  ;;  %v998_v36 = vmul.f32 0.5, %v344_v57 }
 0x7dc   :  { %v972_v46 = vor.u32 1.1754944e-38, %v971_v24  ;;  %v1555_v31 = vadd.f32 %v4678_v55, %v1554_v5 }
 0x7dd   :  { %v988_v37 = vmul.f32 0.5, %v944_v61  ;;  %v948_v39 = vmul.f32 %v3755_v11, %v947_v23  ;;  %vm970_vm10 = vcmp.eq.f32.partialorder %v969_v4, 8.507059e+37 }
 0x7de   :  { %v1578_v61 = vadd.f32 %v1555_v31, %v4327_v16  ;;  %v4700_v16 = vld [vmem:[%s5896_s3 + $0xc] ss:$0 sm:$0xff] }
 0x7df   :  { %v4655_v63 = vadd.f32 %v996_v30, %v988_v37  ;;  %v949_v22 = vadd.f32 %v3755_v11, %v948_v39 }
 0x7e0   :  { %v3757_v15 = vpop.eup %3756  ;;  %v1588_v30 = vmul.f32 %v4687_v53, %v1578_v61 }
 0x7e1   :  { %v961_v3 = vmul.f32 %v3757_v15, %v854_v40  ;;  %v1024_v19 = vsel %vm135_vm1, %v4655_v63, 0.0  ;;  %vm966_vm2 = vweird.f32 %v3757_v15  ;;  %v953_v18 = vsel %vm4659_vm6, %v3755_v11, %v949_v22  ;;  %v1560_v40 = vpop.f32.mrf.mxu1 }
 0x7e2   :  { %1025 = vadd.xlane.f32.xlu0 %v1024_v19  ;;  %vm967_vm8 = vmor %vm965_vm7, %vm966_vm2  ;;  %v958_v34 = vsel %vm955_vm9, %v957_v48, %v953_v18  ;;  %v1561_v20 = vadd.f32 %v4678_v55, %v1560_v40 }
 0x7e3   :  { %v962_v47 = vsub.f32 1.0, %v961_v3 }
 0x7e4   :  { %v1580_v23 = vadd.f32 %v1561_v20, %v4321_v26 }
 0x7e5   :  { %v963_v7 = vmul.f32 %v3757_v15, %v962_v47 }
 0x7e6   :  { %v1590_v47 = vmul.f32 %v4687_v53, %v1580_v23  ;;  %v1661_v23 = vld [vmem:[%s5894_s2 + $0xc8] sm:$0xff] }
 0x7e7   :  { %v964_v8 = vadd.f32 %v3757_v15, %v963_v7  ;;  %v1558_v7 = vadd.f32 %v4678_v55, %v1557_v43  ;;  %1696 = vmatpush.msrb.mxu3 %v1661_v23 }
 0x7e8   :  { %v1600_v22 = vadd.f32 %v4700_v16, %v1590_v47 }
 0x7e9   :  { %v968_v25 = vsel %vm967_vm8, %v3757_v15, %v964_v8  ;;  %v1563_v32 = vpop.f32.mrf.mxu1  ;;  %v1579_v8 = vadd.f32 %v1558_v7, %v4324_v14  ;;  %v1659_v7 = vld [vmem:[%s5894_s2 + $0xb8] sm:$0xff] }
 0x7ea   :  { %v973_v62 = vsel %vm970_vm10, %v972_v46, %v968_v25  ;;  %v1564_v5 = vadd.f32 %v4678_v55, %v1563_v32  ;;  %v1608_v18 = vmax.f32 %v1600_v22, 0.0 }
 0x7eb   :  { %v974_v54 = vmul.f32 %v973_v62, %v787_v59  ;;  %v1589_v25 = vmul.f32 %v4687_v53, %v1579_v8 }
 0x7ed   :  { %v990_v52 = vmul.f32 0.5, %v974_v54 }
 0x7ef   :  { %v713_v49 = vpop.permute.xlu1 %712  ;;  %v4673_v45 = vadd.f32 %v998_v36, %v990_v52 }
 0x7f0   :  { %v784_v51 = vadd.f32 %v783_v17, %v713_v49  ;;  %v1581_v17 = vadd.f32 %v1564_v5, %v4312_v21 }
 0x7f1   :  { %v1030_v10 = vsel %vm135_vm1, %v4673_v45, 0.0  ;;  %v1566_v19 = vpop.f32.mrf.mxu1 }
 0x7f2   :  { %v959_v1 = vmul.f32 %v958_v34, %v784_v51  ;;  %v1591_v50 = vmul.f32 %v4687_v53, %v1581_v17  ;;  %v1567_v28 = vadd.f32 %v4678_v55, %v1566_v19  ;;  %v1599_v51 = vadd.f32 %v4700_v16, %v1589_v25  ;;  %v1657_v17 = vld [vmem:[%s5894_s2 + $0xa8] sm:$0xff] }
 0x7f4   :  { %v989_v60 = vmul.f32 0.5, %v959_v1  ;;  %v1601_v46 = vadd.f32 %v4700_v16, %v1591_v50  ;;  %v1582_v43 = vadd.f32 %v1567_v28, %v4317_v13  ;;  %v1607_v1 = vmax.f32 %v1599_v51, 0.0  ;;  %v1654_v50 = vld [vmem:[%s5894_s2 + $0x90] sm:$0xff] }
 0x7f6   :  { %v4667_v41 = vadd.f32 %v997_v44, %v989_v60  ;;  %v1609_v59 = vmax.f32 %v1601_v46, 0.0 }
 0x7f8   :  { %v1027_v56 = vsel %vm135_vm1, %v4667_v41, 0.0 }
 0x7f9   :  { %1028 = vadd.xlane.f32.xlu0 %v1027_v56  ;;  %v1569_v29 = vpop.f32.mrf.mxu1 }
 0x7fa   :  { %v1570_v35 = vadd.f32 %v4678_v55, %v1569_v29  ;;  %v1656_v29 = vld [vmem:[%s5894_s2 + $0xa0] sm:$0xff] }
 0x7fc   :  { %v1583_v14 = vadd.f32 %v1570_v35, %v4314_v12  ;;  %v1592_v12 = vmul.f32 %v4687_v53, %v1582_v43 }
 0x7fe   :  { %v1593_v62 = vmul.f32 %v4687_v53, %v1583_v14  ;;  %v1602_v44 = vadd.f32 %v4700_v16, %v1592_v12 }
 0x800   :  { %v1610_v40 = vmax.f32 %v1602_v44, 0.0 }
 0x801   :  { %1031 = vadd.xlane.f32.xlu0 %v1030_v10  ;;  %v1572_v31 = vpop.f32.mrf.mxu1 }
 0x806   :  { %v1020_v11 = vpop.xlane.xlu0 %1019 }
 0x807   :  { %v1036_v57 = vmul.f32 %v1020_v11, %v3988_v38 }
 0x809   :  { %v4691_v37 = vsub.f32 %v4610_v58, %v1036_v57  ;;  %v1598_v58 = vadd.f32 %v4700_v16, %v1588_v30 }
 0x80b   :  { %v1052_v15 = vmul.f32 %v4691_v37, %v4691_v37  ;;  %v1606_v39 = vmax.f32 %v1598_v58, 0.0  ;;  %v1660_v58 = vld [vmem:[%s5894_s2 + $0xc0] sm:$0xff] }
 0x80c   :  { %1697 = vmatpush.msrb.mxu3 %v1660_v58 }
 0x80d   :  { %v1066_v3 = vsel %vm135_vm1, %v1052_v15, 0.0 }
 0x80e   :  { %1067 = vadd.xlane.f32.xlu2 %v1066_v3  ;;  %1698 = vmatpush.msrb.mxu3 %v1659_v7 }
 0x815   :  { %1622 = vrot.lane.b32.xlu0 %v1606_v39, %s3892_s27 }
 0x819   :  { %v1017_v24 = vpop.xlane.xlu2 %1016 }
 0x81a   :  { %v1014_v26 = vpop.xlane.xlu1 %1013  ;;  %v1035_v21 = vmul.f32 %v1017_v24, %v3988_v38 }
 0x81b   :  { %v1034_v4 = vmul.f32 %v1014_v26, %v3988_v38  ;;  %v1655_v26 = vld [vmem:[%s5894_s2 + $0x98] sm:$0xff] }
 0x81c   :  { %v4729_v33 = vsub.f32 %v4638_v0, %v1035_v21  ;;  %v1603_v0 = vadd.f32 %v4700_v16, %v1593_v62  ;;  %v4804_v62 = vld [vmem:[%s5896_s3 + $0x5] ss:$0 sm:$0xff] }
 0x81d   :  { %v4719_v48 = vsub.f32 %v4636_v2, %v1034_v4  ;;  %1626 = vrot.lane.b32.xlu0 %v1608_v18, %s3892_s27  ;;  %v1023_v2 = vpop.xlane.xlu0 %1022 }
 0x81e   :  { %v1037_v60 = vmul.f32 %v1023_v2, %v3988_v38  ;;  %v1051_v13 = vmul.f32 %v4729_v33, %v4729_v33  ;;  %v1611_v52 = vmax.f32 %v1603_v0, 0.0 }
 0x81f   :  { %v1050_v49 = vmul.f32 %v4719_v48, %v4719_v48 }
 0x820   :  { %v4742_v54 = vsub.f32 %v4624_v27, %v1037_v60  ;;  %v1063_v56 = vsel %vm135_vm1, %v1051_v13, 0.0  ;;  %v1573_v60 = vadd.f32 %v4678_v55, %v1572_v31 }
 0x821   :  { %v1060_v34 = vsel %vm135_vm1, %v1050_v49, 0.0 }
 0x822   :  { %1061 = vadd.xlane.f32.xlu1 %v1060_v34  ;;  %v1053_v36 = vmul.f32 %v4742_v54, %v4742_v54  ;;  %v1584_v13 = vadd.f32 %v1573_v60, %v4306_v6 }
 0x824   :  { %v1069_v10 = vsel %vm135_vm1, %v1053_v36, 0.0 }
 0x825   :  { %1628 = vrot.lane.b32.xlu0 %v1609_v59, %s3892_s27 }
 0x826   :  { %1624 = vrot.lane.b32.xlu2 %v1607_v1, %s3892_s27 }
 0x82a   :  { %1064 = vadd.xlane.f32.xlu1 %v1063_v56 }
 0x82d   :  { %1632 = vrot.lane.b32.xlu0 %v1611_v52, %s3892_s27  ;;  %v1594_v52 = vmul.f32 %v4687_v53, %v1584_v13 }
 0x82e   :  { %1630 = vrot.lane.b32.xlu2 %v1610_v40, %s3892_s27 }
 0x82f   :  { %v1604_v36 = vadd.f32 %v4700_v16, %v1594_v52 }
 0x832   :  { %1070 = vadd.xlane.f32.xlu1 %v1069_v10 }
 0x843   :  { %v1059_v32 = vpop.xlane.xlu1 %1058 }
 0x844   :  { %v1081_v61 = vmul.f32 %v1059_v32, %v3988_v38  ;;  %v1612_v32 = vmax.f32 %v1604_v36, 0.0 }
 0x846   :  { %v1089_v15 = vadd.f32 1e-05, %v1081_v61 }
 0x848   :  { %3758 = vrsqrt.f32 %v1089_v15  ;;  %vm1103_vm12 = vweird.f32 %v1089_v15 }
 0x84e   :  { %v3759_v22 = vpop.eup %3758 }
 0x84f   :  { %v1098_v8 = vmul.f32 %v3759_v22, %v1089_v15  ;;  %vm1104_vm11 = vweird.f32 %v3759_v22 }
 0x850   :  { %v1575_v11 = vpop.f32.mrf.mxu1  ;;  %vm1105_vm13 = vmor %vm1103_vm12, %vm1104_vm11 }
 0x851   :  { %v1576_v27 = vadd.f32 %v4678_v55, %v1575_v11  ;;  %v1099_v24 = vmul.f32 %v3759_v22, %v1098_v8 }
 0x853   :  { %v1585_v57 = vadd.f32 %v1576_v27, %v4308_v9  ;;  %v1100_v35 = vmul.f32 0.5, %v1099_v24 }
 0x855   :  { %v1595_v30 = vmul.f32 %v4687_v53, %v1585_v57  ;;  %v1026_v20 = vpop.xlane.xlu0 %1025  ;;  %v1101_v25 = vsub.f32 1.5, %v1100_v35 }
 0x856   :  { %v1038_v3 = vmul.f32 %v1026_v20, %v3988_v38 }
 0x857   :  { %v1605_v19 = vadd.f32 %v4700_v16, %v1595_v30  ;;  %v1102_v14 = vmul.f32 %v3759_v22, %v1101_v25 }
 0x858   :  { %v4763_v47 = vsub.f32 %v4655_v63, %v1038_v3  ;;  %v1658_v63 = vld [vmem:[%s5894_s2 + $0xb0] sm:$0xff] }
 0x859   :  { %v1613_v9 = vmax.f32 %v1605_v19, 0.0  ;;  %1699 = vmatpush.msrb.mxu3 %v1658_v63  ;;  %v1106_v51 = vsel %vm1105_vm13, %v3759_v22, %v1102_v14 }
 0x85a   :  { %v1054_v5 = vmul.f32 %v4763_v47, %v4763_v47  ;;  %v1177_v2 = vmul.f32 %v1106_v51, %v4646_v42 }
 0x85b   :  { %1636 = vrot.lane.b32.xlu2 %v1613_v9, %s3892_s27  ;;  %1700 = vmatpush.msrb.mxu3 %v1657_v17 }
 0x85c   :  { %v1072_v39 = vsel %vm135_vm1, %v1054_v5, 0.0  ;;  %v1186_v12 = vmul.f32 %v4804_v62, %v1177_v2 }
 0x85d   :  { %1073 = vadd.xlane.f32.xlu1 %v1072_v39  ;;  %1701 = vmatpush.msrb.mxu3 %v1656_v29 }
 0x85f   :  { %1702 = vmatpush.msrb.mxu3 %v1655_v26 }
 0x861   :  { %1703 = vmatpush.msrb.mxu3 %v1654_v50 }
 0x86c   :  { %v1029_v4 = vpop.xlane.xlu0 %1028 }
 0x86d   :  { %v1039_v18 = vmul.f32 %v1029_v4, %v3988_v38 }
 0x86f   :  { %v4789_v28 = vsub.f32 %v4667_v41, %v1039_v18 }
 0x871   :  { %v1055_v21 = vmul.f32 %v4789_v28, %v4789_v28 }
 0x873   :  { %v1075_v49 = vsel %vm135_vm1, %v1055_v21, 0.0 }
 0x874   :  { %1076 = vadd.xlane.f32.xlu1 %v1075_v49  ;;  %v1032_v46 = vpop.xlane.xlu0 %1031 }
 0x875   :  { %v1040_v43 = vmul.f32 %v1032_v46, %v3988_v38 }
 0x877   :  { %v4796_v34 = vsub.f32 %v4673_v45, %v1040_v43  ;;  %v4811_v45 = vld [vmem:[%s5896_s3 + $0x6] ss:$0 sm:$0xff] }
 0x878   :  { %v1195_v1 = vadd.f32 %v4811_v45, %v1186_v12 }
 0x879   :  { %v1056_v41 = vmul.f32 %v4796_v34, %v4796_v34 }
 0x87a   :  { %v1203_v42 = vmax.f32 %v1195_v1, 0.0 }
 0x87b   :  { %v1078_v59 = vsel %vm135_vm1, %v1056_v41, 0.0 }
 0x87c   :  { %1079 = vadd.xlane.f32.xlu1 %v1078_v59 }
 0x881   :  { %v1068_v56 = vpop.xlane.xlu2 %1067 }
 0x882   :  { %v1084_v40 = vmul.f32 %v1068_v56, %v3988_v38 }
 0x884   :  { %v1092_v10 = vadd.f32 1e-05, %v1084_v40 }
 0x886   :  { %3760 = vrsqrt.f32 %v1092_v10  ;;  %vm1133_vm5 = vweird.f32 %v1092_v10 }
 0x887   :  { %v1623_v0 = vpop.permute.xlu0 %1622 }
 0x888   :  { %v1646_v44 = vsel %vm135_vm1, %v1203_v42, %v1623_v0 }
 0x889   :  { %3536 = vmatmul.msk.f32.vlgmr.msrb.gmra.mxu3 %vm642_vm4, %v1646_v44  ;;  %v1625_v46 = vpop.permute.xlu2 %1624 }
 0x88c   :  { %v3761_v31 = vpop.eup %3760 }
 0x88d   :  { %v1128_v27 = vmul.f32 %v3761_v31, %v1092_v10  ;;  %vm1134_vm2 = vweird.f32 %v3761_v31 }
 0x88e   :  { %vm1135_vm7 = vmor %vm1133_vm5, %vm1134_vm2 }
 0x88f   :  { %v1129_v20 = vmul.f32 %v3761_v31, %v1128_v27  ;;  %v1627_v13 = vpop.permute.xlu0 %1626 }
 0x891   :  { %v1130_v3 = vmul.f32 0.5, %v1129_v20 }
 0x893   :  { %v1131_v7 = vsub.f32 1.5, %v1130_v3 }
 0x895   :  { %v1062_v11 = vpop.xlane.xlu1 %1061  ;;  %1634 = vrot.lane.b32.xlu1 %v1612_v32, %s3892_s27  ;;  %v1132_v24 = vmul.f32 %v3761_v31, %v1131_v7 }
 0x896   :  { %v1082_v6 = vmul.f32 %v1062_v11, %v3988_v38 }
 0x897   :  { %v1136_v25 = vsel %vm1135_vm7, %v3761_v31, %v1132_v24  ;;  %v1629_v10 = vpop.permute.xlu0 %1628  ;;  %v1738_v24 = vld [vmem:[%s5894_s2 + $0xd8] sm:$0xff] }
 0x898   :  { %v1090_v55 = vadd.f32 1e-05, %v1082_v6  ;;  %v1180_v51 = vmul.f32 %v1136_v25, %v4691_v37 }
 0x89a   :  { %3762 = vrsqrt.f32 %v1090_v55  ;;  %vm1113_vm15 = vweird.f32 %v1090_v55  ;;  %v1189_v42 = vmul.f32 %v4804_v62, %v1180_v51 }
 0x89c   :  { %v1198_v52 = vadd.f32 %v4811_v45, %v1189_v42 }
 0x89d   :  { %v1065_v61 = vpop.xlane.xlu1 %1064 }
 0x89e   :  { %v1083_v57 = vmul.f32 %v1065_v61, %v3988_v38  ;;  %v1206_v40 = vmax.f32 %v1198_v52, 0.0 }
 0x8a0   :  { %v3763_v53 = vpop.eup %3762  ;;  %v1091_v30 = vadd.f32 1e-05, %v1083_v57  ;;  %v1649_v32 = vsel %vm135_vm1, %v1206_v40, %v1629_v10 }
 0x8a1   :  { %v1108_v15 = vmul.f32 %v3763_v53, %v1090_v55  ;;  %vm1114_vm14 = vweird.f32 %v3763_v53  ;;  %v1631_v55 = vpop.permute.xlu2 %1630 }
 0x8a2   :  { %3764 = vrsqrt.f32 %v1091_v30  ;;  %vm1115_vm0 = vmor %vm1113_vm15, %vm1114_vm14  ;;  %vm1123_vm8 = vweird.f32 %v1091_v30 }
 0x8a3   :  { %v1109_v16 = vmul.f32 %v3763_v53, %v1108_v15 }
 0x8a5   :  { %v1110_v19 = vmul.f32 0.5, %v1109_v16  ;;  %v1071_v23 = vpop.xlane.xlu1 %1070 }
 0x8a6   :  { %v1085_v58 = vmul.f32 %v1071_v23, %v3988_v38 }
 0x8a7   :  { %v1111_v9 = vsub.f32 1.5, %v1110_v19 }
 0x8a8   :  { %v3765_v5 = vpop.eup %3764  ;;  %v1093_v39 = vadd.f32 1e-05, %v1085_v58 }
 0x8a9   :  { %v1112_v63 = vmul.f32 %v3763_v53, %v1111_v9  ;;  %v1118_v17 = vmul.f32 %v3765_v5, %v1091_v30  ;;  %vm1124_vm6 = vweird.f32 %v3765_v5 }
 0x8aa   :  { %3766 = vrsqrt.f32 %v1093_v39  ;;  %vm1125_vm9 = vmor %vm1123_vm8, %vm1124_vm6  ;;  %vm1143_vm11 = vweird.f32 %v1093_v39 }
 0x8ab   :  { %v1116_v22 = vsel %vm1115_vm0, %v3763_v53, %v1112_v63  ;;  %v1119_v8 = vmul.f32 %v3765_v5, %v1118_v17  ;;  %v1633_v63 = vpop.permute.xlu0 %1632 }
 0x8ac   :  { %v1178_v29 = vmul.f32 %v1116_v22, %v4719_v48 }
 0x8ad   :  { %v1120_v26 = vmul.f32 0.5, %v1119_v8  ;;  %v1740_v8 = vld [vmem:[%s5894_s2 + $0xe8] sm:$0xff] }
 0x8ae   :  { %v1187_v50 = vmul.f32 %v4804_v62, %v1178_v29  ;;  %1777 = vmatpush.msra.mxu0 %v1740_v8  ;;  %v1739_v29 = vld [vmem:[%s5894_s2 + $0xe0] sm:$0xff] }
 0x8af   :  { %v1121_v35 = vsub.f32 1.5, %v1120_v26 }
 0x8b0   :  { %v3767_v4 = vpop.eup %3766  ;;  %v1196_v18 = vadd.f32 %v4811_v45, %v1187_v50  ;;  %1778 = vmatpush.msra.mxu0 %v1739_v29 }
 0x8b1   :  { %v1122_v21 = vmul.f32 %v3765_v5, %v1121_v35  ;;  %v1138_v14 = vmul.f32 %v3767_v4, %v1093_v39  ;;  %vm1144_vm10 = vweird.f32 %v3767_v4 }
 0x8b2   :  { %v1204_v49 = vmax.f32 %v1196_v18, 0.0  ;;  %vm1145_vm12 = vmor %vm1143_vm11, %vm1144_vm10  ;;  %1779 = vmatpush.msra.mxu0 %v1738_v24 }
 0x8b3   :  { %v1126_v48 = vsel %vm1125_vm9, %v3765_v5, %v1122_v21  ;;  %v1139_v43 = vmul.f32 %v3767_v4, %v1138_v14 }
 0x8b4   :  { %v1179_v41 = vmul.f32 %v1126_v48, %v4729_v33  ;;  %v1647_v2 = vsel %vm135_vm1, %v1204_v49, %v1625_v46 }
 0x8b5   :  { %v1140_v59 = vmul.f32 0.5, %v1139_v43  ;;  %3537 = vmatmul.msk.f32.gmra.mxu3 %vm642_vm4, %v1647_v2 }
 0x8b6   :  { %v1188_v12 = vmul.f32 %v4804_v62, %v1179_v41 }
 0x8b7   :  { %v1141_v1 = vsub.f32 1.5, %v1140_v59 }
 0x8b8   :  { %v1197_v60 = vadd.f32 %v4811_v45, %v1188_v12 }
 0x8b9   :  { %v1142_v0 = vmul.f32 %v3767_v4, %v1141_v1 }
 0x8ba   :  { %v1205_v37 = vmax.f32 %v1197_v60, 0.0 }
 0x8bb   :  { %v1146_v44 = vsel %vm1145_vm12, %v3767_v4, %v1142_v0  ;;  %v1737_v4 = vld [vmem:[%s5894_s2 + $0xd0] sm:$0xff] }
 0x8bc   :  { %v1181_v33 = vmul.f32 %v1146_v44, %v4742_v54  ;;  %v1648_v56 = vsel %vm135_vm1, %v1205_v37, %v1627_v13  ;;  %1780 = vmatpush.msra.mxu0 %v1737_v4 }
 0x8bd   :  { %3538 = vmatmul.msk.f32.gmra.mxu3 %vm642_vm4, %v1648_v56 }
 0x8be   :  { %v1190_v36 = vmul.f32 %v4804_v62, %v1181_v33 }
 0x8c0   :  { %v1199_v11 = vadd.f32 %v4811_v45, %v1190_v36  ;;  %v1637_v36 = vpop.permute.xlu2 %1636 }
 0x8c2   :  { %v1207_v6 = vmax.f32 %v1199_v11, 0.0 }
 0x8c4   :  { %v1650_v54 = vsel %vm135_vm1, %v1207_v6, %v1631_v55 }
 0x8c5   :  { %3539 = vmatmul.msk.f32.gmra.mxu3 %vm642_vm4, %v1649_v32 }
 0x8cd   :  { %3540 = vmatmul.msk.f32.gmra.mxu3 %vm642_vm4, %v1650_v54 }
 0x8d0   :  { %v1074_v31 = vpop.xlane.xlu1 %1073 }
 0x8d1   :  { %v1086_v27 = vmul.f32 %v1074_v31, %v3988_v38 }
 0x8d3   :  { %v1094_v61 = vadd.f32 1e-05, %v1086_v27 }
 0x8d5   :  { %3768 = vrsqrt.f32 %v1094_v61  ;;  %vm1153_vm14 = vweird.f32 %v1094_v61 }
 0x8db   :  { %v3769_v57 = vpop.eup %3768 }
 0x8dc   :  { %v1148_v53 = vmul.f32 %v3769_v57, %v1094_v61  ;;  %vm1154_vm13 = vweird.f32 %v3769_v57 }
 0x8dd   :  { %vm1155_vm15 = vmor %vm1153_vm14, %vm1154_vm13 }
 0x8de   :  { %v1149_v30 = vmul.f32 %v3769_v57, %v1148_v53 }
 0x8e0   :  { %v1150_v20 = vmul.f32 0.5, %v1149_v30 }
 0x8e2   :  { %v1151_v15 = vsub.f32 1.5, %v1150_v20 }
 0x8e4   :  { %v1152_v16 = vmul.f32 %v3769_v57, %v1151_v15 }
 0x8e6   :  { %v1156_v3 = vsel %vm1155_vm15, %v3769_v57, %v1152_v16 }
 0x8e7   :  { %v1182_v19 = vmul.f32 %v1156_v3, %v4763_v47  ;;  %v1077_v23 = vpop.xlane.xlu1 %1076 }
 0x8e8   :  { %v1087_v58 = vmul.f32 %v1077_v23, %v3988_v38 }
 0x8e9   :  { %v1191_v9 = vmul.f32 %v4804_v62, %v1182_v19  ;;  %v3705_v19 = vld [vmem:[%s5896_s3 + $0xe] ss:$0 sm:$0xff] }
 0x8ea   :  { %v1095_v5 = vadd.f32 1e-05, %v1087_v58 }
 0x8eb   :  { %v1200_v39 = vadd.f32 %v4811_v45, %v1191_v9 }
 0x8ec   :  { %3770 = vrsqrt.f32 %v1095_v5  ;;  %vm1163_vm2 = vweird.f32 %v1095_v5 }
 0x8ed   :  { %v1208_v7 = vmax.f32 %v1200_v39, 0.0 }
 0x8ef   :  { %v1080_v17 = vpop.xlane.xlu1 %1079  ;;  %v1651_v22 = vsel %vm135_vm1, %v1208_v7, %v1633_v63 }
 0x8f0   :  { %v1088_v47 = vmul.f32 %v1080_v17, %v3988_v38  ;;  %3541 = vmatmul.msk.f32.gmra.mxu3 %vm642_vm4, %v1651_v22 }
 0x8f2   :  { %v3771_v26 = vpop.eup %3770  ;;  %v1096_v50 = vadd.f32 1e-05, %v1088_v47 }
 0x8f3   :  { %v1158_v35 = vmul.f32 %v3771_v26, %v1095_v5  ;;  %vm1164_vm0 = vweird.f32 %v3771_v26 }
 0x8f4   :  { %3772 = vrsqrt.f32 %v1096_v50  ;;  %vm1165_vm5 = vmor %vm1163_vm2, %vm1164_vm0  ;;  %vm1173_vm7 = vweird.f32 %v1096_v50 }
 0x8f5   :  { %v1159_v18 = vmul.f32 %v3771_v26, %v1158_v35 }
 0x8f7   :  { %v1160_v25 = vmul.f32 0.5, %v1159_v18 }
 0x8f9   :  { %v1161_v21 = vsub.f32 1.5, %v1160_v25 }
 0x8fa   :  { %v3773_v14 = vpop.eup %3772 }
 0x8fb   :  { %v1162_v49 = vmul.f32 %v3771_v26, %v1161_v21  ;;  %v1168_v46 = vmul.f32 %v3773_v14, %v1096_v50  ;;  %vm1174_vm6 = vweird.f32 %v3773_v14 }
 0x8fc   :  { %vm1175_vm8 = vmor %vm1173_vm7, %vm1174_vm6 }
 0x8fd   :  { %v1166_v48 = vsel %vm1165_vm5, %v3771_v26, %v1162_v49  ;;  %v1169_v43 = vmul.f32 %v3773_v14, %v1168_v46 }
 0x8fe   :  { %v1183_v51 = vmul.f32 %v1166_v48, %v4789_v28  ;;  %v3704_v28 = vld [vmem:[%s5896_s3 + $0xd] ss:$0 sm:$0xff] }
 0x8ff   :  { %v1170_v41 = vmul.f32 0.5, %v1169_v43 }
 0x900   :  { %v1192_v2 = vmul.f32 %v4804_v62, %v1183_v51 }
 0x901   :  { %v1171_v59 = vsub.f32 1.5, %v1170_v41 }
 0x902   :  { %v1201_v12 = vadd.f32 %v4811_v45, %v1192_v2 }
 0x903   :  { %v1172_v1 = vmul.f32 %v3773_v14, %v1171_v59 }
 0x904   :  { %v1209_v13 = vmax.f32 %v1201_v12, 0.0 }
 0x905   :  { %v1176_v60 = vsel %vm1175_vm8, %v3773_v14, %v1172_v1 }
 0x906   :  { %v1184_v42 = vmul.f32 %v1176_v60, %v4796_v34 }
 0x907   :  { %v1635_v0 = vpop.permute.xlu1 %1634 }
 0x908   :  { %v1652_v37 = vsel %vm135_vm1, %v1209_v13, %v1635_v0  ;;  %v1193_v44 = vmul.f32 %v4804_v62, %v1184_v42 }
 0x909   :  { %3542 = vmatmul.msk.f32.gmra.mxu3 %vm642_vm4, %v1652_v37 }
 0x90a   :  { %v1202_v33 = vadd.f32 %v4811_v45, %v1193_v44 }
 0x90c   :  { %v1705_v56 = vpop.f32.mrf.mxu3  ;;  %v1210_v52 = vmax.f32 %v1202_v33, 0.0 }
 0x90d   :  { %v1706_v40 = vadd.f32 %v3704_v28, %v1705_v56 }
 0x90e   :  { %v1653_v34 = vsel %vm135_vm1, %v1210_v52, %v1637_v36 }
 0x90f   :  { %3774 = vtanh.f32 %v1706_v40 }
 0x911   :  { %3543 = vmatmul.msk.f32.gmra.mxu3 %vm642_vm4, %v1653_v34 }
 0x915   :  { %v4878_v10 = vpop.eup %3774 }
 0x916   :  { %3544 = vmatmul.msk.f32.vlgmr.msra.gmra.mxu0 %vm135_vm1, %v4878_v10 }
 0x938   :  { %v1708_v62 = vpop.f32.mrf.mxu3 }
 0x939   :  { %v1709_v32 = vadd.f32 %v3704_v28, %v1708_v62 }
 0x93b   :  { %3776 = vtanh.f32 %v1709_v32 }
 0x940   :  { %v1711_v11 = vpop.f32.mrf.mxu3 }
 0x941   :  { %v4882_v6 = vpop.eup %3776  ;;  %v1712_v45 = vadd.f32 %v3704_v28, %v1711_v11 }
 0x942   :  { %3545 = vmatmul.msk.f32.gmra.mxu0 %vm135_vm1, %v4882_v6 }
 0x943   :  { %3778 = vtanh.f32 %v1712_v45 }
 0x948   :  { %v1714_v55 = vpop.f32.mrf.mxu3 }
 0x949   :  { %v4886_v54 = vpop.eup %3778  ;;  %v1715_v31 = vadd.f32 %v3704_v28, %v1714_v55 }
 0x94a   :  { %3546 = vmatmul.msk.f32.gmra.mxu0 %vm135_vm1, %v4886_v54 }
 0x94b   :  { %3780 = vtanh.f32 %v1715_v31 }
 0x950   :  { %v1717_v27 = vpop.f32.mrf.mxu3 }
 0x951   :  { %v4890_v61 = vpop.eup %3780  ;;  %v1718_v57 = vadd.f32 %v3704_v28, %v1717_v27 }
 0x952   :  { %3547 = vmatmul.msk.f32.gmra.mxu0 %vm135_vm1, %v4890_v61 }
 0x953   :  { %3782 = vtanh.f32 %v1718_v57 }
 0x959   :  { %v4894_v53 = vpop.eup %3782 }
 0x95a   :  { %3548 = vmatmul.msk.f32.gmra.mxu0 %vm135_vm1, %v4894_v53 }
 0x973   :  { %v1720_v30 = vpop.f32.mrf.mxu3 }
 0x974   :  { %v1721_v20 = vadd.f32 %v3704_v28, %v1720_v30 }
 0x976   :  { %3784 = vtanh.f32 %v1721_v20 }
 0x97c   :  { %v4898_v15 = vpop.eup %3784 }
 0x97d   :  { %3549 = vmatmul.msk.f32.gmra.mxu0 %vm135_vm1, %v4898_v15 }
 0x98c   :  { %v1723_v16 = vpop.f32.mrf.mxu3 }
 0x98d   :  { %v1724_v3 = vadd.f32 %v3704_v28, %v1723_v16 }
 0x98f   :  { %3786 = vtanh.f32 %v1724_v3 }
 0x993   :  { %v4905_v23 = vpop.f32.mrf.mxu0 }
 0x994   :  { %v1808_v58 = vadd.f32 %v3705_v19, %v4905_v23  ;;  %v1726_v9 = vpop.f32.mrf.mxu3 }
 0x995   :  { %v4908_v5 = vpop.eup %3786  ;;  %v1727_v39 = vadd.f32 %v3704_v28, %v1726_v9  ;;  %v2037_v9 = vld [vmem:[%s5894_s2 + $0x108] sm:$0xff] }
 0x996   :  { %3550 = vmatmul.msk.f32.gmra.mxu0 %vm135_vm1, %v4908_v5  ;;  %v1832_v7 = vsel %vm135_vm1, %v1808_v58, 0.0  ;;  %2076 = vmatpush.msra.mxu1 %v2037_v9 }
 0x997   :  { %3788 = vtanh.f32 %v1727_v39  ;;  %1833 = vadd.xlane.f32.xlu0 %v1832_v7  ;;  %v2036_v39 = vld [vmem:[%s5894_s2 + $0x100] sm:$0xff]  ;;  %v2035_v7 = vld [vmem:[%s5894_s2 + $0xf8] sm:$0xff] }
 0x998   :  { %2077 = vmatpush.msra.mxu1 %v2036_v39 }
 0x99a   :  { %2078 = vmatpush.msra.mxu1 %v2035_v7 }
 0x99d   :  { %v4913_v63 = vpop.eup %3788 }
 0x99e   :  { %3551 = vmatmul.msk.f32.gmra.mxu0 %vm135_vm1, %v4913_v63 }
 0x9bf   :  { %v4917_v17 = vpop.f32.mrf.mxu0 }
 0x9c0   :  { %v1809_v22 = vadd.f32 %v3705_v19, %v4917_v17 }
 0x9c2   :  { %v1835_v8 = vsel %vm135_vm1, %v1809_v22, 0.0 }
 0x9c3   :  { %1836 = vadd.xlane.f32.xlu2 %v1835_v8 }
 0x9c7   :  { %v4921_v47 = vpop.f32.mrf.mxu0 }
 0x9c8   :  { %v1810_v29 = vadd.f32 %v3705_v19, %v4921_v47 }
 0x9ca   :  { %v1838_v24 = vsel %vm135_vm1, %v1810_v29, 0.0 }
 0x9cb   :  { %1839 = vadd.xlane.f32.xlu1 %v1838_v24 }
 0x9cf   :  { %v4925_v26 = vpop.f32.mrf.mxu0 }
 0x9d0   :  { %v1811_v50 = vadd.f32 %v3705_v19, %v4925_v26 }
 0x9d2   :  { %v1841_v35 = vsel %vm135_vm1, %v1811_v50, 0.0 }
 0x9d3   :  { %1842 = vadd.xlane.f32.xlu0 %v1841_v35 }
 0x9d7   :  { %v4929_v4 = vpop.f32.mrf.mxu0 }
 0x9d8   :  { %v1812_v18 = vadd.f32 %v3705_v19, %v4929_v4 }
 0x9da   :  { %v1844_v25 = vsel %vm135_vm1, %v1812_v18, 0.0 }
 0x9db   :  { %1845 = vadd.xlane.f32.xlu2 %v1844_v25 }
 0x9fa   :  { %v4933_v21 = vpop.f32.mrf.mxu0 }
 0x9fb   :  { %v1813_v14 = vadd.f32 %v3705_v19, %v4933_v21 }
 0x9fd   :  { %v1847_v49 = vsel %vm135_vm1, %v1813_v14, 0.0 }
 0x9fe   :  { %1848 = vadd.xlane.f32.xlu0 %v1847_v49 }
 0xa0a   :  { %v1834_v46 = vpop.xlane.xlu0 %1833 }
 0xa0b   :  { %v1856_v48 = vmul.f32 %v1834_v46, %v3988_v38 }
 0xa0d   :  { %v4938_v43 = vsub.f32 %v1808_v58, %v1856_v48 }
 0xa0f   :  { %v1872_v51 = vmul.f32 %v4938_v43, %v4938_v43 }
 0xa11   :  { %v1880_v41 = vsel %vm135_vm1, %v1872_v51, 0.0 }
 0xa12   :  { %1881 = vadd.xlane.f32.xlu2 %v1880_v41 }
 0xa13   :  { %v4943_v2 = vpop.f32.mrf.mxu0 }
 0xa14   :  { %v1814_v59 = vadd.f32 %v3705_v19, %v4943_v2 }
 0xa16   :  { %v1850_v12 = vsel %vm135_vm1, %v1814_v59, 0.0 }
 0xa17   :  { %1851 = vadd.xlane.f32.xlu0 %v1850_v12 }
 0xa1b   :  { %v4947_v1 = vpop.f32.mrf.mxu0 }
 0xa1c   :  { %v1815_v60 = vadd.f32 %v3705_v19, %v4947_v1 }
 0xa1e   :  { %v1853_v42 = vsel %vm135_vm1, %v1815_v60, 0.0 }
 0xa1f   :  { %1854 = vadd.xlane.f32.xlu1 %v1853_v42 }
 0xa36   :  { %v1837_v13 = vpop.xlane.xlu2 %1836 }
 0xa37   :  { %v1857_v0 = vmul.f32 %v1837_v13, %v3988_v38 }
 0xa39   :  { %v4952_v37 = vsub.f32 %v1809_v22, %v1857_v0  ;;  %v2034_v22 = vld [vmem:[%s5894_s2 + $0xf0] sm:$0xff] }
 0xa3a   :  { %2079 = vmatpush.msra.mxu1 %v2034_v22 }
 0xa3b   :  { %v1873_v44 = vmul.f32 %v4952_v37, %v4952_v37 }
 0xa3d   :  { %v1883_v28 = vsel %vm135_vm1, %v1873_v44, 0.0 }
 0xa3e   :  { %v1840_v33 = vpop.xlane.xlu1 %1839  ;;  %1884 = vadd.xlane.f32.xlu2 %v1883_v28  ;;  %v5009_v28 = vld [vmem:[%s5896_s3 + $0x10] ss:$0 sm:$0xff] }
 0xa3f   :  { %v1858_v56 = vmul.f32 %v1840_v33, %v3988_v38 }
 0xa41   :  { %v4958_v52 = vsub.f32 %v1810_v29, %v1858_v56  ;;  %v5015_v56 = vld [vmem:[%s5896_s3 + $0x11] ss:$0 sm:$0xff] }
 0xa43   :  { %v1874_v40 = vmul.f32 %v4958_v52, %v4958_v52 }
 0xa45   :  { %v1886_v36 = vsel %vm135_vm1, %v1874_v40, 0.0 }
 0xa46   :  { %1887 = vadd.xlane.f32.xlu0 %v1886_v36  ;;  %v1843_v34 = vpop.xlane.xlu0 %1842 }
 0xa47   :  { %v1859_v62 = vmul.f32 %v1843_v34, %v3988_v38 }
 0xa49   :  { %v4964_v32 = vsub.f32 %v1811_v50, %v1859_v62 }
 0xa4b   :  { %v1875_v11 = vmul.f32 %v4964_v32, %v4964_v32 }
 0xa4d   :  { %v1889_v45 = vsel %vm135_vm1, %v1875_v11, 0.0 }
 0xa4e   :  { %v1846_v55 = vpop.xlane.xlu2 %1845  ;;  %1890 = vadd.xlane.f32.xlu2 %v1889_v45 }
 0xa4f   :  { %v1860_v31 = vmul.f32 %v1846_v55, %v3988_v38 }
 0xa51   :  { %v4970_v27 = vsub.f32 %v1812_v18, %v1860_v31 }
 0xa53   :  { %v1876_v57 = vmul.f32 %v4970_v27, %v4970_v27 }
 0xa55   :  { %v1892_v30 = vsel %vm135_vm1, %v1876_v57, 0.0 }
 0xa56   :  { %1893 = vadd.xlane.f32.xlu1 %v1892_v30 }
 0xa71   :  { %v1849_v20 = vpop.xlane.xlu0 %1848 }
 0xa72   :  { %v1861_v16 = vmul.f32 %v1849_v20, %v3988_v38 }
 0xa74   :  { %v4976_v3 = vsub.f32 %v1813_v14, %v1861_v16 }
 0xa76   :  { %v1877_v19 = vmul.f32 %v4976_v3, %v4976_v3 }
 0xa78   :  { %v1895_v58 = vsel %vm135_vm1, %v1877_v19, 0.0 }
 0xa79   :  { %1896 = vadd.xlane.f32.xlu0 %v1895_v58 }
 0xa85   :  { %v1882_v8 = vpop.xlane.xlu2 %1881 }
 0xa86   :  { %v1904_v29 = vmul.f32 %v1882_v8, %v3988_v38 }
 0xa88   :  { %v1912_v24 = vadd.f32 1e-05, %v1904_v29 }
 0xa8a   :  { %3790 = vrsqrt.f32 %v1912_v24  ;;  %v1852_v50 = vpop.xlane.xlu0 %1851  ;;  %vm1926_vm10 = vweird.f32 %v1912_v24 }
 0xa8b   :  { %v1862_v35 = vmul.f32 %v1852_v50, %v3988_v38 }
 0xa8d   :  { %v4995_v18 = vsub.f32 %v1814_v59, %v1862_v35 }
 0xa8f   :  { %v1878_v25 = vmul.f32 %v4995_v18, %v4995_v18 }
 0xa90   :  { %v3791_v14 = vpop.eup %3790 }
 0xa91   :  { %v1921_v49 = vmul.f32 %v3791_v14, %v1912_v24  ;;  %v1898_v46 = vsel %vm135_vm1, %v1878_v25, 0.0  ;;  %vm1927_vm9 = vweird.f32 %v3791_v14 }
 0xa92   :  { %v1855_v48 = vpop.xlane.xlu1 %1854  ;;  %1899 = vadd.xlane.f32.xlu2 %v1898_v46  ;;  %vm1928_vm11 = vmor %vm1926_vm10, %vm1927_vm9 }
 0xa93   :  { %v1922_v51 = vmul.f32 %v3791_v14, %v1921_v49  ;;  %v1863_v41 = vmul.f32 %v1855_v48, %v3988_v38 }
 0xa95   :  { %v1923_v12 = vmul.f32 0.5, %v1922_v51  ;;  %v5001_v42 = vsub.f32 %v1815_v60, %v1863_v41 }
 0xa97   :  { %v1924_v13 = vsub.f32 1.5, %v1923_v12  ;;  %v1879_v59 = vmul.f32 %v5001_v42, %v5001_v42 }
 0xa99   :  { %v1925_v0 = vmul.f32 %v3791_v14, %v1924_v13  ;;  %v1901_v44 = vsel %vm135_vm1, %v1879_v59, 0.0 }
 0xa9a   :  { %1902 = vadd.xlane.f32.xlu1 %v1901_v44 }
 0xa9b   :  { %v1929_v33 = vsel %vm1928_vm11, %v3791_v14, %v1925_v0 }
 0xa9c   :  { %v2000_v60 = vmul.f32 %v1929_v33, %v4938_v43 }
 0xa9e   :  { %v2009_v40 = vmul.f32 %v5009_v28, %v2000_v60 }
 0xaa0   :  { %v5019_v36 = vadd.f32 %v5015_v56, %v2009_v40 }
 0xaa2   :  { %v2026_v34 = vmax.f32 %v5019_v36, 0.0 }
 0xaa4   :  { %3552 = vmatmul.msk.f32.vlgmr.msra.gmra.mxu1 %vm135_vm1, %v2026_v34 }
 0xab1   :  { %v1885_v62 = vpop.xlane.xlu2 %1884 }
 0xab2   :  { %v1905_v11 = vmul.f32 %v1885_v62, %v3988_v38 }
 0xab4   :  { %v1913_v43 = vadd.f32 1e-05, %v1905_v11 }
 0xab6   :  { %3792 = vrsqrt.f32 %v1913_v43  ;;  %vm1936_vm13 = vweird.f32 %v1913_v43 }
 0xab9   :  { %v1888_v45 = vpop.xlane.xlu0 %1887 }
 0xaba   :  { %v1906_v55 = vmul.f32 %v1888_v45, %v3988_v38 }
 0xabc   :  { %v3793_v31 = vpop.eup %3792  ;;  %v1914_v57 = vadd.f32 1e-05, %v1906_v55 }
 0xabd   :  { %v1931_v30 = vmul.f32 %v3793_v31, %v1913_v43  ;;  %vm1937_vm12 = vweird.f32 %v3793_v31 }
 0xabe   :  { %3794 = vrsqrt.f32 %v1914_v57  ;;  %vm1938_vm14 = vmor %vm1936_vm13, %vm1937_vm12  ;;  %vm1946_vm0 = vweird.f32 %v1914_v57 }
 0xabf   :  { %v1932_v20 = vmul.f32 %v3793_v31, %v1931_v30 }
 0xac1   :  { %v1933_v16 = vmul.f32 0.5, %v1932_v20  ;;  %v1891_v19 = vpop.xlane.xlu2 %1890 }
 0xac2   :  { %v1907_v58 = vmul.f32 %v1891_v19, %v3988_v38 }
 0xac3   :  { %v1934_v9 = vsub.f32 1.5, %v1933_v16 }
 0xac4   :  { %v3795_v39 = vpop.eup %3794  ;;  %v1915_v7 = vadd.f32 1e-05, %v1907_v58 }
 0xac5   :  { %v1935_v22 = vmul.f32 %v3793_v31, %v1934_v9  ;;  %v1941_v8 = vmul.f32 %v3795_v39, %v1914_v57  ;;  %vm1947_vm15 = vweird.f32 %v3795_v39 }
 0xac6   :  { %3796 = vrsqrt.f32 %v1915_v7  ;;  %vm1948_vm2 = vmor %vm1946_vm0, %vm1947_vm15  ;;  %vm1956_vm6 = vweird.f32 %v1915_v7 }
 0xac7   :  { %v1939_v29 = vsel %vm1938_vm14, %v3793_v31, %v1935_v22  ;;  %v1942_v24 = vmul.f32 %v3795_v39, %v1941_v8 }
 0xac8   :  { %v2001_v50 = vmul.f32 %v1939_v29, %v4952_v37 }
 0xac9   :  { %v1943_v35 = vmul.f32 0.5, %v1942_v24  ;;  %v1894_v25 = vpop.xlane.xlu1 %1893 }
 0xaca   :  { %v1908_v14 = vmul.f32 %v1894_v25, %v3988_v38  ;;  %v2010_v49 = vmul.f32 %v5009_v28, %v2001_v50 }
 0xacb   :  { %v1944_v46 = vsub.f32 1.5, %v1943_v35 }
 0xacc   :  { %v3797_v48 = vpop.eup %3796  ;;  %v1916_v51 = vadd.f32 1e-05, %v1908_v14  ;;  %v5032_v41 = vadd.f32 %v5015_v56, %v2010_v49 }
 0xacd   :  { %v1945_v12 = vmul.f32 %v3795_v39, %v1944_v46  ;;  %v1951_v13 = vmul.f32 %v3797_v48, %v1915_v7  ;;  %vm1957_vm5 = vweird.f32 %v3797_v48 }
 0xace   :  { %3798 = vrsqrt.f32 %v1916_v51  ;;  %v2027_v37 = vmax.f32 %v5032_v41, 0.0  ;;  %vm1958_vm7 = vmor %vm1956_vm6, %vm1957_vm5  ;;  %vm1966_vm9 = vweird.f32 %v1916_v51 }
 0xacf   :  { %v1949_v59 = vsel %vm1948_vm2, %v3795_v39, %v1945_v12  ;;  %v1952_v0 = vmul.f32 %v3797_v48, %v1951_v13 }
 0xad0   :  { %3553 = vmatmul.msk.f32.gmra.mxu1 %vm135_vm1, %v2027_v37  ;;  %v2002_v44 = vmul.f32 %v1949_v59, %v4958_v52 }
 0xad1   :  { %v1953_v33 = vmul.f32 0.5, %v1952_v0 }
 0xad2   :  { %v2011_v60 = vmul.f32 %v5009_v28, %v2002_v44 }
 0xad3   :  { %v1954_v40 = vsub.f32 1.5, %v1953_v33 }
 0xad4   :  { %v3799_v62 = vpop.eup %3798  ;;  %v5041_v11 = vadd.f32 %v5015_v56, %v2011_v60 }
 0xad5   :  { %v1955_v43 = vmul.f32 %v3797_v48, %v1954_v40  ;;  %v1961_v45 = vmul.f32 %v3799_v62, %v1916_v51  ;;  %vm1967_vm8 = vweird.f32 %v3799_v62 }
 0xad6   :  { %v2028_v55 = vmax.f32 %v5041_v11, 0.0  ;;  %vm1968_vm10 = vmor %vm1966_vm9, %vm1967_vm8  ;;  %v5569_v11 = vld [vmem:[%s5896_s3 + $0x19] ss:$0 sm:$0xff] }
 0xad7   :  { %v1959_v31 = vsel %vm1958_vm7, %v3797_v48, %v1955_v43  ;;  %v1962_v57 = vmul.f32 %v3799_v62, %v1961_v45 }
 0xad8   :  { %3554 = vmatmul.msk.f32.gmra.mxu1 %vm135_vm1, %v2028_v55  ;;  %v2003_v52 = vmul.f32 %v1959_v31, %v4964_v32 }
 0xad9   :  { %v1963_v30 = vmul.f32 0.5, %v1962_v57 }
 0xada   :  { %v2012_v20 = vmul.f32 %v5009_v28, %v2003_v52 }
 0xadb   :  { %v1964_v16 = vsub.f32 1.5, %v1963_v30 }
 0xadc   :  { %v5050_v19 = vadd.f32 %v5015_v56, %v2012_v20 }
 0xadd   :  { %v1965_v58 = vmul.f32 %v3799_v62, %v1964_v16 }
 0xade   :  { %v5903_v9 = vmax.f32 %v5050_v19, 0.0 }
 0xadf   :  { %v1969_v39 = vsel %vm1968_vm10, %v3799_v62, %v1965_v58 }
 0xae0   :  { %v2004_v7 = vmul.f32 %v1969_v39, %v4970_v27  ;;  %3555 = vmatmul.msk.f32.gmra.mxu1 %vm135_vm1, %v5903_v9 }
 0xae2   :  { %v2013_v32 = vmul.f32 %v5009_v28, %v2004_v7 }
 0xae4   :  { %v5059_v22 = vadd.f32 %v5015_v56, %v2013_v32  ;;  %v3708_v32 = vld [vmem:[%s5896_s3 + $0x12] ss:$0 sm:$0xff] }
 0xae6   :  { %v5902_v8 = vmax.f32 %v5059_v22, 0.0 }
 0xae8   :  { %3556 = vmatmul.msk.f32.gmra.mxu1 %vm135_vm1, %v5902_v8 }
 0xaec   :  { %v1897_v29 = vpop.xlane.xlu0 %1896 }
 0xaed   :  { %v1909_v24 = vmul.f32 %v1897_v29, %v3988_v38 }
 0xaef   :  { %v1917_v50 = vadd.f32 1e-05, %v1909_v24 }
 0xaf1   :  { %3800 = vrsqrt.f32 %v1917_v50  ;;  %vm1976_vm12 = vweird.f32 %v1917_v50 }
 0xaf7   :  { %v3801_v27 = vpop.eup %3800 }
 0xaf8   :  { %v1971_v35 = vmul.f32 %v3801_v27, %v1917_v50  ;;  %vm1977_vm11 = vweird.f32 %v3801_v27 }
 0xaf9   :  { %vm1978_vm13 = vmor %vm1976_vm12, %vm1977_vm11 }
 0xafa   :  { %v1972_v25 = vmul.f32 %v3801_v27, %v1971_v35 }
 0xafc   :  { %v1973_v14 = vmul.f32 0.5, %v1972_v25 }
 0xafe   :  { %v1974_v49 = vsub.f32 1.5, %v1973_v14 }
 0xb00   :  { %v1975_v46 = vmul.f32 %v3801_v27, %v1974_v49 }
 0xb02   :  { %v1979_v48 = vsel %vm1978_vm13, %v3801_v27, %v1975_v46 }
 0xb03   :  { %v2005_v51 = vmul.f32 %v1979_v48, %v4976_v3 }
 0xb05   :  { %v1900_v12 = vpop.xlane.xlu2 %1899  ;;  %v2014_v13 = vmul.f32 %v5009_v28, %v2005_v51 }
 0xb06   :  { %v1910_v59 = vmul.f32 %v1900_v12, %v3988_v38 }
 0xb07   :  { %v5070_v0 = vadd.f32 %v5015_v56, %v2014_v13 }
 0xb08   :  { %v1918_v44 = vadd.f32 1e-05, %v1910_v59 }
 0xb09   :  { %v5901_v33 = vmax.f32 %v5070_v0, 0.0 }
 0xb0a   :  { %3802 = vrsqrt.f32 %v1918_v44  ;;  %vm1986_vm15 = vweird.f32 %v1918_v44 }
 0xb0b   :  { %3557 = vmatmul.msk.f32.gmra.mxu1 %vm135_vm1, %v5901_v33 }
 0xb0d   :  { %v1903_v60 = vpop.xlane.xlu1 %1902 }
 0xb0e   :  { %v1911_v40 = vmul.f32 %v1903_v60, %v3988_v38 }
 0xb10   :  { %v3803_v3 = vpop.eup %3802  ;;  %v1919_v62 = vadd.f32 1e-05, %v1911_v40 }
 0xb11   :  { %v1981_v43 = vmul.f32 %v3803_v3, %v1918_v44  ;;  %vm1987_vm14 = vweird.f32 %v3803_v3 }
 0xb12   :  { %3804 = vrsqrt.f32 %v1919_v62  ;;  %vm1988_vm0 = vmor %vm1986_vm15, %vm1987_vm14  ;;  %vm1996_vm5 = vweird.f32 %v1919_v62 }
 0xb13   :  { %v1982_v45 = vmul.f32 %v3803_v3, %v1981_v43 }
 0xb15   :  { %v1983_v31 = vmul.f32 0.5, %v1982_v45 }
 0xb17   :  { %v1984_v57 = vsub.f32 1.5, %v1983_v31 }
 0xb18   :  { %v3805_v52 = vpop.eup %3804 }
 0xb19   :  { %v1985_v30 = vmul.f32 %v3803_v3, %v1984_v57  ;;  %v1991_v20 = vmul.f32 %v3805_v52, %v1919_v62  ;;  %vm1997_vm2 = vweird.f32 %v3805_v52 }
 0xb1a   :  { %vm1998_vm6 = vmor %vm1996_vm5, %vm1997_vm2 }
 0xb1b   :  { %v1989_v16 = vsel %vm1988_vm0, %v3803_v3, %v1985_v30  ;;  %v1992_v58 = vmul.f32 %v3805_v52, %v1991_v20 }
 0xb1c   :  { %v2006_v39 = vmul.f32 %v1989_v16, %v4995_v18 }
 0xb1d   :  { %v1993_v7 = vmul.f32 0.5, %v1992_v58 }
 0xb1e   :  { %v2015_v29 = vmul.f32 %v5009_v28, %v2006_v39 }
 0xb1f   :  { %v1994_v24 = vsub.f32 1.5, %v1993_v7 }
 0xb20   :  { %v5083_v50 = vadd.f32 %v5015_v56, %v2015_v29 }
 0xb21   :  { %v1995_v27 = vmul.f32 %v3805_v52, %v1994_v24  ;;  %v2081_v35 = vpop.f32.mrf.mxu1 }
 0xb22   :  { %v5085_v25 = vadd.f32 %v3708_v32, %v2081_v35  ;;  %v5900_v18 = vmax.f32 %v5083_v50, 0.0 }
 0xb23   :  { %v1999_v14 = vsel %vm1998_vm6, %v3805_v52, %v1995_v27 }
 0xb24   :  { %v2007_v49 = vmul.f32 %v1999_v14, %v5001_v42  ;;  %3558 = vmatmul.msk.f32.gmra.mxu1 %vm135_vm1, %v5900_v18  ;;  %v2105_v46 = vmul.f32 %v5085_v25, %v5085_v25 }
 0xb26   :  { %2166 = vrot.lane.b32.xlu2 %v2105_v46, %s3891_s24  ;;  %v2016_v48 = vmul.f32 %v5009_v28, %v2007_v49  ;;  %v2113_v44 = vsel %vm135_vm1, %v2105_v46, 0.0 }
 0xb28   :  { %v5097_v51 = vadd.f32 %v5015_v56, %v2016_v48 }
 0xb2a   :  { %v5899_v12 = vmax.f32 %v5097_v51, 0.0 }
 0xb2c   :  { %3559 = vmatmul.msk.f32.gmra.mxu1 %vm135_vm1, %v5899_v12 }
 0xb4d   :  { %v2084_v42 = vpop.f32.mrf.mxu1 }
 0xb4e   :  { %v5103_v13 = vadd.f32 %v3708_v32, %v2084_v42 }
 0xb50   :  { %v2106_v59 = vmul.f32 %v5103_v13, %v5103_v13 }
 0xb52   :  { %2168 = vrot.lane.b32.xlu1 %v2106_v59, %s3891_s24  ;;  %v2114_v28 = vsel %vm135_vm1, %v2106_v59, 0.0  ;;  %v3709_v59 = vld [vmem:[%s5896_s3 + $0xf] ss:$0 sm:$0xff] }
 0xb53   :  { %v2115_v56 = vadd.f32 %v2114_v28, %v2113_v44 }
 0xb55   :  { %v2087_v60 = vpop.f32.mrf.mxu1 }
 0xb56   :  { %v5110_v40 = vadd.f32 %v3708_v32, %v2087_v60 }
 0xb58   :  { %v2107_v3 = vmul.f32 %v5110_v40, %v5110_v40 }
 0xb5a   :  { %2170 = vrot.lane.b32.xlu0 %v2107_v3, %s3891_s24  ;;  %v2116_v62 = vsel %vm135_vm1, %v2107_v3, 0.0 }
 0xb5b   :  { %v2117_v43 = vadd.f32 %v2116_v62, %v2115_v56 }
 0xb5d   :  { %v2090_v45 = vpop.f32.mrf.mxu1 }
 0xb5e   :  { %v5116_v31 = vadd.f32 %v3708_v32, %v2090_v45 }
 0xb60   :  { %v2108_v57 = vmul.f32 %v5116_v31, %v5116_v31 }
 0xb62   :  { %2172 = vrot.lane.b32.xlu2 %v2108_v57, %s3891_s24  ;;  %v2118_v52 = vsel %vm135_vm1, %v2108_v57, 0.0 }
 0xb63   :  { %v2119_v30 = vadd.f32 %v2118_v52, %v2117_v43  ;;  %v3710_v43 = vld [vmem:[%s5896_s3 + $0x15] ss:$0 sm:$0xff] }
 0xb65   :  { %v2093_v20 = vpop.f32.mrf.mxu1 }
 0xb66   :  { %v5122_v16 = vadd.f32 %v3708_v32, %v2093_v20 }
 0xb68   :  { %v2109_v58 = vmul.f32 %v5122_v16, %v5122_v16 }
 0xb6a   :  { %2174 = vrot.lane.b32.xlu0 %v2109_v58, %s3891_s24  ;;  %v2120_v14 = vsel %vm135_vm1, %v2109_v58, 0.0 }
 0xb6b   :  { %v2121_v46 = vadd.f32 %v2120_v14, %v2119_v30 }
 0xb80   :  { %v2167_v52 = vpop.permute.xlu2 %2166 }
 0xb88   :  { %v2096_v39 = vpop.f32.mrf.mxu1 }
 0xb89   :  { %v5127_v7 = vadd.f32 %v3708_v32, %v2096_v39 }
 0xb8b   :  { %v2110_v29 = vmul.f32 %v5127_v7, %v5127_v7 }
 0xb8d   :  { %2176 = vrot.lane.b32.xlu1 %v2110_v29, %s3891_s24  ;;  %v2122_v49 = vsel %vm135_vm1, %v2110_v29, 0.0 }
 0xb8e   :  { %v2123_v28 = vadd.f32 %v2122_v49, %v2121_v46 }
 0xba1   :  { %v2099_v24 = vpop.f32.mrf.mxu1 }
 0xba2   :  { %v5132_v27 = vadd.f32 %v3708_v32, %v2099_v24 }
 0xba4   :  { %v2111_v35 = vmul.f32 %v5132_v27, %v5132_v27 }
 0xba6   :  { %2178 = vrot.lane.b32.xlu2 %v2111_v35, %s3891_s24  ;;  %v2124_v44 = vsel %vm135_vm1, %v2111_v35, 0.0  ;;  %v2190_v35 = vsel %vm135_vm1, %v2167_v52, 0.0 }
 0xba7   :  { %v2125_v60 = vadd.f32 %v2124_v44, %v2123_v28 }
 0xba9   :  { %v2102_v48 = vpop.f32.mrf.mxu1 }
 0xbaa   :  { %v5139_v42 = vadd.f32 %v3708_v32, %v2102_v48  ;;  %v3711_v32 = vld [vmem:[%s5896_s3 + $0x16] ss:$0 sm:$0xff] }
 0xbac   :  { %v2112_v56 = vmul.f32 %v5139_v42, %v5139_v42 }
 0xbae   :  { %1819 = vrot.lane.b32.xlu2 %v3709_v59, %s3892_s27  ;;  %v2126_v3 = vsel %vm135_vm1, %v2112_v56, 0.0 }
 0xbaf   :  { %v2127_v62 = vadd.f32 %v2126_v3, %v2125_v60 }
 0xbb1   :  { %2128 = vadd.xlane.f32.xlu0 %v2127_v62 }
 0xbb6   :  { %2915 = vrot.lane.b32.xlu2 %v3711_v32, %s3892_s27 }
 0xbbc   :  { %v2173_v58 = vpop.permute.xlu2 %2172 }
 0xbbd   :  { %v2195_v60 = vsel %vm135_vm1, %v2173_v58, 0.0 }
 0xbc4   :  { %v2169_v30 = vpop.permute.xlu1 %2168 }
 0xbc5   :  { %2180 = vrot.lane.b32.xlu0 %v2112_v56, %s3891_s24  ;;  %v2191_v29 = vsel %vm135_vm1, %v2169_v30, 0.0 }
 0xbc6   :  { %v2192_v49 = vadd.f32 %v2191_v29, %v2190_v35 }
 0xbcc   :  { %v2171_v45 = vpop.permute.xlu0 %2170 }
 0xbcd   :  { %2901 = vrot.lane.b32.xlu0 %v3710_v43, %s3892_s27  ;;  %v2193_v14 = vsel %vm135_vm1, %v2171_v45, 0.0 }
 0xbce   :  { %v2194_v48 = vadd.f32 %v2193_v14, %v2192_v49 }
 0xbd0   :  { %v2196_v62 = vadd.f32 %v2195_v60, %v2194_v48 }
 0xbdc   :  { %v2175_v57 = vpop.permute.xlu0 %2174 }
 0xbdd   :  { %v2197_v3 = vsel %vm135_vm1, %v2175_v57, 0.0 }
 0xbde   :  { %v2198_v30 = vadd.f32 %v2197_v3, %v2196_v62 }
 0xbff   :  { %v2177_v44 = vpop.permute.xlu1 %2176 }
 0xc00   :  { %v2179_v28 = vpop.permute.xlu2 %2178  ;;  %v2199_v43 = vsel %vm135_vm1, %v2177_v44, 0.0 }
 0xc01   :  { %v2200_v52 = vadd.f32 %v2199_v43, %v2198_v30  ;;  %v2201_v45 = vsel %vm135_vm1, %v2179_v28, 0.0 }
 0xc24   :  { %v2129_v20 = vpop.xlane.xlu0 %2128 }
 0xc25   :  { %v2130_v39 = vrot.slane %v2129_v20, 4 }
 0xc27   :  { %v2131_v24 = vadd.f32 %v2130_v39, %v2129_v20  ;;  %v2202_v20 = vadd.f32 %v2201_v45, %v2200_v52  ;;  %v1820_v39 = vpop.permute.xlu2 %1819 }
 0xc28   :  { %v1829_v58 = vadd.f32 %v1820_v39, %v4947_v1  ;;  %v1828_v57 = vadd.f32 %v1820_v39, %v4943_v2  ;;  %v1826_v28 = vadd.f32 %v1820_v39, %v4929_v4  ;;  %v1822_v43 = vadd.f32 %v1820_v39, %v4905_v23 }
 0xc29   :  { %v2132_v46 = vrot.slane %v2131_v24, 2  ;;  %v1825_v52 = vadd.f32 %v1820_v39, %v4925_v26  ;;  %v1824_v45 = vadd.f32 %v1820_v39, %v4921_v47 }
 0xc2b   :  { %v2133_v59 = vadd.f32 %v2132_v46, %v2131_v24 }
 0xc2d   :  { %v2134_v56 = vrot.slane %v2133_v59, 1 }
 0xc2f   :  { %v2135_v32 = vadd.f32 %v2134_v56, %v2133_v59  ;;  %v2916_v49 = vpop.permute.xlu2 %2915  ;;  %v1827_v56 = vadd.f32 %v1820_v39, %v4933_v21 }
 0xc31   :  { %3638 = vpush %v2135_v32 }
 0xc37   :  { %v2181_v29 = vpop.permute.xlu0 %2180 }
 0xc38   :  { %v2203_v24 = vsel %vm135_vm1, %v2181_v29, 0.0 }
 0xc39   :  { %v2204_v35 = vadd.f32 %v2203_v24, %v2202_v20 }
 0xc3b   :  { %2205 = vadd.xlane.f32.xlu1 %v2204_v35 }
 0xc3f   :  { %v2902_v14 = vpop.permute.xlu0 %2901 }
 0xc40   :  { %v2911_v46 = vmul.f32 %v2902_v14, %v1829_v58  ;;  %v2910_v48 = vmul.f32 %v2902_v14, %v1828_v57  ;;  %v2909_v62 = vmul.f32 %v2902_v14, %v1827_v56  ;;  %v2908_v32 = vmul.f32 %v2902_v14, %v1826_v28 }
 0xc41   :  { %v2904_v30 = vmul.f32 %v2902_v14, %v1822_v43  ;;  %v2907_v4 = vmul.f32 %v2902_v14, %v1825_v52  ;;  %v2906_v29 = vmul.f32 %v2902_v14, %v1824_v45 }
 0xc42   :  { %v2925_v59 = vadd.f32 %v2916_v49, %v2911_v46  ;;  %v2924_v44 = vadd.f32 %v2916_v49, %v2910_v48  ;;  %v2923_v1 = vadd.f32 %v2916_v49, %v2909_v62  ;;  %v2922_v2 = vadd.f32 %v2916_v49, %v2908_v32 }
 0xc43   :  { %v2918_v24 = vadd.f32 %v2916_v49, %v2904_v30  ;;  %v2921_v35 = vadd.f32 %v2916_v49, %v2907_v4  ;;  %v2920_v58 = vadd.f32 %v2916_v49, %v2906_v29  ;;  %v1823_v46 = vadd.f32 %v1820_v39, %v4917_v17 }
 0xc44   :  { %v2933_v60 = vmax.f32 %v2925_v59, 0.0  ;;  %v2932_v3 = vmax.f32 %v2924_v44, 0.0  ;;  %v2931_v21 = vmax.f32 %v2923_v1, 0.0  ;;  %v2930_v20 = vmax.f32 %v2922_v2, 0.0 }
 0xc45   :  { %v2926_v57 = vmax.f32 %v2918_v24, 0.0  ;;  %v2929_v23 = vmax.f32 %v2921_v35, 0.0  ;;  %v2928_v26 = vmax.f32 %v2920_v58, 0.0  ;;  %v2905_v48 = vmul.f32 %v2902_v14, %v1823_v46  ;;  %v3874_v58 = vld [vmem:[%s5897_s1] sm:$0xff]  ;;  %v3876_v46 = vld [vmem:[%s5897_s1 + $0x10] sm:$0xff] }
 0xc46   :  { %2956 = vrot.lane.b32.xlu0 %v2933_v60, %s3891_s24  ;;  %2954 = vrot.lane.b32.xlu2 %v2932_v3, %s3891_s24 }
 0xc47   :  { %v2919_v47 = vadd.f32 %v2916_v49, %v2905_v48 }
 0xc49   :  { %v2927_v59 = vmax.f32 %v2919_v47, 0.0  ;;  %v3878_v47 = vld [vmem:[%s5897_s1 + $0x20] sm:$0xff] }
 0xc4e   :  { %2952 = vrot.lane.b32.xlu0 %v2931_v21, %s3891_s24  ;;  %2950 = vrot.lane.b32.xlu2 %v2930_v20, %s3891_s24 }
 0xc54   :  { %2942 = vrot.lane.b32.xlu1 %v2926_v57, %s3891_s24  ;;  %v3875_v57 = vld [vmem:[%s5897_s1 + $0x8] sm:$0xff] }
 0xc56   :  { %2948 = vrot.lane.b32.xlu0 %v2929_v23, %s3891_s24  ;;  %2946 = vrot.lane.b32.xlu2 %v2928_v26, %s3891_s24  ;;  %v3877_v23 = vld [vmem:[%s5897_s1 + $0x18] sm:$0xff] }
 0xc5e   :  { %2944 = vrot.lane.b32.xlu0 %v2927_v59, %s3891_s24 }
 0xc62   :  { %s3639_s7 = spop %3638 }
 0xc63   :  { %v2137_v44 = vstv %s3639_s7 }
 0xc64   :  { %3806 = vrsqrt.f32 %v2137_v44  ;;  %vm2144_vm8 = vweird.f32 %v2137_v44 }
 0xc6a   :  { %v3807_v56 = vpop.eup %3806 }
 0xc6b   :  { %v2139_v28 = vmul.f32 %v3807_v56, %v2137_v44  ;;  %vm2145_vm7 = vweird.f32 %v3807_v56 }
 0xc6c   :  { %vm2146_vm9 = vmor %vm2144_vm8, %vm2145_vm7 }
 0xc6d   :  { %v2140_v60 = vmul.f32 %v3807_v56, %v2139_v28 }
 0xc6f   :  { %v2141_v17 = vmul.f32 0.5, %v2140_v60  ;;  %v3879_v60 = vld [vmem:[%s5897_s1 + $0x28] sm:$0xff] }
 0xc71   :  { %v2142_v39 = vsub.f32 1.5, %v2141_v17 }
 0xc73   :  { %v2143_v3 = vmul.f32 %v3807_v56, %v2142_v39 }
 0xc75   :  { %v2147_v14 = vsel %vm2146_vm9, %v3807_v56, %v2143_v3  ;;  %v3880_v3 = vld [vmem:[%s5897_s1 + $0x30] sm:$0xff] }
 0xc76   :  { %3640 = vpush %v2147_v14  ;;  %v3881_v14 = vld [vmem:[%s5897_s1 + $0x38] sm:$0xff] }
 0xca0   :  { %v5182_v43 = vpop.permute.xlu2 %2954 }
 0xca7   :  { %s5218_s14 = spop %3640 }
 0xca8   :  { %v5188_v21 = vpop.permute.xlu2 %2950 }
 0xcae   :  { %v2206_v62 = vpop.xlane.xlu1 %2205 }
 0xcaf   :  { %v2207_v32 = vrot.slane %v2206_v62, 4 }
 0xcb0   :  { %v5197_v29 = vpop.permute.xlu2 %2946 }
 0xcb1   :  { %v2208_v49 = vadd.f32 %v2207_v32, %v2206_v62  ;;  %v3882_v62 = vld [vmem:[%s5897_s1 + $0x40] sm:$0xff]  ;;  %v3883_v32 = vld [vmem:[%s5897_s1 + $0x48] sm:$0xff] }
 0xcb3   :  { %v2209_v1 = vrot.slane %v2208_v49, 2 }
 0xcb5   :  { %v2210_v2 = vadd.f32 %v2209_v1, %v2208_v49  ;;  %v3884_v49 = vld [vmem:[%s5897_s1 + $0x50] sm:$0xff]  ;;  %v3885_v1 = vld [vmem:[%s5897_s1 + $0x58] sm:$0xff] }
 0xcb7   :  { %v2211_v30 = vrot.slane %v2210_v2, 1 }
 0xcb8   :  { %v5184_v52 = vpop.permute.xlu0 %2956 }
 0xcb9   :  { %2974 = vmatpush.msra.mxu2 %v5184_v52  ;;  %v2212_v45 = vadd.f32 %v2211_v30, %v2210_v2 }
 0xcbb   :  { %3642 = vpush %v2212_v45  ;;  %2975 = vmatpush.msra.mxu2 %v5182_v43 }
 0xcc0   :  { %v5190_v20 = vpop.permute.xlu0 %2952 }
 0xcc1   :  { %2976 = vmatpush.msra.mxu2 %v5190_v20 }
 0xcc3   :  { %2977 = vmatpush.msra.mxu2 %v5188_v21 }
 0xcc6   :  { %v5203_v35 = vpop.permute.xlu1 %2942 }
 0xcc8   :  { %v5194_v4 = vpop.permute.xlu0 %2948 }
 0xcc9   :  { %2978 = vmatpush.msra.mxu2 %v5194_v4 }
 0xccb   :  { %2979 = vmatpush.msra.mxu2 %v5197_v29 }
 0xcd0   :  { %v5200_v24 = vpop.permute.xlu0 %2944 }
 0xcd1   :  { %2980 = vmatpush.msra.mxu2 %v5200_v24 }
 0xcd3   :  { %2981 = vmatpush.msra.mxu2 %v5203_v35 }
 0xcd4   :  { %3572 = vmatmul.msk.f32.vlgmr.msra.gmra.mxu2 %vm642_vm4, %v3874_v58 }
 0xcdc   :  { %3573 = vmatmul.msk.f32.gmra.mxu2 %vm642_vm4, %v3875_v57 }
 0xce4   :  { %3574 = vmatmul.msk.f32.gmra.mxu2 %vm642_vm4, %v3876_v46  ;;  %v3886_v46 = vld [vmem:[%s5897_s1 + $0x60] sm:$0xff] }
 0xcec   :  { %s3643_s15 = spop %3642  ;;  %3575 = vmatmul.msk.f32.gmra.mxu2 %vm642_vm4, %v3877_v23 }
 0xced   :  { %v2214_v26 = vstv %s3643_s15 }
 0xcee   :  { %3808 = vrsqrt.f32 %v2214_v26  ;;  %vm2221_vm11 = vweird.f32 %v2214_v26 }
 0xcf4   :  { %v3809_v48 = vpop.eup %3808  ;;  %3576 = vmatmul.msk.f32.gmra.mxu2 %vm642_vm4, %v3878_v47 }
 0xcf5   :  { %v2216_v59 = vmul.f32 %v3809_v48, %v2214_v26  ;;  %vm2222_vm10 = vweird.f32 %v3809_v48 }
 0xcf6   :  { %vm2223_vm12 = vmor %vm2221_vm11, %vm2222_vm10 }
 0xcf7   :  { %v2217_v44 = vmul.f32 %v3809_v48, %v2216_v59 }
 0xcf9   :  { %v2218_v56 = vmul.f32 0.5, %v2217_v44 }
 0xcfb   :  { %v2219_v28 = vsub.f32 1.5, %v2218_v56 }
 0xcfc   :  { %3577 = vmatmul.msk.f32.gmra.mxu2 %vm642_vm4, %v3879_v60 }
 0xcfd   :  { %v2220_v17 = vmul.f32 %v3809_v48, %v2219_v28 }
 0xcff   :  { %v2224_v39 = vsel %vm2223_vm12, %v3809_v48, %v2220_v17 }
 0xd00   :  { %3644 = vpush %v2224_v39 }
 0xd04   :  { %3578 = vmatmul.msk.f32.gmra.mxu2 %vm642_vm4, %v3880_v3  ;;  %v3887_v3 = vld [vmem:[%s5897_s1 + $0x68] sm:$0xff] }
 0xd0c   :  { %3579 = vmatmul.msk.f32.gmra.mxu2 %vm642_vm4, %v3881_v14  ;;  %v3676_v14 = vpack.i.bf16 %v5122_v16, %v5127_v7 }
 0xd14   :  { %3580 = vmatmul.msk.f32.gmra.mxu2 %vm642_vm4, %v3882_v62 }
 0xd1c   :  { %3581 = vmatmul.msk.f32.gmra.mxu2 %vm642_vm4, %v3883_v32 }
 0xd24   :  { %3582 = vmatmul.msk.f32.gmra.mxu2 %vm642_vm4, %v3884_v49 }
 0xd2c   :  { %3583 = vmatmul.msk.f32.gmra.mxu2 %vm642_vm4, %v3885_v1 }
 0xd31   :  { %s3645_s0 = spop %3644 }
 0xd32   :  { %v2226_v2 = vstv %s3645_s0 }
 0xd33   :  { %v2227_v30 = vmul.f32 %v2226_v2, %v5085_v25  ;;  %v2228_v45 = vmul.f32 %v2226_v2, %v5103_v13  ;;  %v2233_v58 = vmul.f32 %v2226_v2, %v5132_v27  ;;  %v2229_v57 = vmul.f32 %v2226_v2, %v5110_v40 }
 0xd34   :  { %3584 = vmatmul.msk.f32.gmra.mxu2 %vm642_vm4, %v3886_v46  ;;  %v2230_v48 = vmul.f32 %v2226_v2, %v5116_v31  ;;  %v2231_v44 = vmul.f32 %v2226_v2, %v5122_v16  ;;  %v2232_v60 = vmul.f32 %v2226_v2, %v5127_v7  ;;  %v2234_v49 = vmul.f32 %v2226_v2, %v5139_v42 }
 0xd35   :  { %v2477_v23 = vsel %vm789_vm3, %v2227_v30, 0.0  ;;  %v2478_v26 = vsel %vm789_vm3, %v2228_v45, 0.0  ;;  %2243 = vrot.lane.b32.xlu2 %v2227_v30, %s3891_s24  ;;  %2245 = vrot.lane.b32.xlu0 %v2228_v45, %s3891_s24  ;;  %v2480_v59 = vsel %vm789_vm3, %v2229_v57, 0.0  ;;  %v2488_v30 = vsel %vm789_vm3, %v2233_v58, 0.0 }
 0xd36   :  { %v2479_v47 = vadd.f32 %v2478_v26, %v2477_v23  ;;  %2255 = vrot.lane.b32.xlu1 %v2233_v58, %s3891_s24  ;;  %v2482_v28 = vsel %vm789_vm3, %v2230_v48, 0.0  ;;  %v2484_v39 = vsel %vm789_vm3, %v2231_v44, 0.0  ;;  %v2486_v32 = vsel %vm789_vm3, %v2232_v60, 0.0  ;;  %v3888_v26 = vld [vmem:[%s5897_s1 + $0x70] sm:$0xff]  ;;  %v3889_v58 = vld [vmem:[%s5897_s1 + $0x78] sm:$0xff] }
 0xd37   :  { %v2490_v46 = vsel %vm789_vm3, %v2234_v49, 0.0  ;;  %v3671_v2 = vpack.i.bf16 %v5132_v27, %v5139_v42 }
 0xd38   :  { %v2481_v56 = vadd.f32 %v2480_v59, %v2479_v47 }
 0xd3a   :  { %v2483_v17 = vadd.f32 %v2482_v28, %v2481_v56 }
 0xd3c   :  { %3585 = vmatmul.msk.f32.gmra.mxu2 %vm642_vm4, %v3887_v3  ;;  %v2485_v62 = vadd.f32 %v2484_v39, %v2483_v17 }
 0xd3d   :  { %2247 = vrot.lane.b32.xlu2 %v2229_v57, %s3891_s24  ;;  %2249 = vrot.lane.b32.xlu0 %v2230_v48, %s3891_s24  ;;  %v3681_v57 = vpack.i.bf16 %v5110_v40, %v5116_v31  ;;  %v3686_v48 = vpack.i.bf16 %v5085_v25, %v5103_v13 }
 0xd3e   :  { %3677 = vrot.lane.b32.xlu1 %v3676_v14, %s3893_s6  ;;  %v2487_v1 = vadd.f32 %v2486_v32, %v2485_v62 }
 0xd40   :  { %v2489_v45 = vadd.f32 %v2488_v30, %v2487_v1 }
 0xd42   :  { %v2491_v23 = vadd.f32 %v2490_v46, %v2489_v45 }
 0xd44   :  { %3586 = vmatmul.msk.f32.gmra.mxu2 %vm642_vm4, %v3888_v26 }
 0xd45   :  { %2251 = vrot.lane.b32.xlu2 %v2231_v44, %s3891_s24  ;;  %2253 = vrot.lane.b32.xlu0 %v2232_v60, %s3891_s24 }
 0xd4c   :  { %3587 = vmatmul.msk.f32.gmra.mxu2 %vm642_vm4, %v3889_v58 }
 0xd4d   :  { %2257 = vrot.lane.b32.xlu2 %v2234_v49, %s3891_s24  ;;  %3672 = vrot.lane.b32.xlu0 %v3671_v2, %s3893_s6 }
 0xd55   :  { %3682 = vrot.lane.b32.xlu2 %v3681_v57, %s3893_s6  ;;  %3687 = vrot.lane.b32.xlu0 %v3686_v48, %s3893_s6  ;;  %v3078_v57 = vld [vmem:[%s5894_s2 + $0x148] sm:$0xff]  ;;  %v3077_v48 = vld [vmem:[%s5894_s2 + $0x140] sm:$0xff] }
 0xd56   :  { %3113 = vmatpush.msrb.mxu0 %v3078_v57  ;;  %v3073_v57 = vld [vmem:[%s5894_s2 + $0x120] sm:$0xff] }
 0xd57   :  { %v5308_v47 = vpop.f32.mrf.mxu2 }
 0xd58   :  { %3114 = vmatpush.msrb.mxu0 %v3077_v48 }
 0xd5f   :  { %v5310_v59 = vpop.f32.mrf.mxu2 }
 0xd67   :  { %v5312_v44 = vpop.f32.mrf.mxu2 }
 0xd6f   :  { %v5314_v56 = vpop.f32.mrf.mxu2 }
 0xd77   :  { %v5316_v28 = vpop.f32.mrf.mxu2 }
 0xd7f   :  { %v5318_v60 = vpop.f32.mrf.mxu2 }
 0xd87   :  { %v5320_v17 = vpop.f32.mrf.mxu2 }
 0xd8f   :  { %v2244_v39 = vpop.permute.xlu2 %2243  ;;  %v5322_v3 = vpop.f32.mrf.mxu2 }
 0xd90   :  { %2267 = vxpose.xlu1.b32.start [1/8] (short) (narrow) %v2244_v39, 32  ;;  %v3076_v39 = vld [vmem:[%s5894_s2 + $0x138] sm:$0xff] }
 0xd91   :  { %3115 = vmatpush.msrb.mxu0 %v3076_v39  ;;  %v3072_v39 = vld [vmem:[%s5894_s2 + $0x118] sm:$0xff] }
 0xd97   :  { %v3007_v14 = vpop.f32.mrf.mxu2  ;;  %v2248_v32 = vpop.permute.xlu2 %2247 }
 0xd98   :  { %3039 = vrot.lane.b32.xlu2 %v3007_v14, %s3892_s27  ;;  %v2492_v14 = vrot.slane %v2491_v23, 4 }
 0xd9f   :  { %v3010_v62 = vpop.f32.mrf.mxu2  ;;  %v2252_v46 = vpop.permute.xlu2 %2251 }
 0xda0   :  { %3041 = vrot.lane.b32.xlu0 %v3010_v62, %s3892_s27 }
 0xda7   :  { %v2246_v49 = vpop.permute.xlu0 %2245  ;;  %v3013_v1 = vpop.f32.mrf.mxu2 }
 0xda8   :  { %2268 = vxpose.xlu1.b32.cont [2/8] (short) (narrow) %v2246_v49, 32  ;;  %3043 = vrot.lane.b32.xlu2 %v3013_v1, %s3892_s27  ;;  %v2256_v26 = vpop.permute.xlu1 %2255  ;;  %v2258_v62 = vpop.permute.xlu2 %2257  ;;  %v3074_v49 = vld [vmem:[%s5894_s2 + $0x128] sm:$0xff] }
 0xdaf   :  { %v2250_v30 = vpop.permute.xlu0 %2249  ;;  %v3016_v45 = vpop.f32.mrf.mxu2 }
 0xdb0   :  { %2269 = vxpose.xlu1.b32.cont [3/8] (short) (narrow) %v2248_v32, 32  ;;  %3045 = vrot.lane.b32.xlu0 %v3016_v45, %s3892_s27  ;;  %v3075_v32 = vld [vmem:[%s5894_s2 + $0x130] sm:$0xff]  ;;  %v3678_v48 = vpop.permute.xlu1 %3677 }
 0xdb1   :  { %3116 = vmatpush.msrb.mxu0 %v3075_v32 }
 0xdb3   :  { %3117 = vmatpush.msrb.mxu0 %v3074_v49 }
 0xdb5   :  { %3118 = vmatpush.msrb.mxu0 %v3073_v57 }
 0xdb7   :  { %v2254_v2 = vpop.permute.xlu0 %2253  ;;  %v3019_v58 = vpop.f32.mrf.mxu2  ;;  %3119 = vmatpush.msrb.mxu0 %v3072_v39 }
 0xdb8   :  { %2270 = vxpose.xlu1.b32.cont [4/8] (short) (narrow) %v2250_v30, 32  ;;  %3047 = vrot.lane.b32.xlu2 %v3019_v58, %s3892_s27  ;;  %v2493_v30 = vadd.f32 %v2492_v14, %v2491_v23  ;;  %v3679_v23 = vunpack.i.l.bf16 %v3678_v48  ;;  %v3683_v14 = vpop.permute.xlu2 %3682 }
 0xdb9   :  { %v3684_v33 = vunpack.i.l.bf16 %v3683_v14 }
 0xdba   :  { %v2494_v18 = vrot.slane %v2493_v30, 2 }
 0xdbc   :  { %v2495_v32 = vadd.f32 %v2494_v18, %v2493_v30  ;;  %v3071_v18 = vld [vmem:[%s5894_s2 + $0x110] sm:$0xff] }
 0xdbd   :  { %3120 = vmatpush.msrb.mxu0 %v3071_v18 }
 0xdbf   :  { %v3673_v1 = vpop.permute.xlu0 %3672  ;;  %v3022_v58 = vpop.f32.mrf.mxu2 }
 0xdc0   :  { %v3674_v45 = vunpack.i.l.bf16 %v3673_v1  ;;  %2271 = vxpose.xlu1.b32.cont [5/8] (short) (narrow) %v2252_v46, 32  ;;  %3049 = vrot.lane.b32.xlu0 %v3022_v58, %s3892_s27  ;;  %v3675_v12 = vunpack.i.h.bf16 %v3673_v1  ;;  %v3680_v46 = vunpack.i.h.bf16 %v3678_v48  ;;  %v3685_v1 = vunpack.i.h.bf16 %v3683_v14 }
 0xdc2   :  { %2351 = vmatpush.msra.mxu3 %v3674_v45  ;;  %v2496_v45 = vrot.slane %v2495_v32, 1 }
 0xdc4   :  { %2352 = vmatpush.msra.mxu3 %v3675_v12  ;;  %v2497_v12 = vadd.f32 %v2496_v45, %v2495_v32  ;;  %v2374_v45 = vmul.f32 64.0, %v5110_v40 }
 0xdc6   :  { %2353 = vmatpush.msra.mxu3 %v3679_v23  ;;  %v5370_v23 = vstv %s5218_s14 }
 0xdc7   :  { %v3025_v8 = vpop.f32.mrf.mxu2  ;;  %v3688_v49 = vpop.permute.xlu0 %3687  ;;  %v5378_v14 = vmul.f32 %v5370_v23, %v5085_v25 }
 0xdc8   :  { %2272 = vxpose.xlu1.b32.cont [6/8] (short) (narrow) %v2254_v2, 32  ;;  %2354 = vmatpush.msra.mxu3 %v3680_v46  ;;  %v3689_v58 = vunpack.i.l.bf16 %v3688_v49  ;;  %v3690_v57 = vunpack.i.h.bf16 %v3688_v49 }
 0xdc9   :  { %3051 = vrot.lane.b32.xlu2 %v3025_v8, %s3892_s27 }
 0xdca   :  { %2355 = vmatpush.msra.mxu3 %v3684_v33 }
 0xdcc   :  { %2356 = vmatpush.msra.mxu3 %v3685_v1 }
 0xdce   :  { %2357 = vmatpush.msra.mxu3 %v3689_v58  ;;  %v5394_v58 = vmul.f32 %v5370_v23, %v5110_v40 }
 0xdcf   :  { %v3028_v9 = vpop.f32.mrf.mxu2 }
 0xdd0   :  { %2273 = vxpose.xlu1.b32.cont [7/8] (short) (narrow) %v2256_v26, 32  ;;  %2358 = vmatpush.msra.mxu3 %v3690_v57 }
 0xdd1   :  { %2499 = vrot.lane.b32.xlu2 %v2497_v12, %s3891_s24  ;;  %3053 = vrot.lane.b32.xlu0 %v3028_v9, %s3892_s27 }
 0xdd8   :  { %2274 = vxpose.xlu1.b32.end [8/8] (short) (narrow) %v2258_v62, 32 }
 0xdf2   :  { %v3040_v8 = vpop.permute.xlu2 %3039 }
 0xdf3   :  { %v3063_v33 = vsel %vm135_vm1, %v5308_v47, %v3040_v8  ;;  %v5405_v8 = vmul.f32 %v5370_v23, %v5116_v31 }
 0xdf4   :  { %3588 = vmatmul.msk.f32.vlgmr.msrb.gmra.mxu0 %vm642_vm4, %v3063_v33 }
 0xe02   :  { %v3044_v26 = vpop.permute.xlu2 %3043 }
 0xe03   :  { %v3065_v48 = vsel %vm135_vm1, %v5312_v44, %v3044_v26 }
 0xe12   :  { %v3042_v2 = vpop.permute.xlu0 %3041  ;;  %v3048_v9 = vpop.permute.xlu2 %3047 }
 0xe13   :  { %v3064_v30 = vsel %vm135_vm1, %v5310_v59, %v3042_v2  ;;  %v5374_v59 = vmul.f32 %v5370_v23, %v5103_v13  ;;  %v3067_v46 = vsel %vm135_vm1, %v5316_v28, %v3048_v9  ;;  %v3148_v2 = vld [vmem:[%s5894_s2 + $0x160] sm:$0xff] }
 0xe14   :  { %3589 = vmatmul.msk.f32.gmra.mxu0 %vm642_vm4, %v3064_v30 }
 0xe1c   :  { %3590 = vmatmul.msk.f32.gmra.mxu0 %vm642_vm4, %v3065_v48  ;;  %v2372_v48 = vmul.f32 64.0, %v5085_v25 }
 0xe22   :  { %v3046_v62 = vpop.permute.xlu0 %3045 }
 0xe23   :  { %v3052_v39 = vpop.permute.xlu2 %3051  ;;  %v3066_v47 = vsel %vm135_vm1, %v5314_v56, %v3046_v62 }
 0xe24   :  { %3591 = vmatmul.msk.f32.gmra.mxu0 %vm642_vm4, %v3066_v47  ;;  %v3069_v33 = vsel %vm135_vm1, %v5320_v17, %v3052_v39  ;;  %v2373_v39 = vmul.f32 64.0, %v5103_v13  ;;  %v3147_v47 = vld [vmem:[%s5894_s2 + $0x158] sm:$0xff]  ;;  %v5438_v13 = vmul.f32 %v5370_v23, %v5122_v16 }
 0xe2b   :  { %v5380_v44 = vpop.permute.xlu2 %2499 }
 0xe2c   :  { %v2503_v56 = vmul.f32 %v5380_v44, %v5374_v59  ;;  %v2502_v32 = vmul.f32 %v5380_v44, %v5378_v14  ;;  %3592 = vmatmul.msk.f32.gmra.mxu0 %vm642_vm4, %v3067_v46  ;;  %v2504_v28 = vmul.f32 %v5380_v44, %v5394_v58  ;;  %v2505_v40 = vmul.f32 %v5380_v44, %v5405_v8 }
 0xe2e   :  { %v2513_v49 = vsel %vm135_vm1, %v2503_v56, 0.0  ;;  %v2510_v1 = vsel %vm135_vm1, %v2502_v32, 0.0  ;;  %v2516_v18 = vsel %vm135_vm1, %v2504_v28, 0.0  ;;  %v2519_v26 = vsel %vm135_vm1, %v2505_v40, 0.0  ;;  %v3712_v32 = vld [vmem:[%s5896_s3 + $0x17] ss:$0 sm:$0xff] }
 0xe2f   :  { %2514 = vadd.xlane.f32.xlu2 %v2513_v49  ;;  %2511 = vadd.xlane.f32.xlu0 %v2510_v1  ;;  %v2506_v56 = vmul.f32 %v5380_v44, %v5438_v13  ;;  %v2155_v28 = vmul.f32 %v5370_v23, %v5127_v7 }
 0xe31   :  { %v2522_v49 = vsel %vm135_vm1, %v2506_v56, 0.0 }
 0xe32   :  { %2392 = vrot.lane.b32.xlu1 %v2374_v45, %s3893_s6  ;;  %v3050_v57 = vpop.permute.xlu0 %3049 }
 0xe33   :  { %v3068_v12 = vsel %vm135_vm1, %v5318_v60, %v3050_v57  ;;  %v3149_v60 = vld [vmem:[%s5894_s2 + $0x168] sm:$0xff]  ;;  %v2507_v57 = vmul.f32 %v5380_v44, %v2155_v28 }
 0xe34   :  { %3593 = vmatmul.msk.f32.gmra.mxu0 %vm642_vm4, %v3068_v12  ;;  %3188 = vmatpush.msrb.mxu1 %v3149_v60  ;;  %v2375_v60 = vmul.f32 64.0, %v5116_v31 }
 0xe35   :  { %v2525_v12 = vsel %vm135_vm1, %v2507_v57, 0.0 }
 0xe36   :  { %3189 = vmatpush.msrb.mxu1 %v3148_v2 }
 0xe37   :  { %2517 = vadd.xlane.f32.xlu0 %v2516_v18  ;;  %v2156_v18 = vmul.f32 %v5370_v23, %v5132_v27 }
 0xe38   :  { %3190 = vmatpush.msrb.mxu1 %v3147_v47 }
 0xe39   :  { %v2508_v40 = vmul.f32 %v5380_v44, %v2156_v18 }
 0xe3c   :  { %3594 = vmatmul.msk.f32.gmra.mxu0 %vm642_vm4, %v3069_v33  ;;  %v2528_v33 = vsel %vm135_vm1, %v2508_v40, 0.0 }
 0xe3f   :  { %2520 = vadd.xlane.f32.xlu0 %v2519_v26 }
 0xe43   :  { %v3054_v30 = vpop.permute.xlu0 %3053 }
 0xe44   :  { %v3070_v9 = vsel %vm135_vm1, %v5322_v3, %v3054_v30  ;;  %v2283_v17 = vpop.trf.xlu1  ;;  %v3146_v3 = vld [vmem:[%s5894_s2 + $0x150] sm:$0xff]  ;;  %v2376_v30 = vmul.f32 64.0, %v5122_v16  ;;  %v2157_v16 = vmul.f32 %v5370_v23, %v5139_v42 }
 0xe45   :  { %3595 = vmatmul.msk.f32.gmra.mxu0 %vm642_vm4, %v3070_v9  ;;  %3560 = vmatmul.msk.f32.vlgmr.msra.gmra.mxu3 %vm642_vm4, %v2283_v17 }
 0xe46   :  { %3191 = vmatpush.msrb.mxu1 %v3146_v3 }
 0xe47   :  { %2388 = vrot.lane.b32.xlu2 %v2372_v48, %s3893_s6  ;;  %v2377_v48 = vmul.f32 64.0, %v5127_v7  ;;  %v2379_v7 = vmul.f32 64.0, %v5139_v42 }
 0xe4c   :  { %v2284_v62 = vpop.trf.xlu1 }
 0xe4d   :  { %3561 = vmatmul.msk.f32.gmra.mxu3 %vm642_vm4, %v2284_v62 }
 0xe53   :  { %2390 = vrot.lane.b32.xlu0 %v2373_v39, %s3893_s6  ;;  %v2378_v39 = vmul.f32 64.0, %v5132_v27 }
 0xe54   :  { %v2285_v46 = vpop.trf.xlu1 }
 0xe55   :  { %3562 = vmatmul.msk.f32.gmra.mxu3 %vm642_vm4, %v2285_v46  ;;  %v2509_v46 = vmul.f32 %v5380_v44, %v2157_v16 }
 0xe5c   :  { %v2286_v25 = vpop.trf.xlu1 }
 0xe5d   :  { %3563 = vmatmul.msk.f32.gmra.mxu3 %vm642_vm4, %v2286_v25  ;;  %v2531_v25 = vsel %vm135_vm1, %v2509_v46, 0.0 }
 0xe70   :  { %2523 = vadd.xlane.f32.xlu2 %v2522_v49 }
 0xe71   :  { %v3122_v1 = vpop.f32.mrf.mxu0 }
 0xe72   :  { %v3123_v45 = vadd.f32 %v3712_v32, %v3122_v1 }
 0xe74   :  { %3596 = vmatmul.msk.f32.vlgmr.msrb.gmra.mxu1 %vm135_vm1, %v3123_v45 }
 0xe7d   :  { %2526 = vadd.xlane.f32.xlu0 %v2525_v12 }
 0xe85   :  { %2529 = vadd.xlane.f32.xlu0 %v2528_v33 }
 0xe88   :  { %2394 = vrot.lane.b32.xlu2 %v2375_v60, %s3893_s6 }
 0xe91   :  { %v3125_v2 = vpop.f32.mrf.mxu0 }
 0xe92   :  { %v3126_v26 = vadd.f32 %v3712_v32, %v3125_v2 }
 0xe94   :  { %3597 = vmatmul.msk.f32.gmra.mxu1 %vm135_vm1, %v3126_v26 }
 0xe99   :  { %2396 = vrot.lane.b32.xlu0 %v2376_v30, %s3893_s6  ;;  %v3128_v9 = vpop.f32.mrf.mxu0 }
 0xe9a   :  { %v3129_v17 = vadd.f32 %v3712_v32, %v3128_v9 }
 0xe9c   :  { %3598 = vmatmul.msk.f32.gmra.mxu1 %vm135_vm1, %v3129_v17 }
 0xea1   :  { %2398 = vrot.lane.b32.xlu0 %v2377_v48, %s3893_s6  ;;  %v3131_v62 = vpop.f32.mrf.mxu0 }
 0xea2   :  { %v3132_v31 = vadd.f32 %v3712_v32, %v3131_v62  ;;  %v2515_v40 = vpop.xlane.xlu2 %2514 }
 0xea4   :  { %3599 = vmatmul.msk.f32.gmra.mxu1 %vm135_vm1, %v3132_v31 }
 0xea9   :  { %2400 = vrot.lane.b32.xlu0 %v2378_v39, %s3893_s6  ;;  %v3134_v47 = vpop.f32.mrf.mxu0 }
 0xeaa   :  { %v3135_v3 = vadd.f32 %v3712_v32, %v3134_v47 }
 0xeac   :  { %3600 = vmatmul.msk.f32.gmra.mxu1 %vm135_vm1, %v3135_v3 }
 0xeb1   :  { %2532 = vadd.xlane.f32.xlu2 %v2531_v25  ;;  %2402 = vrot.lane.b32.xlu0 %v2379_v7, %s3893_s6  ;;  %v3137_v56 = vpop.f32.mrf.mxu0 }
 0xeb2   :  { %v3138_v27 = vadd.f32 %v3712_v32, %v3137_v56 }
 0xeb4   :  { %3601 = vmatmul.msk.f32.gmra.mxu1 %vm135_vm1, %v3138_v27 }
 0xeb9   :  { %v3140_v49 = vpop.f32.mrf.mxu0 }
 0xeba   :  { %v3141_v1 = vadd.f32 %v3712_v32, %v3140_v49 }
 0xebc   :  { %3602 = vmatmul.msk.f32.gmra.mxu1 %vm135_vm1, %v3141_v1 }
 0xec2   :  { %v3143_v23 = vpop.f32.mrf.mxu0 }
 0xec3   :  { %v3144_v45 = vadd.f32 %v3712_v32, %v3143_v23  ;;  %v2512_v32 = vpop.xlane.xlu0 %2511 }
 0xec5   :  { %3603 = vmatmul.msk.f32.gmra.mxu1 %vm135_vm1, %v3144_v45 }
 0xec8   :  { %v2360_v44 = vpop.f32.mrf.mxu3 }
 0xecb   :  { %v2518_v33 = vpop.xlane.xlu0 %2517 }
 0xecc   :  { %v5489_v2 = vadd.f32 64.0, %v2518_v33 }
 0xece   :  { %vm2577_vm8 = vweird.f32 %v5489_v2 }
 0xed0   :  { %v2363_v57 = vpop.f32.mrf.mxu3 }
 0xed8   :  { %v2366_v42 = vpop.f32.mrf.mxu3 }
 0xee0   :  { %v2369_v12 = vpop.f32.mrf.mxu3 }
 0xee1   :  { %2448 = vmatpush.msrb.mxu3 %v2369_v12 }
 0xee3   :  { %2449 = vmatpush.msrb.mxu3 %v2366_v42 }
 0xee5   :  { %2450 = vmatpush.msrb.mxu3 %v2363_v57 }
 0xee7   :  { %2451 = vmatpush.msrb.mxu3 %v2360_v44 }
 0xee8   :  { %3564 = vmatmul.msk.f32.vlgmr.msrb.gmra.mxu3 %vm135_vm1, %v5378_v14  ;;  %v2534_v14 = vadd.f32 64.0, %v2512_v32 }
 0xeea   :  { %3810 = vrcp.f32 %v2534_v14  ;;  %v2553_v31 = vand.u32 2147483648, %v2534_v14  ;;  %vm2547_vm13 = vweird.f32 %v2534_v14  ;;  %v2551_v47 = vand.u32 2147483647, %v2534_v14 }
 0xeec   :  { %v2554_v56 = vor.u32 1.1754944e-38, %v2553_v31  ;;  %vm2552_vm15 = vcmp.eq.f32.partialorder %v2551_v47, 8.507059e+37  ;;  %v2583_v47 = vand.u32 2147483648, %v5489_v2 }
 0xef0   :  { %3565 = vmatmul.msk.f32.gmra.mxu3 %vm135_vm1, %v5374_v59  ;;  %v2535_v59 = vadd.f32 64.0, %v2515_v40  ;;  %v3811_v60 = vpop.eup %3810  ;;  %v2678_v40 = vmul.f32 0.5, %v2026_v34 }
 0xef1   :  { %vm2548_vm3 = vweird.f32 %v3811_v60  ;;  %v5506_v33 = vpop.f32.mrf.mxu1 }
 0xef2   :  { %3812 = vrcp.f32 %v2535_v59  ;;  %vm2549_vm14 = vmor %vm2547_vm13, %vm2548_vm3  ;;  %v2568_v42 = vand.u32 2147483648, %v2535_v59  ;;  %vm2562_vm2 = vweird.f32 %v2535_v59 }
 0xef3   :  { %3814 = vrcp.f32 %v5489_v2 }
 0xef8   :  { %3566 = vmatmul.msk.f32.gmra.mxu3 %vm135_vm1, %v5394_v58  ;;  %v2543_v58 = vmul.f32 %v3811_v60, %v2534_v14  ;;  %v3813_v26 = vpop.eup %3812  ;;  %v2566_v14 = vand.u32 2147483647, %v2535_v59 }
 0xef9   :  { %v5494_v62 = vpop.eup %3814  ;;  %vm2563_vm0 = vweird.f32 %v3813_v26 }
 0xefa   :  { %vm2564_vm5 = vmor %vm2562_vm2, %vm2563_vm0  ;;  %vm2567_vm6 = vcmp.eq.f32.partialorder %v2566_v14, 8.507059e+37  ;;  %vm2578_vm7 = vweird.f32 %v5494_v62 }
 0xefb   :  { %vm5527_vm9 = vmor %vm2577_vm8, %vm2578_vm7 }
 0xf00   :  { %3567 = vmatmul.msk.f32.gmra.mxu3 %vm135_vm1, %v5405_v8  ;;  %v2544_v8 = vsub.f32 1.0, %v2543_v58 }
 0xf02   :  { %v2545_v30 = vmul.f32 %v3811_v60, %v2544_v8 }
 0xf04   :  { %v2546_v48 = vadd.f32 %v3811_v60, %v2545_v30 }
 0xf06   :  { %v2550_v46 = vsel %vm2549_vm14, %v3811_v60, %v2546_v48 }
 0xf07   :  { %v2555_v1 = vsel %vm2552_vm15, %v2554_v56, %v2550_v46 }
 0xf08   :  { %3568 = vmatmul.msk.f32.gmra.mxu3 %vm135_vm1, %v5438_v13  ;;  %v2521_v13 = vpop.xlane.xlu0 %2520 }
 0xf09   :  { %v5492_v9 = vadd.f32 64.0, %v2521_v13 }
 0xf0b   :  { %3816 = vrcp.f32 %v5492_v9  ;;  %vm2592_vm12 = vweird.f32 %v5492_v9 }
 0xf10   :  { %3569 = vmatmul.msk.f32.gmra.mxu3 %vm135_vm1, %v2155_v28  ;;  %v2558_v28 = vmul.f32 %v3813_v26, %v2535_v59  ;;  %v2391_v39 = vpop.permute.xlu0 %2390 }
 0xf11   :  { %v5501_v57 = vpop.eup %3816  ;;  %v3196_v46 = vpop.f32.mrf.mxu1 }
 0xf12   :  { %v2559_v17 = vsub.f32 1.0, %v2558_v28  ;;  %v2588_v60 = vmul.f32 %v5501_v57, %v5492_v9  ;;  %vm2593_vm11 = vweird.f32 %v5501_v57 }
 0xf13   :  { %vm5560_vm3 = vmor %vm2592_vm12, %vm2593_vm11 }
 0xf14   :  { %v2560_v7 = vmul.f32 %v3813_v26, %v2559_v17  ;;  %v2589_v17 = vsub.f32 1.0, %v2588_v60 }
 0xf16   :  { %v2561_v44 = vadd.f32 %v3813_v26, %v2560_v7 }
 0xf18   :  { %3570 = vmatmul.msk.f32.gmra.mxu3 %vm135_vm1, %v2156_v18  ;;  %v2389_v18 = vpop.permute.xlu2 %2388  ;;  %v2527_v12 = vpop.xlane.xlu0 %2526  ;;  %v2565_v58 = vsel %vm2564_vm5, %v3813_v26, %v2561_v44  ;;  %v2584_v44 = vor.u32 1.1754944e-38, %v2583_v47 }
 0xf19   :  { %v5515_v34 = vadd.f32 64.0, %v2527_v12 }
 0xf20   :  { %3571 = vmatmul.msk.f32.gmra.mxu3 %vm135_vm1, %v2157_v16  ;;  %v2573_v16 = vmul.f32 %v5494_v62, %v5489_v2  ;;  %v2524_v3 = vpop.xlane.xlu2 %2523 }
 0xf21   :  { %v5499_v49 = vadd.f32 64.0, %v2524_v3  ;;  %v2679_v3 = vmul.f32 0.5, %v2027_v37 }
 0xf22   :  { %v2574_v23 = vsub.f32 1.0, %v2573_v16 }
 0xf23   :  { %3818 = vrcp.f32 %v5499_v49  ;;  %vm2607_vm15 = vweird.f32 %v5499_v49 }
 0xf24   :  { %v2575_v13 = vmul.f32 %v5494_v62, %v2574_v23  ;;  %3820 = vrcp.f32 %v5515_v34  ;;  %v2393_v23 = vpop.permute.xlu1 %2392 }
 0xf26   :  { %v2576_v31 = vadd.f32 %v5494_v62, %v2575_v13 }
 0xf28   :  { %v2395_v56 = vpop.permute.xlu2 %2394  ;;  %v2580_v41 = vsel %vm5527_vm9, %v5494_v62, %v2576_v31 }
 0xf29   :  { %v5519_v26 = vpop.eup %3818 }
 0xf2a   :  { %v5551_v13 = vpop.eup %3820  ;;  %vm2608_vm14 = vweird.f32 %v5519_v26 }
 0xf2b   :  { %vm2609_vm0 = vmor %vm2607_vm15, %vm2608_vm14  ;;  %vm2623_vm5 = vweird.f32 %v5551_v13 }
 0xf6b   :  { %v2453_v25 = vpop.f32.mrf.mxu3 }
 0xf6c   :  { %v2454_v27 = vadd.f32 %v2453_v25, %v2389_v18  ;;  %v2569_v18 = vor.u32 1.1754944e-38, %v2568_v42  ;;  %v2603_v25 = vmul.f32 %v5519_v26, %v5499_v49 }
 0xf6e   :  { %v2556_v45 = vmul.f32 %v2555_v1, %v2454_v27  ;;  %v2570_v59 = vsel %vm2567_vm6, %v2569_v18, %v2565_v58  ;;  %v5536_v27 = vld [vmem:[%s5896_s3 + $0x18] ss:$0 sm:$0xff]  ;;  %v2590_v1 = vmul.f32 %v5501_v57, %v2589_v17  ;;  %v2604_v60 = vsub.f32 1.0, %v2603_v25 }
 0xf6f   :  { %v3197_v42 = vadd.f32 %v5536_v27, %v3196_v46  ;;  %v2680_v18 = vmul.f32 0.5, %v2028_v55  ;;  %v2533_v55 = vpop.xlane.xlu2 %2532  ;;  %vm2622_vm6 = vweird.f32 %v5515_v34 }
 0xf70   :  { %v2670_v32 = vmul.f32 0.5, %v2556_v45  ;;  %v2591_v58 = vadd.f32 %v5501_v57, %v2590_v1  ;;  %v2605_v31 = vmul.f32 %v5519_v26, %v2604_v60  ;;  %v5580_v25 = vadd.f32 64.0, %v2533_v55  ;;  %vm2624_vm7 = vmor %vm2622_vm6, %vm2623_vm5 }
 0xf72   :  { %v5510_v8 = vadd.f32 %v2678_v40, %v2670_v32 }
 0xf73   :  { %v2456_v28 = vpop.f32.mrf.mxu3 }
 0xf74   :  { %v2457_v30 = vadd.f32 %v2456_v28, %v2391_v39  ;;  %v2696_v36 = vsel %vm135_vm1, %v5510_v8, 0.0  ;;  %v2581_v39 = vand.u32 2147483647, %v5489_v2  ;;  %v2530_v2 = vpop.xlane.xlu0 %2529  ;;  %v2598_v28 = vand.u32 2147483648, %v5492_v9 }
 0xf75   :  { %2697 = vadd.xlane.f32.xlu1 %v2696_v36  ;;  %v5547_v14 = vadd.f32 64.0, %v2530_v2 }
 0xf76   :  { %v2571_v48 = vmul.f32 %v2570_v59, %v2457_v30  ;;  %vm2582_vm10 = vcmp.eq.f32.partialorder %v2581_v39, 8.507059e+37  ;;  %v3218_v30 = vadd.f32 %v3197_v42, %v5200_v24  ;;  %v2596_v59 = vand.u32 2147483647, %v5492_v9 }
 0xf77   :  { %v2585_v40 = vsel %vm2582_vm10, %v2584_v44, %v2580_v41  ;;  %3822 = vrcp.f32 %v5547_v14  ;;  %v2595_v24 = vsel %vm5560_vm3, %v5501_v57, %v2591_v58  ;;  %v5585_v57 = vld [vmem:[%s5896_s3 + $0x1a] ss:$0 sm:$0xff]  ;;  %v5910_v44 = vmax.f32 %v5050_v19, 0.0 }
 0xf78   :  { %v2671_v16 = vmul.f32 0.5, %v2571_v48  ;;  %v2618_v48 = vmul.f32 %v5551_v13, %v5515_v34  ;;  %v3228_v39 = vmul.f32 %v5569_v11, %v3218_v30  ;;  %vm2597_vm13 = vcmp.eq.f32.partialorder %v2596_v59, 8.507059e+37 }
 0xf79   :  { %v2681_v42 = vmul.f32 0.5, %v5910_v44  ;;  %3824 = vrcp.f32 %v5580_v25  ;;  %vm2637_vm10 = vweird.f32 %v5547_v14 }
 0xf7a   :  { %v5541_v37 = vadd.f32 %v2679_v3, %v2671_v16  ;;  %v2599_v16 = vor.u32 1.1754944e-38, %v2598_v28  ;;  %v2619_v41 = vsub.f32 1.0, %v2618_v48 }
 0xf7b   :  { %v2459_v45 = vpop.f32.mrf.mxu3 }
 0xf7c   :  { %v2460_v12 = vadd.f32 %v2459_v45, %v2393_v23  ;;  %v2699_v32 = vsel %vm135_vm1, %v5541_v37, 0.0  ;;  %v2397_v7 = vpop.permute.xlu0 %2396  ;;  %v2600_v2 = vsel %vm2597_vm13, %v2599_v16, %v2595_v24  ;;  %v2606_v23 = vadd.f32 %v5519_v26, %v2605_v31 }
 0xf7d   :  { %2700 = vadd.xlane.f32.xlu0 %v2699_v32  ;;  %v2613_v45 = vand.u32 2147483648, %v5499_v49  ;;  %v2620_v19 = vmul.f32 %v5551_v13, %v2619_v41  ;;  %v2628_v31 = vand.u32 2147483648, %v5515_v34  ;;  %v2626_v16 = vand.u32 2147483647, %v5515_v34 }
 0xf7e   :  { %v2586_v62 = vmul.f32 %v2585_v40, %v2460_v12  ;;  %v3238_v12 = vadd.f32 %v5585_v57, %v3228_v39  ;;  %v2611_v40 = vand.u32 2147483647, %v5499_v49  ;;  %v5911_v39 = vmax.f32 %v5059_v22, 0.0 }
 0xf7f   :  { %vm2627_vm8 = vcmp.eq.f32.partialorder %v2626_v16, 8.507059e+37  ;;  %vm2652_vm13 = vweird.f32 %v5580_v25 }
 0xf80   :  { %v2672_v36 = vmul.f32 0.5, %v2586_v62  ;;  %v2610_v62 = vsel %vm2609_vm0, %v5519_v26, %v2606_v23  ;;  %v3246_v30 = vmax.f32 %v3238_v12, 0.0  ;;  %vm2612_vm2 = vcmp.eq.f32.partialorder %v2611_v40, 8.507059e+37 }
 0xf81   :  { %v2621_v26 = vadd.f32 %v5551_v13, %v2620_v19  ;;  %v2629_v23 = vor.u32 1.1754944e-38, %v2628_v31  ;;  %v2641_v40 = vand.u32 2147483647, %v5547_v14  ;;  %v5913_v31 = vmax.f32 %v5083_v50, 0.0 }
 0xf82   :  { %v5574_v9 = vadd.f32 %v2680_v18, %v2672_v36  ;;  %v2614_v18 = vor.u32 1.1754944e-38, %v2613_v45  ;;  %v5914_v50 = vmax.f32 %v5097_v51, 0.0 }
 0xf83   :  { %v2462_v47 = vpop.f32.mrf.mxu3  ;;  %vm2642_vm12 = vcmp.eq.f32.partialorder %v2641_v40, 8.507059e+37 }
 0xf84   :  { %v2463_v3 = vadd.f32 %v2462_v47, %v2395_v56  ;;  %v2702_v46 = vsel %vm135_vm1, %v5574_v9, 0.0  ;;  %v5589_v56 = vpop.eup %3822  ;;  %v2615_v59 = vsel %vm2612_vm2, %v2614_v18, %v2610_v62  ;;  %v2399_v24 = vpop.permute.xlu0 %2398 }
 0xf85   :  { %2703 = vadd.xlane.f32.xlu2 %v2702_v46  ;;  %v2633_v60 = vmul.f32 %v5589_v56, %v5547_v14  ;;  %v3825_v55 = vpop.eup %3824  ;;  %vm2638_vm9 = vweird.f32 %v5589_v56 }
 0xf86   :  { %v2601_v1 = vmul.f32 %v2600_v2, %v2463_v3  ;;  %v2682_v3 = vmul.f32 0.5, %v5911_v39  ;;  %v2648_v46 = vmul.f32 %v3825_v55, %v5580_v25  ;;  %vm2639_vm11 = vmor %vm2637_vm10, %vm2638_vm9  ;;  %vm2653_vm3 = vweird.f32 %v3825_v55 }
 0xf87   :  { %v2634_v17 = vsub.f32 1.0, %v2633_v60  ;;  %v5912_v60 = vmax.f32 %v5070_v0, 0.0  ;;  %v2658_v0 = vand.u32 2147483648, %v5580_v25  ;;  %vm2654_vm14 = vmor %vm2652_vm13, %vm2653_vm3 }
 0xf88   :  { %v2673_v32 = vmul.f32 0.5, %v2601_v1  ;;  %v2649_v22 = vsub.f32 1.0, %v2648_v46 }
 0xf89   :  { %v2635_v41 = vmul.f32 %v5589_v56, %v2634_v17  ;;  %v2683_v62 = vmul.f32 0.5, %v5912_v60 }
 0xf8a   :  { %v5601_v58 = vadd.f32 %v2681_v42, %v2673_v32 }
 0xf8b   :  { %v2465_v28 = vpop.f32.mrf.mxu3  ;;  %v2636_v12 = vadd.f32 %v5589_v56, %v2635_v41 }
 0xf8c   :  { %v2466_v36 = vadd.f32 %v2465_v28, %v2397_v7  ;;  %v2705_v49 = vsel %vm135_vm1, %v5601_v58, 0.0  ;;  %v2625_v7 = vsel %vm2624_vm7, %v5551_v13, %v2621_v26  ;;  %v2643_v13 = vand.u32 2147483648, %v5547_v14  ;;  %v2401_v19 = vpop.permute.xlu0 %2400 }
 0xf8d   :  { %2706 = vadd.xlane.f32.xlu2 %v2705_v49  ;;  %v2630_v34 = vsel %vm2627_vm8, %v2629_v23, %v2625_v7  ;;  %v2640_v28 = vsel %vm2639_vm11, %v5589_v56, %v2636_v12  ;;  %v2656_v56 = vand.u32 2147483647, %v5580_v25  ;;  %v2659_v7 = vor.u32 1.1754944e-38, %v2658_v0 }
 0xf8e   :  { %v2616_v48 = vmul.f32 %v2615_v59, %v2466_v36  ;;  %3263 = vrot.lane.b32.xlu1 %v3246_v30, %s3892_s27  ;;  %v2650_v30 = vmul.f32 %v3825_v55, %v2649_v22  ;;  %v2644_v49 = vor.u32 1.1754944e-38, %v2643_v13  ;;  %v3194_v12 = vadd.f32 %v5536_v27, %v5506_v33 }
 0xf8f   :  { %vm2657_vm15 = vcmp.eq.f32.partialorder %v2656_v56, 8.507059e+37 }
 0xf90   :  { %v2674_v47 = vmul.f32 0.5, %v2616_v48  ;;  %v2645_v48 = vsel %vm2642_vm12, %v2644_v49, %v2640_v28  ;;  %v2651_v26 = vadd.f32 %v3825_v55, %v2650_v30 }
 0xf92   :  { %v5616_v2 = vadd.f32 %v2682_v3, %v2674_v47  ;;  %v2684_v47 = vmul.f32 0.5, %v5913_v31  ;;  %v2655_v16 = vsel %vm2654_vm14, %v3825_v55, %v2651_v26 }
 0xf93   :  { %v2468_v1 = vpop.f32.mrf.mxu3  ;;  %v2660_v23 = vsel %vm2657_vm15, %v2659_v7, %v2655_v16 }
 0xf94   :  { %v2469_v45 = vadd.f32 %v2468_v1, %v2399_v24  ;;  %v2708_v44 = vsel %vm135_vm1, %v5616_v2, 0.0  ;;  %v2403_v3 = vpop.permute.xlu0 %2402 }
 0xf95   :  { %2709 = vadd.xlane.f32.xlu2 %v2708_v44  ;;  %v3199_v44 = vpop.f32.mrf.mxu1 }
 0xf96   :  { %v2631_v42 = vmul.f32 %v2630_v34, %v2469_v45  ;;  %v2685_v34 = vmul.f32 0.5, %v5914_v50  ;;  %v3200_v55 = vadd.f32 %v5536_v27, %v3199_v44 }
 0xf98   :  { %v2675_v32 = vmul.f32 0.5, %v2631_v42  ;;  %v3219_v13 = vadd.f32 %v3200_v55, %v5197_v29 }
 0xf9a   :  { %v5629_v18 = vadd.f32 %v2683_v62, %v2675_v32  ;;  %v3217_v32 = vadd.f32 %v3194_v12, %v5203_v35  ;;  %v3229_v40 = vmul.f32 %v5569_v11, %v3219_v13 }
 0xf9b   :  { %v2471_v36 = vpop.f32.mrf.mxu3 }
 0xf9c   :  { %v2472_v59 = vadd.f32 %v2471_v36, %v2401_v19  ;;  %v2711_v17 = vsel %vm135_vm1, %v5629_v18, 0.0  ;;  %v3227_v51 = vmul.f32 %v5569_v11, %v3217_v32  ;;  %v3239_v60 = vadd.f32 %v5585_v57, %v3229_v40 }
 0xf9d   :  { %2712 = vadd.xlane.f32.xlu2 %v2711_v17 }
 0xf9e   :  { %v2646_v14 = vmul.f32 %v2645_v48, %v2472_v59  ;;  %v3237_v62 = vadd.f32 %v5585_v57, %v3227_v51  ;;  %v3247_v19 = vmax.f32 %v3239_v60, 0.0 }
 0xfa0   :  { %v2676_v24 = vmul.f32 0.5, %v2646_v14  ;;  %v3245_v28 = vmax.f32 %v3237_v62, 0.0  ;;  %v3202_v14 = vpop.f32.mrf.mxu1 }
 0xfa1   :  { %v3203_v44 = vadd.f32 %v5536_v27, %v3202_v14 }
 0xfa2   :  { %v5638_v39 = vadd.f32 %v2684_v47, %v2676_v24 }
 0xfa3   :  { %v2474_v46 = vpop.f32.mrf.mxu3 }
 0xfa4   :  { %v2475_v41 = vadd.f32 %v2474_v46, %v2403_v3  ;;  %v2714_v1 = vsel %vm135_vm1, %v5638_v39, 0.0 }
 0xfa5   :  { %2715 = vadd.xlane.f32.xlu2 %v2714_v1 }
 0xfa6   :  { %v2661_v45 = vmul.f32 %v2660_v23, %v2475_v41 }
 0xfa8   :  { %v2677_v25 = vmul.f32 0.5, %v2661_v45  ;;  %v3205_v47 = vpop.f32.mrf.mxu1 }
 0xfaa   :  { %v5644_v22 = vadd.f32 %v2685_v34, %v2677_v25  ;;  %v3220_v34 = vadd.f32 %v3203_v44, %v5194_v4  ;;  %v3294_v44 = vld [vmem:[%s5894_s2 + $0x178] sm:$0xff] }
 0xfac   :  { %v2717_v42 = vsel %vm135_vm1, %v5644_v22, 0.0  ;;  %v3230_v12 = vmul.f32 %v5569_v11, %v3220_v34 }
 0xfad   :  { %2718 = vadd.xlane.f32.xlu0 %v2717_v42 }
 0xfae   :  { %v3240_v51 = vadd.f32 %v5585_v57, %v3230_v12 }
 0xfb0   :  { %v3208_v1 = vpop.f32.mrf.mxu1  ;;  %v3248_v62 = vmax.f32 %v3240_v51, 0.0 }
 0xfb8   :  { %v3211_v42 = vpop.f32.mrf.mxu1 }
 0xfbd   :  { %3265 = vrot.lane.b32.xlu2 %v3247_v19, %s3892_s27 }
 0xfc0   :  { %v3214_v19 = vpop.f32.mrf.mxu1 }
 0xfc1   :  { %3261 = vrot.lane.b32.xlu0 %v3245_v28, %s3892_s27 }
 0xfe8   :  { %v2698_v30 = vpop.xlane.xlu1 %2697 }
 0xfe9   :  { %v2720_v33 = vmul.f32 %v2698_v30, %v3988_v38 }
 0xfeb   :  { %v5661_v29 = vsub.f32 %v5510_v8, %v2720_v33  ;;  %v3215_v33 = vadd.f32 %v5536_v27, %v3214_v19 }
 0xfed   :  { %v2736_v35 = vmul.f32 %v5661_v29, %v5661_v29 }
 0xfef   :  { %v2744_v36 = vsel %vm135_vm1, %v2736_v35, 0.0 }
 0xff0   :  { %v2701_v49 = vpop.xlane.xlu0 %2700  ;;  %2745 = vadd.xlane.f32.xlu1 %v2744_v36  ;;  %v3224_v36 = vadd.f32 %v3215_v33, %v5184_v52 }
 0xff1   :  { %v2721_v59 = vmul.f32 %v2701_v49, %v3988_v38 }
 0xff3   :  { %v5668_v17 = vsub.f32 %v5541_v37, %v2721_v59 }
 0xff5   :  { %v2737_v48 = vmul.f32 %v5668_v17, %v5668_v17 }
 0xff7   :  { %v2747_v26 = vsel %vm135_vm1, %v2737_v48, 0.0  ;;  %v3234_v48 = vmul.f32 %v5569_v11, %v3224_v36 }
 0xff8   :  { %v2704_v8 = vpop.xlane.xlu2 %2703  ;;  %2748 = vadd.xlane.f32.xlu1 %v2747_v26 }
 0xff9   :  { %v2722_v0 = vmul.f32 %v2704_v8, %v3988_v38  ;;  %v3212_v8 = vadd.f32 %v5536_v27, %v3211_v42 }
 0xffb   :  { %v5675_v24 = vsub.f32 %v5574_v9, %v2722_v0 }
 0xffd   :  { %v2738_v56 = vmul.f32 %v5675_v24, %v5675_v24 }
 0xfff   :  { %v2750_v31 = vsel %vm135_vm1, %v2738_v56, 0.0  ;;  %v3223_v56 = vadd.f32 %v3212_v8, %v5182_v43 }
0x1000   :  { %2751 = vadd.xlane.f32.xlu2 %v2750_v31  ;;  %v2707_v37 = vpop.xlane.xlu2 %2706 }
0x1001   :  { %v2723_v16 = vmul.f32 %v2707_v37, %v3988_v38 }
0x1003   :  { %v5682_v3 = vsub.f32 %v5601_v58, %v2723_v16 }
0x1005   :  { %v2739_v46 = vmul.f32 %v5682_v3, %v5682_v3 }
0x1007   :  { %v2753_v7 = vsel %vm135_vm1, %v2739_v46, 0.0 }
0x1008   :  { %v2710_v9 = vpop.xlane.xlu2 %2709  ;;  %2754 = vadd.xlane.f32.xlu1 %v2753_v7 }
0x1009   :  { %v2724_v41 = vmul.f32 %v2710_v9, %v3988_v38  ;;  %v5749_v9 = vpop.permute.xlu1 %3263 }
0x100b   :  { %v5689_v23 = vsub.f32 %v5616_v2, %v2724_v41  ;;  %v3297_v41 = vld [vmem:[%s5894_s2 + $0x190] sm:$0xff] }
0x100d   :  { %v2740_v45 = vmul.f32 %v5689_v23, %v5689_v23 }
0x100f   :  { %v2756_v58 = vsel %vm135_vm1, %v2740_v45, 0.0  ;;  %v3295_v45 = vld [vmem:[%s5894_s2 + $0x180] sm:$0xff] }
0x1010   :  { %2757 = vadd.xlane.f32.xlu2 %v2756_v58  ;;  %v2713_v25 = vpop.xlane.xlu2 %2712 }
0x1011   :  { %v2725_v50 = vmul.f32 %v2713_v25, %v3988_v38 }
0x1013   :  { %v5698_v55 = vsub.f32 %v5629_v18, %v2725_v50  ;;  %v3206_v18 = vadd.f32 %v5536_v27, %v3205_v47  ;;  %v3293_v50 = vld [vmem:[%s5894_s2 + $0x170] sm:$0xff] }
0x1015   :  { %v2741_v2 = vmul.f32 %v5698_v55, %v5698_v55  ;;  %v3221_v30 = vadd.f32 %v3206_v18, %v5188_v21  ;;  %v3244_v21 = vadd.f32 %v5585_v57, %v3234_v48  ;;  %v5780_v48 = vld [vmem:[%s5896_s3 + $0x14] ss:$0 sm:$0xff] }
0x1017   :  { %v2759_v13 = vsel %vm135_vm1, %v2741_v2, 0.0  ;;  %v3231_v35 = vmul.f32 %v5569_v11, %v3221_v30  ;;  %v3252_v52 = vmax.f32 %v3244_v21, 0.0 }
0x1018   :  { %2760 = vadd.xlane.f32.xlu2 %v2759_v13  ;;  %v2716_v32 = vpop.xlane.xlu2 %2715 }
0x1019   :  { %v2726_v40 = vmul.f32 %v2716_v32, %v3988_v38  ;;  %v3241_v49 = vadd.f32 %v5585_v57, %v3231_v35 }
0x101b   :  { %v5707_v60 = vsub.f32 %v5638_v39, %v2726_v40  ;;  %v3209_v39 = vadd.f32 %v5536_v27, %v3208_v1  ;;  %v3249_v14 = vmax.f32 %v3241_v49, 0.0  ;;  %v3296_v1 = vld [vmem:[%s5894_s2 + $0x188] sm:$0xff] }
0x101d   :  { %v2742_v4 = vmul.f32 %v5707_v60, %v5707_v60  ;;  %v3222_v59 = vadd.f32 %v3209_v39, %v5190_v20  ;;  %v3233_v20 = vmul.f32 %v5569_v11, %v3223_v56  ;;  %v5774_v39 = vld [vmem:[%s5896_s3 + $0x13] ss:$0 sm:$0xff] }
0x101f   :  { %v2762_v28 = vsel %vm135_vm1, %v2742_v4, 0.0  ;;  %v3232_v26 = vmul.f32 %v5569_v11, %v3222_v59  ;;  %v3243_v37 = vadd.f32 %v5585_v57, %v3233_v20  ;;  %v3300_v11 = vld [vmem:[%s5894_s2 + $0x1a8] sm:$0xff] }
0x1020   :  { %2763 = vadd.xlane.f32.xlu0 %v2762_v28  ;;  %v2719_v47 = vpop.xlane.xlu0 %2718  ;;  %3335 = vmatpush.msra.mxu3 %v3300_v11  ;;  %v5767_v42 = vpop.permute.xlu2 %3265 }
0x1021   :  { %3267 = vrot.lane.b32.xlu1 %v3248_v62, %s3892_s27  ;;  %v3242_v0 = vadd.f32 %v5585_v57, %v3232_v26  ;;  %v3251_v27 = vmax.f32 %v3243_v37, 0.0  ;;  %v2727_v16 = vmul.f32 %v2719_v47, %v3988_v38  ;;  %v3299_v57 = vld [vmem:[%s5894_s2 + $0x1a0] sm:$0xff] }
0x1022   :  { %3336 = vmatpush.msra.mxu3 %v3299_v57 }
0x1023   :  { %v3250_v31 = vmax.f32 %v3242_v0, 0.0  ;;  %v5735_v46 = vsub.f32 %v5644_v22, %v2727_v16  ;;  %v3298_v22 = vld [vmem:[%s5894_s2 + $0x198] sm:$0xff] }
0x1024   :  { %3337 = vmatpush.msra.mxu3 %v3298_v22 }
0x1025   :  { %v2743_v43 = vmul.f32 %v5735_v46, %v5735_v46 }
0x1026   :  { %3338 = vmatpush.msra.mxu3 %v3297_v41 }
0x1027   :  { %v2765_v7 = vsel %vm135_vm1, %v2743_v43, 0.0 }
0x1028   :  { %3339 = vmatpush.msra.mxu3 %v3296_v1 }
0x102a   :  { %3340 = vmatpush.msra.mxu3 %v3295_v45 }
0x102c   :  { %3341 = vmatpush.msra.mxu3 %v3294_v44 }
0x102e   :  { %3342 = vmatpush.msra.mxu3 %v3293_v50 }
0x1030   :  { %3269 = vrot.lane.b32.xlu2 %v3249_v14, %s3892_s27 }
0x1033   :  { %v3262_v47 = vpop.permute.xlu0 %3261 }
0x1034   :  { %3275 = vrot.lane.b32.xlu0 %v3252_v52, %s3892_s27 }
0x1038   :  { %3271 = vrot.lane.b32.xlu2 %v3250_v31, %s3892_s27 }
0x1040   :  { %3273 = vrot.lane.b32.xlu2 %v3251_v27, %s3892_s27 }
0x104b   :  { %2766 = vadd.xlane.f32.xlu1 %v2765_v7 }
0x1063   :  { %v2746_v58 = vpop.xlane.xlu1 %2745 }
0x1064   :  { %v2768_v25 = vmul.f32 %v2746_v58, %v3988_v38 }
0x1066   :  { %v2776_v34 = vadd.f32 1e-05, %v2768_v25 }
0x1068   :  { %3826 = vrsqrt.f32 %v2776_v34  ;;  %vm2790_vm2 = vweird.f32 %v2776_v34 }
0x106b   :  { %v2749_v2 = vpop.xlane.xlu1 %2748 }
0x106c   :  { %v2769_v12 = vmul.f32 %v2749_v2, %v3988_v38 }
0x106e   :  { %v3827_v13 = vpop.eup %3826  ;;  %v2777_v32 = vadd.f32 1e-05, %v2769_v12 }
0x106f   :  { %v2785_v40 = vmul.f32 %v3827_v13, %v2776_v34  ;;  %vm2791_vm0 = vweird.f32 %v3827_v13 }
0x1070   :  { %3828 = vrsqrt.f32 %v2777_v32  ;;  %vm2792_vm5 = vmor %vm2790_vm2, %vm2791_vm0  ;;  %vm2800_vm7 = vweird.f32 %v2777_v32 }
0x1071   :  { %v2786_v51 = vmul.f32 %v3827_v13, %v2785_v40 }
0x1073   :  { %v2787_v4 = vmul.f32 0.5, %v2786_v51  ;;  %v2752_v18 = vpop.xlane.xlu2 %2751 }
0x1074   :  { %v2770_v62 = vmul.f32 %v2752_v18, %v3988_v38 }
0x1075   :  { %v2788_v19 = vsub.f32 1.5, %v2787_v4 }
0x1076   :  { %v3829_v28 = vpop.eup %3828  ;;  %v2778_v30 = vadd.f32 1e-05, %v2770_v62 }
0x1077   :  { %v2789_v33 = vmul.f32 %v3827_v13, %v2788_v19  ;;  %v2795_v35 = vmul.f32 %v3829_v28, %v2777_v32  ;;  %vm2801_vm6 = vweird.f32 %v3829_v28 }
0x1078   :  { %3830 = vrsqrt.f32 %v2778_v30  ;;  %vm2802_vm8 = vmor %vm2800_vm7, %vm2801_vm6  ;;  %vm2810_vm10 = vweird.f32 %v2778_v30 }
0x1079   :  { %v2793_v36 = vsel %vm2792_vm5, %v3827_v13, %v2789_v33  ;;  %v2796_v49 = vmul.f32 %v3829_v28, %v2795_v35 }
0x107a   :  { %v2864_v59 = vmul.f32 %v2793_v36, %v5661_v29 }
0x107b   :  { %v2797_v14 = vmul.f32 0.5, %v2796_v49  ;;  %v2755_v26 = vpop.xlane.xlu1 %2754 }
0x107c   :  { %v2873_v8 = vmul.f32 %v5774_v39, %v2864_v59  ;;  %v2771_v21 = vmul.f32 %v2755_v26, %v3988_v38 }
0x107d   :  { %v2798_v0 = vsub.f32 1.5, %v2797_v14 }
0x107e   :  { %v3831_v56 = vpop.eup %3830  ;;  %v2779_v52 = vadd.f32 1e-05, %v2771_v21  ;;  %v2882_v31 = vadd.f32 %v5780_v48, %v2873_v8 }
0x107f   :  { %v2799_v20 = vmul.f32 %v3829_v28, %v2798_v0  ;;  %v2805_v29 = vmul.f32 %v3831_v56, %v2778_v30  ;;  %vm2811_vm9 = vweird.f32 %v3831_v56 }
0x1080   :  { %3832 = vrsqrt.f32 %v2779_v52  ;;  %v2890_v37 = vmax.f32 %v2882_v31, 0.0  ;;  %vm2812_vm11 = vmor %vm2810_vm10, %vm2811_vm9  ;;  %vm2820_vm3 = vweird.f32 %v2779_v52 }
0x1081   :  { %v2803_v27 = vsel %vm2802_vm8, %v3829_v28, %v2799_v20  ;;  %v2806_v16 = vmul.f32 %v3831_v56, %v2805_v29 }
0x1082   :  { %v2865_v43 = vmul.f32 %v2803_v27, %v5668_v17  ;;  %v3285_v7 = vsel %vm135_vm1, %v2890_v37, %v3262_v47 }
0x1083   :  { %v2807_v11 = vmul.f32 0.5, %v2806_v16  ;;  %v2758_v57 = vpop.xlane.xlu2 %2757  ;;  %3604 = vmatmul.msk.f32.vlgmr.msra.gmra.mxu3 %vm642_vm4, %v3285_v7 }
0x1084   :  { %v2772_v22 = vmul.f32 %v2758_v57, %v3988_v38  ;;  %v2874_v41 = vmul.f32 %v5774_v39, %v2865_v43 }
0x1085   :  { %v2808_v1 = vsub.f32 1.5, %v2807_v11 }
0x1086   :  { %v3833_v45 = vpop.eup %3832  ;;  %v2780_v44 = vadd.f32 1e-05, %v2772_v22  ;;  %v2883_v58 = vadd.f32 %v5780_v48, %v2874_v41 }
0x1087   :  { %v2809_v25 = vmul.f32 %v3831_v56, %v2808_v1  ;;  %v2815_v50 = vmul.f32 %v3833_v45, %v2779_v52  ;;  %vm2821_vm12 = vweird.f32 %v3833_v45 }
0x1088   :  { %3834 = vrsqrt.f32 %v2780_v44  ;;  %v2891_v17 = vmax.f32 %v2883_v58, 0.0  ;;  %vm2822_vm13 = vmor %vm2820_vm3, %vm2821_vm12  ;;  %vm2830_vm15 = vweird.f32 %v2780_v44 }
0x1089   :  { %v2813_v34 = vsel %vm2812_vm11, %v3831_v56, %v2809_v25  ;;  %v2816_v2 = vmul.f32 %v3833_v45, %v2815_v50 }
0x108a   :  { %v2866_v12 = vmul.f32 %v2813_v34, %v5675_v24  ;;  %v3286_v13 = vsel %vm135_vm1, %v2891_v17, %v5749_v9 }
0x108b   :  { %v2817_v32 = vmul.f32 0.5, %v2816_v2  ;;  %v2761_v40 = vpop.xlane.xlu2 %2760  ;;  %3605 = vmatmul.msk.f32.gmra.mxu3 %vm642_vm4, %v3286_v13 }
0x108c   :  { %v2773_v51 = vmul.f32 %v2761_v40, %v3988_v38  ;;  %v2875_v4 = vmul.f32 %v5774_v39, %v2866_v12 }
0x108d   :  { %v2818_v18 = vsub.f32 1.5, %v2817_v32 }
0x108e   :  { %v3835_v62 = vpop.eup %3834  ;;  %v2781_v19 = vadd.f32 1e-05, %v2773_v51  ;;  %v2884_v28 = vadd.f32 %v5780_v48, %v2875_v4 }
0x108f   :  { %v2819_v30 = vmul.f32 %v3833_v45, %v2818_v18  ;;  %v2825_v24 = vmul.f32 %v3835_v62, %v2780_v44  ;;  %vm2831_vm14 = vweird.f32 %v3835_v62 }
0x1090   :  { %3836 = vrsqrt.f32 %v2781_v19  ;;  %v2892_v9 = vmax.f32 %v2884_v28, 0.0  ;;  %vm2832_vm0 = vmor %vm2830_vm15, %vm2831_vm14  ;;  %vm2840_vm5 = vweird.f32 %v2781_v19 }
0x1091   :  { %v2823_v33 = vsel %vm2822_vm13, %v3833_v45, %v2819_v30  ;;  %v2826_v35 = vmul.f32 %v3835_v62, %v2825_v24 }
0x1092   :  { %v2867_v36 = vmul.f32 %v2823_v33, %v5682_v3  ;;  %v3287_v49 = vsel %vm135_vm1, %v2892_v9, %v5767_v42 }
0x1093   :  { %v2827_v59 = vmul.f32 0.5, %v2826_v35  ;;  %v2764_v14 = vpop.xlane.xlu0 %2763  ;;  %3606 = vmatmul.msk.f32.gmra.mxu3 %vm642_vm4, %v3287_v49  ;;  %v3268_v37 = vpop.permute.xlu1 %3267 }
0x1094   :  { %v2774_v26 = vmul.f32 %v2764_v14, %v3988_v38  ;;  %v2876_v8 = vmul.f32 %v5774_v39, %v2867_v36  ;;  %v3270_v11 = vpop.permute.xlu2 %3269 }
0x1095   :  { %v2828_v21 = vsub.f32 1.5, %v2827_v59 }
0x1096   :  { %v3837_v0 = vpop.eup %3836  ;;  %v2782_v56 = vadd.f32 1e-05, %v2774_v26  ;;  %v2885_v52 = vadd.f32 %v5780_v48, %v2876_v8 }
0x1097   :  { %v2829_v31 = vmul.f32 %v3835_v62, %v2828_v21  ;;  %v2835_v3 = vmul.f32 %v3837_v0, %v2781_v19  ;;  %vm2841_vm2 = vweird.f32 %v3837_v0 }
0x1098   :  { %3838 = vrsqrt.f32 %v2782_v56  ;;  %v2893_v42 = vmax.f32 %v2885_v52, 0.0  ;;  %vm2842_vm6 = vmor %vm2840_vm5, %vm2841_vm2  ;;  %vm2850_vm8 = vweird.f32 %v2782_v56  ;;  %v3387_v52 = vld [vmem:[%s5894_s2 + $0x1c8] sm:$0xff] }
0x1099   :  { %v2833_v20 = vsel %vm2832_vm0, %v3835_v62, %v2829_v31  ;;  %v2836_v29 = vmul.f32 %v3837_v0, %v2835_v3  ;;  %3426 = vmatpush.msra.mxu0 %v3387_v52  ;;  %v3386_v31 = vld [vmem:[%s5894_s2 + $0x1c0] sm:$0xff] }
0x109a   :  { %v2868_v47 = vmul.f32 %v2833_v20, %v5689_v23  ;;  %v3288_v27 = vsel %vm135_vm1, %v2893_v42, %v3268_v37 }
0x109b   :  { %v2837_v16 = vmul.f32 0.5, %v2836_v29  ;;  %3607 = vmatmul.msk.f32.gmra.mxu3 %vm642_vm4, %v3288_v27  ;;  %3427 = vmatpush.msra.mxu0 %v3386_v31 }
0x109c   :  { %v2877_v43 = vmul.f32 %v5774_v39, %v2868_v47  ;;  %v3272_v13 = vpop.permute.xlu2 %3271 }
0x109d   :  { %v2838_v7 = vsub.f32 1.5, %v2837_v16 }
0x109e   :  { %v3839_v57 = vpop.eup %3838  ;;  %v2886_v22 = vadd.f32 %v5780_v48, %v2877_v43 }
0x109f   :  { %v2839_v41 = vmul.f32 %v3837_v0, %v2838_v7  ;;  %v2845_v1 = vmul.f32 %v3839_v57, %v2782_v56  ;;  %vm2851_vm7 = vweird.f32 %v3839_v57 }
0x10a0   :  { %v2894_v45 = vmax.f32 %v2886_v22, 0.0  ;;  %vm2852_vm9 = vmor %vm2850_vm8, %vm2851_vm7 }
0x10a1   :  { %v2843_v44 = vsel %vm2842_vm6, %v3837_v0, %v2839_v41  ;;  %v2846_v23 = vmul.f32 %v3839_v57, %v2845_v1 }
0x10a2   :  { %v2869_v58 = vmul.f32 %v2843_v44, %v5698_v55  ;;  %v3289_v25 = vsel %vm135_vm1, %v2894_v45, %v3270_v11 }
0x10a3   :  { %v2847_v50 = vmul.f32 0.5, %v2846_v23  ;;  %3608 = vmatmul.msk.f32.gmra.mxu3 %vm642_vm4, %v3289_v25 }
0x10a4   :  { %v2878_v17 = vmul.f32 %v5774_v39, %v2869_v58  ;;  %v3274_v19 = vpop.permute.xlu2 %3273 }
0x10a5   :  { %v2848_v34 = vsub.f32 1.5, %v2847_v50 }
0x10a6   :  { %v2887_v2 = vadd.f32 %v5780_v48, %v2878_v17 }
0x10a7   :  { %v2849_v12 = vmul.f32 %v3839_v57, %v2848_v34 }
0x10a8   :  { %v2895_v32 = vmax.f32 %v2887_v2, 0.0 }
0x10a9   :  { %v2853_v40 = vsel %vm2852_vm9, %v3839_v57, %v2849_v12 }
0x10aa   :  { %v2870_v51 = vmul.f32 %v2853_v40, %v5707_v60  ;;  %v3290_v55 = vsel %vm135_vm1, %v2895_v32, %v3272_v13 }
0x10ab   :  { %3609 = vmatmul.msk.f32.gmra.mxu3 %vm642_vm4, %v3290_v55 }
0x10ac   :  { %v2879_v4 = vmul.f32 %v5774_v39, %v2870_v51 }
0x10ae   :  { %v2888_v18 = vadd.f32 %v5780_v48, %v2879_v4 }
0x10b0   :  { %v2896_v62 = vmax.f32 %v2888_v18, 0.0 }
0x10b2   :  { %v3291_v28 = vsel %vm135_vm1, %v2896_v62, %v3274_v19 }
0x10b3   :  { %3610 = vmatmul.msk.f32.gmra.mxu3 %vm642_vm4, %v3291_v28 }
0x10be   :  { %v2767_v30 = vpop.xlane.xlu1 %2766 }
0x10bf   :  { %v2775_v24 = vmul.f32 %v2767_v30, %v3988_v38  ;;  %v3276_v38 = vpop.permute.xlu0 %3275 }
0x10c1   :  { %v2783_v9 = vadd.f32 1e-05, %v2775_v24 }
0x10c3   :  { %3840 = vrsqrt.f32 %v2783_v9  ;;  %vm2860_vm11 = vweird.f32 %v2783_v9 }
0x10c9   :  { %v3841_v60 = vpop.eup %3840 }
0x10ca   :  { %v2855_v33 = vmul.f32 %v3841_v60, %v2783_v9  ;;  %vm2861_vm10 = vweird.f32 %v3841_v60 }
0x10cb   :  { %vm2862_vm12 = vmor %vm2860_vm11, %vm2861_vm10 }
0x10cc   :  { %v2856_v35 = vmul.f32 %v3841_v60, %v2855_v33 }
0x10ce   :  { %v2857_v36 = vmul.f32 0.5, %v2856_v35 }
0x10d0   :  { %v2858_v49 = vsub.f32 1.5, %v2857_v36 }
0x10d2   :  { %v2859_v59 = vmul.f32 %v3841_v60, %v2858_v49 }
0x10d4   :  { %v2863_v14 = vsel %vm2862_vm12, %v3841_v60, %v2859_v59 }
0x10d5   :  { %v2871_v26 = vmul.f32 %v2863_v14, %v5735_v46  ;;  %v3385_v46 = vld [vmem:[%s5894_s2 + $0x1b8] sm:$0xff] }
0x10d6   :  { %3428 = vmatpush.msra.mxu0 %v3385_v46 }
0x10d7   :  { %v2880_v8 = vmul.f32 %v5774_v39, %v2871_v26  ;;  %v3384_v39 = vld [vmem:[%s5894_s2 + $0x1b0] sm:$0xff] }
0x10d8   :  { %3429 = vmatpush.msra.mxu0 %v3384_v39 }
0x10d9   :  { %v2889_v21 = vadd.f32 %v5780_v48, %v2880_v8  ;;  %v3718_v48 = vld [vmem:[%s5896_s3 + $0x1b] ss:$0 sm:$0xff] }
0x10db   :  { %v2897_v0 = vmax.f32 %v2889_v21, 0.0 }
0x10dd   :  { %v3292_v56 = vsel %vm135_vm1, %v2897_v0, %v3276_v38 }
0x10de   :  { %3611 = vmatmul.msk.f32.gmra.mxu3 %vm642_vm4, %v3292_v56  ;;  %vm3463_vm4 = vcmask 64512  }
0x1106   :  { %v3344_v3 = vpop.f32.mrf.mxu3 }
0x1107   :  { %v3345_v42 = vadd.f32 %v3718_v48, %v3344_v3 }
0x1109   :  { %3842 = vtanh.f32 %v3345_v42 }
0x110e   :  { %v3347_v20 = vpop.f32.mrf.mxu3 }
0x110f   :  { %v3843_v29 = vpop.eup %3842  ;;  %v3348_v37 = vadd.f32 %v3718_v48, %v3347_v20 }
0x1110   :  { %v3376_v47 = vadd.f32 %v3843_v29, %v4878_v10 }
0x1111   :  { %3844 = vtanh.f32 %v3348_v37 }
0x1112   :  { %3612 = vmatmul.msk.f32.vlgmr.msra.gmra.mxu0 %vm135_vm1, %v3376_v47 }
0x1116   :  { %v3350_v27 = vpop.f32.mrf.mxu3 }
0x1117   :  { %v3845_v16 = vpop.eup %3844  ;;  %v3351_v43 = vadd.f32 %v3718_v48, %v3350_v27 }
0x1118   :  { %v3377_v7 = vadd.f32 %v3845_v16, %v4882_v6 }
0x1119   :  { %3846 = vtanh.f32 %v3351_v43 }
0x111a   :  { %3613 = vmatmul.msk.f32.gmra.mxu0 %vm135_vm1, %v3377_v7 }
0x111e   :  { %v3353_v11 = vpop.f32.mrf.mxu3 }
0x111f   :  { %v3847_v57 = vpop.eup %3846  ;;  %v3354_v22 = vadd.f32 %v3718_v48, %v3353_v11 }
0x1120   :  { %v3378_v41 = vadd.f32 %v3847_v57, %v4886_v54 }
0x1121   :  { %3848 = vtanh.f32 %v3354_v22 }
0x1122   :  { %3614 = vmatmul.msk.f32.gmra.mxu0 %vm135_vm1, %v3378_v41 }
0x1126   :  { %v3356_v10 = vpop.f32.mrf.mxu3 }
0x1127   :  { %v3849_v1 = vpop.eup %3848  ;;  %v3357_v45 = vadd.f32 %v3718_v48, %v3356_v10 }
0x1128   :  { %v3379_v44 = vadd.f32 %v3849_v1, %v4890_v61 }
0x1129   :  { %3850 = vtanh.f32 %v3357_v45 }
0x112a   :  { %3615 = vmatmul.msk.f32.gmra.mxu0 %vm135_vm1, %v3379_v44 }
0x112e   :  { %v3359_v6 = vpop.f32.mrf.mxu3 }
0x112f   :  { %v3851_v23 = vpop.eup %3850  ;;  %v3360_v58 = vadd.f32 %v3718_v48, %v3359_v6 }
0x1130   :  { %v3380_v25 = vadd.f32 %v3851_v23, %v4894_v53 }
0x1131   :  { %3852 = vtanh.f32 %v3360_v58 }
0x1132   :  { %3616 = vmatmul.msk.f32.gmra.mxu0 %vm135_vm1, %v3380_v25 }
0x1136   :  { %v3362_v54 = vpop.f32.mrf.mxu3 }
0x1137   :  { %v3853_v50 = vpop.eup %3852  ;;  %v3363_v17 = vadd.f32 %v3718_v48, %v3362_v54 }
0x1138   :  { %v3381_v34 = vadd.f32 %v3853_v50, %v4898_v15  ;;  %v3719_v15 = vld [vmem:[%s5896_s3 + $0x1c] ss:$0 sm:$0xff] }
0x1139   :  { %3854 = vtanh.f32 %v3363_v17 }
0x113a   :  { %3617 = vmatmul.msk.f32.gmra.mxu0 %vm135_vm1, %v3381_v34 }
0x113f   :  { %v3855_v61 = vpop.eup %3854 }
0x1140   :  { %v3382_v2 = vadd.f32 %v3855_v61, %v4908_v5 }
0x1142   :  { %3618 = vmatmul.msk.f32.gmra.mxu0 %vm135_vm1, %v3382_v2 }
0x1161   :  { %v3365_v12 = vpop.f32.mrf.mxu3 }
0x1162   :  { %v3366_v13 = vadd.f32 %v3718_v48, %v3365_v12 }
0x1164   :  { %3856 = vtanh.f32 %v3366_v13 }
0x116a   :  { %v3857_v53 = vpop.eup %3856 }
0x116b   :  { %v3383_v32 = vadd.f32 %v3857_v53, %v4913_v63 }
0x116d   :  { %3619 = vmatmul.msk.f32.gmra.mxu0 %vm135_vm1, %v3383_v32 }
0x118f   :  { %v3431_v40 = vpop.f32.mrf.mxu0 }
0x1190   :  { %v3432_v51 = vadd.f32 %v3719_v15, %v3431_v40 }
0x1192   :  { %3858 = vtanh.f32 %v3432_v51 }
0x1197   :  { %v3434_v55 = vpop.f32.mrf.mxu0 }
0x1198   :  { %v3859_v5 = vpop.eup %3858  ;;  %v3435_v4 = vadd.f32 %v3719_v15, %v3434_v55 }
0x1199   :  { %3464 = vst.msk [vmem:[%s5898_s4] sm:$0xff] %vm3463_vm4, %v3859_v5 }
0x119a   :  { %3860 = vtanh.f32 %v3435_v4 }
0x119f   :  { %v3437_v63 = vpop.f32.mrf.mxu0 }
0x11a0   :  { %v3861_v18 = vpop.eup %3860  ;;  %v3438_v62 = vadd.f32 %v3719_v15, %v3437_v63 }
0x11a1   :  { %3465 = vst.msk [vmem:[%s5898_s4 + $0x8] sm:$0xff] %vm3463_vm4, %v3861_v18 }
0x11a2   :  { %3862 = vtanh.f32 %v3438_v62 }
0x11a7   :  { %v3440_v19 = vpop.f32.mrf.mxu0 }
0x11a8   :  { %v3863_v28 = vpop.eup %3862  ;;  %v3441_v30 = vadd.f32 %v3719_v15, %v3440_v19 }
0x11a9   :  { %3466 = vst.msk [vmem:[%s5898_s4 + $0x10] sm:$0xff] %vm3463_vm4, %v3863_v28 }
0x11aa   :  { %3864 = vtanh.f32 %v3441_v30 }
0x11af   :  { %v3443_v24 = vpop.f32.mrf.mxu0 }
0x11b0   :  { %v3865_v9 = vpop.eup %3864  ;;  %v3444_v60 = vadd.f32 %v3719_v15, %v3443_v24 }
0x11b1   :  { %3467 = vst.msk [vmem:[%s5898_s4 + $0x18] sm:$0xff] %vm3463_vm4, %v3865_v9 }
0x11b2   :  { %3866 = vtanh.f32 %v3444_v60 }
0x11b7   :  { %v3446_v33 = vpop.f32.mrf.mxu0 }
0x11b8   :  { %v3867_v35 = vpop.eup %3866  ;;  %v3447_v36 = vadd.f32 %v3719_v15, %v3446_v33 }
0x11b9   :  { %3468 = vst.msk [vmem:[%s5898_s4 + $0x20] sm:$0xff] %vm3463_vm4, %v3867_v35 }
0x11ba   :  { %3868 = vtanh.f32 %v3447_v36 }
0x11bf   :  { %v3449_v49 = vpop.f32.mrf.mxu0 }
0x11c0   :  { %v3869_v59 = vpop.eup %3868  ;;  %v3450_v14 = vadd.f32 %v3719_v15, %v3449_v49 }
0x11c1   :  { %3469 = vst.msk [vmem:[%s5898_s4 + $0x28] sm:$0xff] %vm3463_vm4, %v3869_v59 }
0x11c2   :  { %3870 = vtanh.f32 %v3450_v14 }
0x11c8   :  { %v3871_v26 = vpop.eup %3870 }
0x11c9   :  { %3470 = vst.msk [vmem:[%s5898_s4 + $0x30] sm:$0xff] %vm3463_vm4, %v3871_v26 }
0x11ea   :  { %v3452_v8 = vpop.f32.mrf.mxu0 }
0x11eb   :  { %v3453_v21 = vadd.f32 %v3719_v15, %v3452_v8 }
0x11ed   :  { %3872 = vtanh.f32 %v3453_v21 }
0x11f3   :  { %v3873_v0 = vpop.eup %3872 }
0x11f4   :  { %3471 = vst.msk [vmem:[%s5898_s4 + $0x38] sm:$0xff] %vm3463_vm4, %v3873_v0 }

</bundles_post_ra>
